<compile_context>
chip_gen: v7x
topology: tpu7x:2x2x1
jax: 0.10.0
libtpu: 0.0.40
codegen_flags: <defaults>
</compile_context>

<pallas_src>
import functools
import math

import jax
import jax.numpy as jnp
from jax.experimental import pallas as pl
from jax.experimental.pallas import tpu as pltpu

A_BIT = 2          # activation quantization bits
W_BIT = 2          # weight quantization bits
RES_SCALE = 1.0    # res_scale default
_TAPS = tuple((dh, dw) for dh in (-1, 0, 1) for dw in (-1, 0, 1))  # t = kh*3 + kw


def _fake_quant(x, bit):
    """Per-tensor min/max uniform fake quantization to 2**bit levels (f32)."""
    levels = float(2 ** bit - 1)
    xmin = jnp.min(x, keepdims=True)
    xmax = jnp.max(x, keepdims=True)
    scale = (xmax - xmin) / levels
    safe = jnp.where(scale > 0, scale, 1.0)
    inv = 1.0 / safe
    xq = jnp.round((x - xmin) * inv) * safe + xmin
    return jnp.where(scale > 0, xq, x)


def _resblock_kernel(x_ref, mask_ref, w1_ref, b1_ref, w2_ref, b2_ref,
                     o_ref, xpad_ref, *, H, W, pad):
    HW = H * W
    C = x_ref.shape[1]

    # channel-major (C, HW) -> spatial-major (HW, C); all conv shifts below
    # are sublane (row) reads, matmul lanes stay 128-dense.
    x_s = x_ref[0].T                                     # (HW, C) f32

    # zero the spatial halo of the padded scratch once per sample
    zeros_halo = jnp.zeros((pad, C), jnp.float32)
    xpad_ref[pl.ds(0, pad), :] = zeros_halo
    xpad_ref[pl.ds(pad + HW, pad), :] = zeros_halo

    # Horizontal-wrap validity masks (sublane columns, broadcast over lanes).
    # Vertical out-of-range taps read the zero halo, so dw == 0 taps and all
    # top/bottom-row cases need no masking at all.
    mask_l = mask_ref[:, 0:1]    # 0 at image column w == 0      (dw = -1 taps)
    mask_r = mask_ref[:, 1:2]    # 0 at image column w == W - 1  (dw = +1 taps)

    def conv3x3(act_s, w_ref):
        """3x3 conv (padding=1): 9 shifted (HW,C)@(C,C) bf16 MXU matmuls."""
        xpad_ref[pl.ds(pad, HW), :] = act_s              # center of halo scratch
        acc = jnp.zeros((HW, C), jnp.float32)
        for t, (dh, dw) in enumerate(_TAPS):
            tap = xpad_ref[pl.ds(pad + dh * W + dw, HW), :]
            if dw == -1:
                tap = tap * mask_l
            elif dw == 1:
                tap = tap * mask_r
            acc = acc + jnp.dot(tap.astype(jnp.bfloat16), w_ref[t],
                                preferred_element_type=jnp.float32)
        return acc

    # quant1 -> conv1 -> ReLU
    xq_s = _fake_quant(x_s, A_BIT)
    out1 = jnp.maximum(conv3x3(xq_s, w1_ref) + b1_ref[...], 0.0)

    # quant2 -> conv2
    oq_s = _fake_quant(out1, A_BIT)
    res_s = conv3x3(oq_s, w2_ref) + b2_ref[...]

    # res * res_scale + x, back to channel-major (lane-dense store)
    o_ref[0] = (res_s * RES_SCALE + x_s).T


def _build_col_masks(H, W):
    """(HW, 2) f32 {0,1}: horizontal validity for dw = -1 / dw = +1 taps."""
    HW = H * W
    w = jnp.arange(HW, dtype=jnp.int32) % W
    mask_l = (w != 0).astype(jnp.float32)        # output col 0 invalid for dw=-1
    mask_r = (w != W - 1).astype(jnp.float32)    # output col W-1 invalid for dw=+1
    return jnp.stack([mask_l, mask_r], axis=1)


@jax.jit
def res_block_daq(x_nchw, params):
    """x_nchw: (N, C, H, W) f32 -> (N, C, H, W) f32."""
    w1t, b1, w2t, b2 = params
    N, C, H, W = x_nchw.shape
    HW = H * W
    pad = ((W + 1) + 7) // 8 * 8            # halo rows, sublane-aligned, >= W+1

    x_mat = x_nchw.reshape(N, C, HW)        # free view, no HBM transpose
    masks = _build_col_masks(H, W)

    kernel = functools.partial(_resblock_kernel, H=H, W=W, pad=pad)
    flops = 2 * 9 * 2 * HW * C * C * N
    bytes_accessed = (2 * N * C * HW * 4 + 2 * 9 * C * C * 2
                      + HW * 2 * 4 + 2 * C * 4)

    out = pl.pallas_call(
        kernel,
        out_shape=jax.ShapeDtypeStruct((N, C, HW), jnp.float32),
        grid=(N,),
        in_specs=[
            pl.BlockSpec((1, C, HW), lambda n: (n, 0, 0)),   # x (f32)
            pl.BlockSpec((HW, 2), lambda n: (0, 0)),          # column validity masks
            pl.BlockSpec((9, C, C), lambda n: (0, 0, 0)),     # conv1 taps (bf16)
            pl.BlockSpec((1, C), lambda n: (0, 0)),           # conv1 bias
            pl.BlockSpec((9, C, C), lambda n: (0, 0, 0)),     # conv2 taps (bf16)
            pl.BlockSpec((1, C), lambda n: (0, 0)),           # conv2 bias
        ],
        out_specs=pl.BlockSpec((1, C, HW), lambda n: (n, 0, 0)),
        scratch_shapes=[pltpu.VMEM((HW + 2 * pad, C), jnp.float32)],
        compiler_params=pltpu.CompilerParams(
            dimension_semantics=("parallel",)),
        cost_estimate=pl.CostEstimate(
            flops=flops, transcendentals=0, bytes_accessed=bytes_accessed),
    )(x_mat, masks, w1t, b1, w2t, b2)

    return out.reshape(N, C, H, W)


def init_params(key, n_feats):
    """Conv weights stored per-tap as (9, Cin, Cout) bf16 with t = kh*3 + kw."""
    C = n_feats
    fan_in = C * 9                           # 3x3 conv fan-in
    bound = 1.0 / math.sqrt(fan_in)
    k1, k2, k3, k4 = jax.random.split(key, 4)

    def qconv_w(k):
        w = jax.random.uniform(k, (9, C, C), jnp.float32, -bound, bound)
        return _fake_quant(w, W_BIT).astype(jnp.bfloat16)   # Conv2d_Q weight quant

    def conv_b(k):
        return jax.random.uniform(k, (1, C), jnp.float32, -bound, bound)

    return qconv_w(k1), conv_b(k2), qconv_w(k3), conv_b(k4)


def _taps_to_oihw(w_taps):
    t, cin, cout = w_taps.shape
    return jnp.transpose(w_taps, (2, 1, 0)).reshape(cout, cin, 3, 3)


@jax.jit
def reference(x_nchw, params):
    """Independent plain-JAX reference (lax.conv) with identical quant math."""
    w1t, b1, w2t, b2 = params
    N, C, H, W = x_nchw.shape
    w1 = _taps_to_oihw(w1t)
    w2 = _taps_to_oihw(w2t)

    def conv(v, w):    # v: (C, H, W) f32, w: (O, I, 3, 3) bf16
        y = jax.lax.conv_general_dilated(
            v[None].astype(jnp.bfloat16), w,
            window_strides=(1, 1), padding=((1, 1), (1, 1)),
            dimension_numbers=("NCHW", "OIHW", "NCHW"),
            preferred_element_type=jnp.float32)
        return y[0]

    def one(xc):
        xq = _fake_quant(xc, A_BIT)
        out1 = jnp.maximum(conv(xq, w1) + b1.reshape(C, 1, 1), 0.0)
        oq = _fake_quant(out1, A_BIT)
        res = conv(oq, w2) + b2.reshape(C, 1, 1)
        return res * RES_SCALE + xc

    return jax.vmap(one)(x_nchw)


if __name__ == "__main__":
    N, C, H, W = 2, 128, 16, 16
    key = jax.random.PRNGKey(0)
    kx, kp = jax.random.split(key)
    x = jax.random.normal(kx, (N, C, H, W), jnp.float32)
    params = init_params(kp, C)

    out = jax.block_until_ready(res_block_daq(x, params))
    assert out.shape == (N, C, H, W) and out.dtype == jnp.float32

    ref = reference(x, params)
    diff = jnp.abs(out - ref)
    tol = 1e-2 + 1e-2 * jnp.abs(ref)
    frac_ok = float(jnp.mean((diff <= tol).astype(jnp.float32)))
    mean_err = float(jnp.mean(diff))
    # bf16 MXU accumulation-order differences can flip a handful of elements
    # of the data-dependent fake quantizer by one level; require a near-total
    # elementwise match plus a tiny mean error instead of strict allclose.
    assert frac_ok > 0.97 and mean_err < 2e-2, (frac_ok, mean_err)

    print("KERNEL_OK")
</pallas_src>

<mosaic_0001>
module attributes {stable_mosaic.version = 11 : i64} {
  func.func @_resblock_kernel(%arg0: i32, %arg1: memref<1x128x256xf32, #tpu.memory_space<vmem>>, %arg2: memref<256x2xf32, #tpu.memory_space<vmem>>, %arg3: memref<9x128x128xbf16, #tpu.memory_space<vmem>>, %arg4: memref<1x128xf32, #tpu.memory_space<vmem>>, %arg5: memref<9x128x128xbf16, #tpu.memory_space<vmem>>, %arg6: memref<1x128xf32, #tpu.memory_space<vmem>>, %arg7: memref<1x128x256xf32, #tpu.memory_space<vmem>>, %arg8: memref<304x128xf32, #tpu.memory_space<vmem>>) attributes {dimension_semantics = [#tpu.dimension_semantics<parallel>], iteration_bounds = array<i64: 2>, scalar_prefetch = 0 : i64, scratch_operands = 1 : i64, tpu.core_type = #tpu.core_type<tc>, window_params = [{transform_indices = @transform_0, window_bounds = array<i64: 1, 128, 256>}, {pipeline_mode = #tpu.pipeline_mode<synchronous>, transform_indices = @transform_1, window_bounds = array<i64: 256, 2>}, {pipeline_mode = #tpu.pipeline_mode<synchronous>, transform_indices = @transform_2, window_bounds = array<i64: 9, 128, 128>}, {pipeline_mode = #tpu.pipeline_mode<synchronous>, transform_indices = @transform_3, window_bounds = array<i64: 1, 128>}, {pipeline_mode = #tpu.pipeline_mode<synchronous>, transform_indices = @transform_4, window_bounds = array<i64: 9, 128, 128>}, {pipeline_mode = #tpu.pipeline_mode<synchronous>, transform_indices = @transform_5, window_bounds = array<i64: 1, 128>}, {transform_indices = @transform_6, window_bounds = array<i64: 1, 128, 256>}]} {
    %c0 = arith.constant 0 : index
    %c0_0 = arith.constant 0 : index
    %c0_1 = arith.constant 0 : index
    %0 = vector.load %arg1[%c0, %c0_0, %c0_1] : memref<1x128x256xf32, #tpu.memory_space<vmem>>, vector<1x128x256xf32>
    %1 = vector.shape_cast %0 : vector<1x128x256xf32> to vector<128x256xf32>
    %2 = tpu.transpose %1, [1, 0] : vector<128x256xf32> -> vector<256x128xf32>
    %cst = arith.constant 0.000000e+00 : f32
    %3 = vector.broadcast %cst : f32 to vector<24x128xf32>
    %c0_2 = arith.constant 0 : index
    %c0_3 = arith.constant 0 : index
    %4 = vector.load %arg8[%c0_2, %c0_3] : memref<304x128xf32, #tpu.memory_space<vmem>>, vector<24x128xf32>
    tpu.vector_store %arg8[%c0_2, %c0_3], %3 {strides = array<i32>} : memref<304x128xf32, #tpu.memory_space<vmem>>, vector<24x128xf32>,
    %c280 = arith.constant 280 : index
    %c0_4 = arith.constant 0 : index
    %5 = vector.load %arg8[%c280, %c0_4] : memref<304x128xf32, #tpu.memory_space<vmem>>, vector<24x128xf32>
    tpu.vector_store %arg8[%c280, %c0_4], %3 {strides = array<i32>} : memref<304x128xf32, #tpu.memory_space<vmem>>, vector<24x128xf32>,
    %c0_5 = arith.constant 0 : index
    %c0_6 = arith.constant 0 : index
    %6 = vector.load %arg2[%c0_5, %c0_6] : memref<256x2xf32, #tpu.memory_space<vmem>>, vector<256x1xf32>
    %c0_7 = arith.constant 0 : index
    %c1 = arith.constant 1 : index
    %7 = vector.load %arg2[%c0_7, %c1] : memref<256x2xf32, #tpu.memory_space<vmem>>, vector<256x1xf32>
    %8 = vector.shape_cast %2 : vector<256x128xf32> to vector<1x256x128xf32>
    %cst_8 = arith.constant dense<0x7F800000> : vector<1xf32>
    %9 = vector.multi_reduction <minimumf>, %8, %cst_8 [1, 2] : vector<1x256x128xf32> to vector<1xf32>
    %10 = vector.shape_cast %9 : vector<1xf32> to vector<1x1x1xf32>
    %11 = vector.extract %10[0, 0, 0] : f32 from vector<1x1x1xf32>
    %12 = vector.broadcast %11 : f32 to vector<1x1xf32>
    %13 = vector.shape_cast %2 : vector<256x128xf32> to vector<1x256x128xf32>
    %cst_9 = arith.constant dense<0xFF800000> : vector<1xf32>
    %14 = vector.multi_reduction <maximumf>, %13, %cst_9 [1, 2] : vector<1x256x128xf32> to vector<1xf32>
    %15 = vector.shape_cast %14 : vector<1xf32> to vector<1x1x1xf32>
    %16 = vector.extract %15[0, 0, 0] : f32 from vector<1x1x1xf32>
    %17 = vector.broadcast %16 : f32 to vector<1x1xf32>
    %18 = arith.subf %17, %12 : vector<1x1xf32>
    %cst_10 = arith.constant 3.000000e+00 : f32
    %19 = vector.broadcast %cst_10 : f32 to vector<1x1xf32>
    %20 = arith.divf %18, %19 : vector<1x1xf32>
    %cst_11 = arith.constant 0.000000e+00 : f32
    %21 = vector.broadcast %cst_11 : f32 to vector<1x1xf32>
    %22 = arith.cmpf ogt, %20, %21 : vector<1x1xf32>
    %cst_12 = arith.constant 1.000000e+00 : f32
    %23 = vector.broadcast %cst_12 : f32 to vector<1x1xf32>
    %24 = arith.select %22, %20, %23 : vector<1x1xi1>, vector<1x1xf32>
    %cst_13 = arith.constant 1.000000e+00 : f32
    %25 = vector.broadcast %cst_13 : f32 to vector<1x1xf32>
    %26 = arith.divf %25, %24 : vector<1x1xf32>
    %27 = vector.broadcast %12 : vector<1x1xf32> to vector<256x128xf32>
    %28 = arith.subf %2, %27 : vector<256x128xf32>
    %29 = vector.broadcast %26 : vector<1x1xf32> to vector<256x128xf32>
    %30 = arith.mulf %28, %29 : vector<256x128xf32>
    %31 = math.roundeven %30 : vector<256x128xf32>
    %32 = vector.broadcast %24 : vector<1x1xf32> to vector<256x128xf32>
    %33 = arith.mulf %31, %32 : vector<256x128xf32>
    %34 = vector.broadcast %12 : vector<1x1xf32> to vector<256x128xf32>
    %35 = arith.addf %33, %34 : vector<256x128xf32>
    %cst_14 = arith.constant 0.000000e+00 : f32
    %36 = vector.broadcast %cst_14 : f32 to vector<1x1xf32>
    %37 = arith.cmpf ogt, %20, %36 : vector<1x1xf32>
    %38 = vector.shape_cast %37 : vector<1x1xi1> to vector<1x1xi1>
    %39 = vector.broadcast %38 : vector<1x1xi1> to vector<256x128xi1>
    %40 = arith.select %39, %35, %2 : vector<256x128xi1>, vector<256x128xf32>
    %c24 = arith.constant 24 : index
    %c0_15 = arith.constant 0 : index
    %41 = vector.load %arg8[%c24, %c0_15] : memref<304x128xf32, #tpu.memory_space<vmem>>, vector<256x128xf32>
    tpu.vector_store %arg8[%c24, %c0_15], %40 {strides = array<i32>} : memref<304x128xf32, #tpu.memory_space<vmem>>, vector<256x128xf32>,
    %cst_16 = arith.constant 0.000000e+00 : f32
    %42 = vector.broadcast %cst_16 : f32 to vector<256x128xf32>
    %c7 = arith.constant 7 : index
    %c0_17 = arith.constant 0 : index
    %43 = vector.load %arg8[%c7, %c0_17] : memref<304x128xf32, #tpu.memory_space<vmem>>, vector<256x128xf32>
    %44 = vector.broadcast %6 : vector<256x1xf32> to vector<256x128xf32>
    %45 = arith.mulf %43, %44 : vector<256x128xf32>
    %46 = arith.truncf %45 : vector<256x128xf32> to vector<256x128xbf16>
    %c0_18 = arith.constant 0 : index
    %c0_19 = arith.constant 0 : index
    %c0_20 = arith.constant 0 : index
    %47 = vector.load %arg3[%c0_18, %c0_19, %c0_20] : memref<9x128x128xbf16, #tpu.memory_space<vmem>>, vector<1x128x128xbf16>
    %48 = vector.shape_cast %47 : vector<1x128x128xbf16> to vector<128x128xbf16>
    %cst_21 = arith.constant dense<0.000000e+00> : vector<256x128xf32>
    %49 = tpu.matmul %46, %48, %cst_21 {dimension_numbers = #tpu.dot_dimension_numbers<[1], [0], [0], [1], [0, 0, 1, 1], [], []>} : vector<256x128xbf16>, vector<128x128xbf16>, vector<256x128xf32> -> vector<256x128xf32>
    %50 = arith.addf %42, %49 : vector<256x128xf32>
    %c8 = arith.constant 8 : index
    %c0_22 = arith.constant 0 : index
    %51 = vector.load %arg8[%c8, %c0_22] : memref<304x128xf32, #tpu.memory_space<vmem>>, vector<256x128xf32>
    %52 = arith.truncf %51 : vector<256x128xf32> to vector<256x128xbf16>
    %c1_23 = arith.constant 1 : index
    %c0_24 = arith.constant 0 : index
    %c0_25 = arith.constant 0 : index
    %53 = vector.load %arg3[%c1_23, %c0_24, %c0_25] : memref<9x128x128xbf16, #tpu.memory_space<vmem>>, vector<1x128x128xbf16>
    %54 = vector.shape_cast %53 : vector<1x128x128xbf16> to vector<128x128xbf16>
    %cst_26 = arith.constant dense<0.000000e+00> : vector<256x128xf32>
    %55 = tpu.matmul %52, %54, %cst_26 {dimension_numbers = #tpu.dot_dimension_numbers<[1], [0], [0], [1], [0, 0, 1, 1], [], []>} : vector<256x128xbf16>, vector<128x128xbf16>, vector<256x128xf32> -> vector<256x128xf32>
    %56 = arith.addf %50, %55 : vector<256x128xf32>
    %c9 = arith.constant 9 : index
    %c0_27 = arith.constant 0 : index
    %57 = vector.load %arg8[%c9, %c0_27] : memref<304x128xf32, #tpu.memory_space<vmem>>, vector<256x128xf32>
    %58 = vector.broadcast %7 : vector<256x1xf32> to vector<256x128xf32>
    %59 = arith.mulf %57, %58 : vector<256x128xf32>
    %60 = arith.truncf %59 : vector<256x128xf32> to vector<256x128xbf16>
    %c2 = arith.constant 2 : index
    %c0_28 = arith.constant 0 : index
    %c0_29 = arith.constant 0 : index
    %61 = vector.load %arg3[%c2, %c0_28, %c0_29] : memref<9x128x128xbf16, #tpu.memory_space<vmem>>, vector<1x128x128xbf16>
    %62 = vector.shape_cast %61 : vector<1x128x128xbf16> to vector<128x128xbf16>
    %cst_30 = arith.constant dense<0.000000e+00> : vector<256x128xf32>
    %63 = tpu.matmul %60, %62, %cst_30 {dimension_numbers = #tpu.dot_dimension_numbers<[1], [0], [0], [1], [0, 0, 1, 1], [], []>} : vector<256x128xbf16>, vector<128x128xbf16>, vector<256x128xf32> -> vector<256x128xf32>
    %64 = arith.addf %56, %63 : vector<256x128xf32>
    %c23 = arith.constant 23 : index
    %c0_31 = arith.constant 0 : index
    %65 = vector.load %arg8[%c23, %c0_31] : memref<304x128xf32, #tpu.memory_space<vmem>>, vector<256x128xf32>
    %66 = vector.broadcast %6 : vector<256x1xf32> to vector<256x128xf32>
    %67 = arith.mulf %65, %66 : vector<256x128xf32>
    %68 = arith.truncf %67 : vector<256x128xf32> to vector<256x128xbf16>
    %c3 = arith.constant 3 : index
    %c0_32 = arith.constant 0 : index
    %c0_33 = arith.constant 0 : index
    %69 = vector.load %arg3[%c3, %c0_32, %c0_33] : memref<9x128x128xbf16, #tpu.memory_space<vmem>>, vector<1x128x128xbf16>
    %70 = vector.shape_cast %69 : vector<1x128x128xbf16> to vector<128x128xbf16>
    %cst_34 = arith.constant dense<0.000000e+00> : vector<256x128xf32>
    %71 = tpu.matmul %68, %70, %cst_34 {dimension_numbers = #tpu.dot_dimension_numbers<[1], [0], [0], [1], [0, 0, 1, 1], [], []>} : vector<256x128xbf16>, vector<128x128xbf16>, vector<256x128xf32> -> vector<256x128xf32>
    %72 = arith.addf %64, %71 : vector<256x128xf32>
    %c24_35 = arith.constant 24 : index
    %c0_36 = arith.constant 0 : index
    %73 = vector.load %arg8[%c24_35, %c0_36] : memref<304x128xf32, #tpu.memory_space<vmem>>, vector<256x128xf32>
    %74 = arith.truncf %73 : vector<256x128xf32> to vector<256x128xbf16>
    %c4 = arith.constant 4 : index
    %c0_37 = arith.constant 0 : index
    %c0_38 = arith.constant 0 : index
    %75 = vector.load %arg3[%c4, %c0_37, %c0_38] : memref<9x128x128xbf16, #tpu.memory_space<vmem>>, vector<1x128x128xbf16>
    %76 = vector.shape_cast %75 : vector<1x128x128xbf16> to vector<128x128xbf16>
    %cst_39 = arith.constant dense<0.000000e+00> : vector<256x128xf32>
    %77 = tpu.matmul %74, %76, %cst_39 {dimension_numbers = #tpu.dot_dimension_numbers<[1], [0], [0], [1], [0, 0, 1, 1], [], []>} : vector<256x128xbf16>, vector<128x128xbf16>, vector<256x128xf32> -> vector<256x128xf32>
    %78 = arith.addf %72, %77 : vector<256x128xf32>
    %c25 = arith.constant 25 : index
    %c0_40 = arith.constant 0 : index
    %79 = vector.load %arg8[%c25, %c0_40] : memref<304x128xf32, #tpu.memory_space<vmem>>, vector<256x128xf32>
    %80 = vector.broadcast %7 : vector<256x1xf32> to vector<256x128xf32>
    %81 = arith.mulf %79, %80 : vector<256x128xf32>
    %82 = arith.truncf %81 : vector<256x128xf32> to vector<256x128xbf16>
    %c5 = arith.constant 5 : index
    %c0_41 = arith.constant 0 : index
    %c0_42 = arith.constant 0 : index
    %83 = vector.load %arg3[%c5, %c0_41, %c0_42] : memref<9x128x128xbf16, #tpu.memory_space<vmem>>, vector<1x128x128xbf16>
    %84 = vector.shape_cast %83 : vector<1x128x128xbf16> to vector<128x128xbf16>
    %cst_43 = arith.constant dense<0.000000e+00> : vector<256x128xf32>
    %85 = tpu.matmul %82, %84, %cst_43 {dimension_numbers = #tpu.dot_dimension_numbers<[1], [0], [0], [1], [0, 0, 1, 1], [], []>} : vector<256x128xbf16>, vector<128x128xbf16>, vector<256x128xf32> -> vector<256x128xf32>
    %86 = arith.addf %78, %85 : vector<256x128xf32>
    %c39 = arith.constant 39 : index
    %c0_44 = arith.constant 0 : index
    %87 = vector.load %arg8[%c39, %c0_44] : memref<304x128xf32, #tpu.memory_space<vmem>>, vector<256x128xf32>
    %88 = vector.broadcast %6 : vector<256x1xf32> to vector<256x128xf32>
    %89 = arith.mulf %87, %88 : vector<256x128xf32>
    %90 = arith.truncf %89 : vector<256x128xf32> to vector<256x128xbf16>
    %c6 = arith.constant 6 : index
    %c0_45 = arith.constant 0 : index
    %c0_46 = arith.constant 0 : index
    %91 = vector.load %arg3[%c6, %c0_45, %c0_46] : memref<9x128x128xbf16, #tpu.memory_space<vmem>>, vector<1x128x128xbf16>
    %92 = vector.shape_cast %91 : vector<1x128x128xbf16> to vector<128x128xbf16>
    %cst_47 = arith.constant dense<0.000000e+00> : vector<256x128xf32>
    %93 = tpu.matmul %90, %92, %cst_47 {dimension_numbers = #tpu.dot_dimension_numbers<[1], [0], [0], [1], [0, 0, 1, 1], [], []>} : vector<256x128xbf16>, vector<128x128xbf16>, vector<256x128xf32> -> vector<256x128xf32>
    %94 = arith.addf %86, %93 : vector<256x128xf32>
    %c40 = arith.constant 40 : index
    %c0_48 = arith.constant 0 : index
    %95 = vector.load %arg8[%c40, %c0_48] : memref<304x128xf32, #tpu.memory_space<vmem>>, vector<256x128xf32>
    %96 = arith.truncf %95 : vector<256x128xf32> to vector<256x128xbf16>
    %c7_49 = arith.constant 7 : index
    %c0_50 = arith.constant 0 : index
    %c0_51 = arith.constant 0 : index
    %97 = vector.load %arg3[%c7_49, %c0_50, %c0_51] : memref<9x128x128xbf16, #tpu.memory_space<vmem>>, vector<1x128x128xbf16>
    %98 = vector.shape_cast %97 : vector<1x128x128xbf16> to vector<128x128xbf16>
    %cst_52 = arith.constant dense<0.000000e+00> : vector<256x128xf32>
    %99 = tpu.matmul %96, %98, %cst_52 {dimension_numbers = #tpu.dot_dimension_numbers<[1], [0], [0], [1], [0, 0, 1, 1], [], []>} : vector<256x128xbf16>, vector<128x128xbf16>, vector<256x128xf32> -> vector<256x128xf32>
    %100 = arith.addf %94, %99 : vector<256x128xf32>
    %c41 = arith.constant 41 : index
    %c0_53 = arith.constant 0 : index
    %101 = vector.load %arg8[%c41, %c0_53] : memref<304x128xf32, #tpu.memory_space<vmem>>, vector<256x128xf32>
    %102 = vector.broadcast %7 : vector<256x1xf32> to vector<256x128xf32>
    %103 = arith.mulf %101, %102 : vector<256x128xf32>
    %104 = arith.truncf %103 : vector<256x128xf32> to vector<256x128xbf16>
    %c8_54 = arith.constant 8 : index
    %c0_55 = arith.constant 0 : index
    %c0_56 = arith.constant 0 : index
    %105 = vector.load %arg3[%c8_54, %c0_55, %c0_56] : memref<9x128x128xbf16, #tpu.memory_space<vmem>>, vector<1x128x128xbf16>
    %106 = vector.shape_cast %105 : vector<1x128x128xbf16> to vector<128x128xbf16>
    %cst_57 = arith.constant dense<0.000000e+00> : vector<256x128xf32>
    %107 = tpu.matmul %104, %106, %cst_57 {dimension_numbers = #tpu.dot_dimension_numbers<[1], [0], [0], [1], [0, 0, 1, 1], [], []>} : vector<256x128xbf16>, vector<128x128xbf16>, vector<256x128xf32> -> vector<256x128xf32>
    %108 = arith.addf %100, %107 : vector<256x128xf32>
    %c0_58 = arith.constant 0 : index
    %c0_59 = arith.constant 0 : index
    %109 = vector.load %arg4[%c0_58, %c0_59] : memref<1x128xf32, #tpu.memory_space<vmem>>, vector<1x128xf32>
    %110 = vector.broadcast %109 : vector<1x128xf32> to vector<256x128xf32>
    %111 = arith.addf %108, %110 : vector<256x128xf32>
    %cst_60 = arith.constant 0.000000e+00 : f32
    %112 = vector.broadcast %cst_60 : f32 to vector<256x128xf32>
    %113 = arith.maximumf %111, %112 : vector<256x128xf32>
    %114 = vector.shape_cast %113 : vector<256x128xf32> to vector<1x256x128xf32>
    %cst_61 = arith.constant dense<0x7F800000> : vector<1xf32>
    %115 = vector.multi_reduction <minimumf>, %114, %cst_61 [1, 2] : vector<1x256x128xf32> to vector<1xf32>
    %116 = vector.shape_cast %115 : vector<1xf32> to vector<1x1x1xf32>
    %117 = vector.extract %116[0, 0, 0] : f32 from vector<1x1x1xf32>
    %118 = vector.broadcast %117 : f32 to vector<1x1xf32>
    %119 = vector.shape_cast %113 : vector<256x128xf32> to vector<1x256x128xf32>
    %cst_62 = arith.constant dense<0xFF800000> : vector<1xf32>
    %120 = vector.multi_reduction <maximumf>, %119, %cst_62 [1, 2] : vector<1x256x128xf32> to vector<1xf32>
    %121 = vector.shape_cast %120 : vector<1xf32> to vector<1x1x1xf32>
    %122 = vector.extract %121[0, 0, 0] : f32 from vector<1x1x1xf32>
    %123 = vector.broadcast %122 : f32 to vector<1x1xf32>
    %124 = arith.subf %123, %118 : vector<1x1xf32>
    %cst_63 = arith.constant 3.000000e+00 : f32
    %125 = vector.broadcast %cst_63 : f32 to vector<1x1xf32>
    %126 = arith.divf %124, %125 : vector<1x1xf32>
    %cst_64 = arith.constant 0.000000e+00 : f32
    %127 = vector.broadcast %cst_64 : f32 to vector<1x1xf32>
    %128 = arith.cmpf ogt, %126, %127 : vector<1x1xf32>
    %cst_65 = arith.constant 1.000000e+00 : f32
    %129 = vector.broadcast %cst_65 : f32 to vector<1x1xf32>
    %130 = arith.select %128, %126, %129 : vector<1x1xi1>, vector<1x1xf32>
    %cst_66 = arith.constant 1.000000e+00 : f32
    %131 = vector.broadcast %cst_66 : f32 to vector<1x1xf32>
    %132 = arith.divf %131, %130 : vector<1x1xf32>
    %133 = vector.broadcast %118 : vector<1x1xf32> to vector<256x128xf32>
    %134 = arith.subf %113, %133 : vector<256x128xf32>
    %135 = vector.broadcast %132 : vector<1x1xf32> to vector<256x128xf32>
    %136 = arith.mulf %134, %135 : vector<256x128xf32>
    %137 = math.roundeven %136 : vector<256x128xf32>
    %138 = vector.broadcast %130 : vector<1x1xf32> to vector<256x128xf32>
    %139 = arith.mulf %137, %138 : vector<256x128xf32>
    %140 = vector.broadcast %118 : vector<1x1xf32> to vector<256x128xf32>
    %141 = arith.addf %139, %140 : vector<256x128xf32>
    %cst_67 = arith.constant 0.000000e+00 : f32
    %142 = vector.broadcast %cst_67 : f32 to vector<1x1xf32>
    %143 = arith.cmpf ogt, %126, %142 : vector<1x1xf32>
    %144 = vector.shape_cast %143 : vector<1x1xi1> to vector<1x1xi1>
    %145 = vector.broadcast %144 : vector<1x1xi1> to vector<256x128xi1>
    %146 = arith.select %145, %141, %113 : vector<256x128xi1>, vector<256x128xf32>
    %c24_68 = arith.constant 24 : index
    %c0_69 = arith.constant 0 : index
    %147 = vector.load %arg8[%c24_68, %c0_69] : memref<304x128xf32, #tpu.memory_space<vmem>>, vector<256x128xf32>
    tpu.vector_store %arg8[%c24_68, %c0_69], %146 {strides = array<i32>} : memref<304x128xf32, #tpu.memory_space<vmem>>, vector<256x128xf32>,
    %cst_70 = arith.constant 0.000000e+00 : f32
    %148 = vector.broadcast %cst_70 : f32 to vector<256x128xf32>
    %c7_71 = arith.constant 7 : index
    %c0_72 = arith.constant 0 : index
    %149 = vector.load %arg8[%c7_71, %c0_72] : memref<304x128xf32, #tpu.memory_space<vmem>>, vector<256x128xf32>
    %150 = vector.broadcast %6 : vector<256x1xf32> to vector<256x128xf32>
    %151 = arith.mulf %149, %150 : vector<256x128xf32>
    %152 = arith.truncf %151 : vector<256x128xf32> to vector<256x128xbf16>
    %c0_73 = arith.constant 0 : index
    %c0_74 = arith.constant 0 : index
    %c0_75 = arith.constant 0 : index
    %153 = vector.load %arg5[%c0_73, %c0_74, %c0_75] : memref<9x128x128xbf16, #tpu.memory_space<vmem>>, vector<1x128x128xbf16>
    %154 = vector.shape_cast %153 : vector<1x128x128xbf16> to vector<128x128xbf16>
    %cst_76 = arith.constant dense<0.000000e+00> : vector<256x128xf32>
    %155 = tpu.matmul %152, %154, %cst_76 {dimension_numbers = #tpu.dot_dimension_numbers<[1], [0], [0], [1], [0, 0, 1, 1], [], []>} : vector<256x128xbf16>, vector<128x128xbf16>, vector<256x128xf32> -> vector<256x128xf32>
    %156 = arith.addf %148, %155 : vector<256x128xf32>
    %c8_77 = arith.constant 8 : index
    %c0_78 = arith.constant 0 : index
    %157 = vector.load %arg8[%c8_77, %c0_78] : memref<304x128xf32, #tpu.memory_space<vmem>>, vector<256x128xf32>
    %158 = arith.truncf %157 : vector<256x128xf32> to vector<256x128xbf16>
    %c1_79 = arith.constant 1 : index
    %c0_80 = arith.constant 0 : index
    %c0_81 = arith.constant 0 : index
    %159 = vector.load %arg5[%c1_79, %c0_80, %c0_81] : memref<9x128x128xbf16, #tpu.memory_space<vmem>>, vector<1x128x128xbf16>
    %160 = vector.shape_cast %159 : vector<1x128x128xbf16> to vector<128x128xbf16>
    %cst_82 = arith.constant dense<0.000000e+00> : vector<256x128xf32>
    %161 = tpu.matmul %158, %160, %cst_82 {dimension_numbers = #tpu.dot_dimension_numbers<[1], [0], [0], [1], [0, 0, 1, 1], [], []>} : vector<256x128xbf16>, vector<128x128xbf16>, vector<256x128xf32> -> vector<256x128xf32>
    %162 = arith.addf %156, %161 : vector<256x128xf32>
    %c9_83 = arith.constant 9 : index
    %c0_84 = arith.constant 0 : index
    %163 = vector.load %arg8[%c9_83, %c0_84] : memref<304x128xf32, #tpu.memory_space<vmem>>, vector<256x128xf32>
    %164 = vector.broadcast %7 : vector<256x1xf32> to vector<256x128xf32>
    %165 = arith.mulf %163, %164 : vector<256x128xf32>
    %166 = arith.truncf %165 : vector<256x128xf32> to vector<256x128xbf16>
    %c2_85 = arith.constant 2 : index
    %c0_86 = arith.constant 0 : index
    %c0_87 = arith.constant 0 : index
    %167 = vector.load %arg5[%c2_85, %c0_86, %c0_87] : memref<9x128x128xbf16, #tpu.memory_space<vmem>>, vector<1x128x128xbf16>
    %168 = vector.shape_cast %167 : vector<1x128x128xbf16> to vector<128x128xbf16>
    %cst_88 = arith.constant dense<0.000000e+00> : vector<256x128xf32>
    %169 = tpu.matmul %166, %168, %cst_88 {dimension_numbers = #tpu.dot_dimension_numbers<[1], [0], [0], [1], [0, 0, 1, 1], [], []>} : vector<256x128xbf16>, vector<128x128xbf16>, vector<256x128xf32> -> vector<256x128xf32>
    %170 = arith.addf %162, %169 : vector<256x128xf32>
    %c23_89 = arith.constant 23 : index
    %c0_90 = arith.constant 0 : index
    %171 = vector.load %arg8[%c23_89, %c0_90] : memref<304x128xf32, #tpu.memory_space<vmem>>, vector<256x128xf32>
    %172 = vector.broadcast %6 : vector<256x1xf32> to vector<256x128xf32>
    %173 = arith.mulf %171, %172 : vector<256x128xf32>
    %174 = arith.truncf %173 : vector<256x128xf32> to vector<256x128xbf16>
    %c3_91 = arith.constant 3 : index
    %c0_92 = arith.constant 0 : index
    %c0_93 = arith.constant 0 : index
    %175 = vector.load %arg5[%c3_91, %c0_92, %c0_93] : memref<9x128x128xbf16, #tpu.memory_space<vmem>>, vector<1x128x128xbf16>
    %176 = vector.shape_cast %175 : vector<1x128x128xbf16> to vector<128x128xbf16>
    %cst_94 = arith.constant dense<0.000000e+00> : vector<256x128xf32>
    %177 = tpu.matmul %174, %176, %cst_94 {dimension_numbers = #tpu.dot_dimension_numbers<[1], [0], [0], [1], [0, 0, 1, 1], [], []>} : vector<256x128xbf16>, vector<128x128xbf16>, vector<256x128xf32> -> vector<256x128xf32>
    %178 = arith.addf %170, %177 : vector<256x128xf32>
    %c24_95 = arith.constant 24 : index
    %c0_96 = arith.constant 0 : index
    %179 = vector.load %arg8[%c24_95, %c0_96] : memref<304x128xf32, #tpu.memory_space<vmem>>, vector<256x128xf32>
    %180 = arith.truncf %179 : vector<256x128xf32> to vector<256x128xbf16>
    %c4_97 = arith.constant 4 : index
    %c0_98 = arith.constant 0 : index
    %c0_99 = arith.constant 0 : index
    %181 = vector.load %arg5[%c4_97, %c0_98, %c0_99] : memref<9x128x128xbf16, #tpu.memory_space<vmem>>, vector<1x128x128xbf16>
    %182 = vector.shape_cast %181 : vector<1x128x128xbf16> to vector<128x128xbf16>
    %cst_100 = arith.constant dense<0.000000e+00> : vector<256x128xf32>
    %183 = tpu.matmul %180, %182, %cst_100 {dimension_numbers = #tpu.dot_dimension_numbers<[1], [0], [0], [1], [0, 0, 1, 1], [], []>} : vector<256x128xbf16>, vector<128x128xbf16>, vector<256x128xf32> -> vector<256x128xf32>
    %184 = arith.addf %178, %183 : vector<256x128xf32>
    %c25_101 = arith.constant 25 : index
    %c0_102 = arith.constant 0 : index
    %185 = vector.load %arg8[%c25_101, %c0_102] : memref<304x128xf32, #tpu.memory_space<vmem>>, vector<256x128xf32>
    %186 = vector.broadcast %7 : vector<256x1xf32> to vector<256x128xf32>
    %187 = arith.mulf %185, %186 : vector<256x128xf32>
    %188 = arith.truncf %187 : vector<256x128xf32> to vector<256x128xbf16>
    %c5_103 = arith.constant 5 : index
    %c0_104 = arith.constant 0 : index
    %c0_105 = arith.constant 0 : index
    %189 = vector.load %arg5[%c5_103, %c0_104, %c0_105] : memref<9x128x128xbf16, #tpu.memory_space<vmem>>, vector<1x128x128xbf16>
    %190 = vector.shape_cast %189 : vector<1x128x128xbf16> to vector<128x128xbf16>
    %cst_106 = arith.constant dense<0.000000e+00> : vector<256x128xf32>
    %191 = tpu.matmul %188, %190, %cst_106 {dimension_numbers = #tpu.dot_dimension_numbers<[1], [0], [0], [1], [0, 0, 1, 1], [], []>} : vector<256x128xbf16>, vector<128x128xbf16>, vector<256x128xf32> -> vector<256x128xf32>
    %192 = arith.addf %184, %191 : vector<256x128xf32>
    %c39_107 = arith.constant 39 : index
    %c0_108 = arith.constant 0 : index
    %193 = vector.load %arg8[%c39_107, %c0_108] : memref<304x128xf32, #tpu.memory_space<vmem>>, vector<256x128xf32>
    %194 = vector.broadcast %6 : vector<256x1xf32> to vector<256x128xf32>
    %195 = arith.mulf %193, %194 : vector<256x128xf32>
    %196 = arith.truncf %195 : vector<256x128xf32> to vector<256x128xbf16>
    %c6_109 = arith.constant 6 : index
    %c0_110 = arith.constant 0 : index
    %c0_111 = arith.constant 0 : index
    %197 = vector.load %arg5[%c6_109, %c0_110, %c0_111] : memref<9x128x128xbf16, #tpu.memory_space<vmem>>, vector<1x128x128xbf16>
    %198 = vector.shape_cast %197 : vector<1x128x128xbf16> to vector<128x128xbf16>
    %cst_112 = arith.constant dense<0.000000e+00> : vector<256x128xf32>
    %199 = tpu.matmul %196, %198, %cst_112 {dimension_numbers = #tpu.dot_dimension_numbers<[1], [0], [0], [1], [0, 0, 1, 1], [], []>} : vector<256x128xbf16>, vector<128x128xbf16>, vector<256x128xf32> -> vector<256x128xf32>
    %200 = arith.addf %192, %199 : vector<256x128xf32>
    %c40_113 = arith.constant 40 : index
    %c0_114 = arith.constant 0 : index
    %201 = vector.load %arg8[%c40_113, %c0_114] : memref<304x128xf32, #tpu.memory_space<vmem>>, vector<256x128xf32>
    %202 = arith.truncf %201 : vector<256x128xf32> to vector<256x128xbf16>
    %c7_115 = arith.constant 7 : index
    %c0_116 = arith.constant 0 : index
    %c0_117 = arith.constant 0 : index
    %203 = vector.load %arg5[%c7_115, %c0_116, %c0_117] : memref<9x128x128xbf16, #tpu.memory_space<vmem>>, vector<1x128x128xbf16>
    %204 = vector.shape_cast %203 : vector<1x128x128xbf16> to vector<128x128xbf16>
    %cst_118 = arith.constant dense<0.000000e+00> : vector<256x128xf32>
    %205 = tpu.matmul %202, %204, %cst_118 {dimension_numbers = #tpu.dot_dimension_numbers<[1], [0], [0], [1], [0, 0, 1, 1], [], []>} : vector<256x128xbf16>, vector<128x128xbf16>, vector<256x128xf32> -> vector<256x128xf32>
    %206 = arith.addf %200, %205 : vector<256x128xf32>
    %c41_119 = arith.constant 41 : index
    %c0_120 = arith.constant 0 : index
    %207 = vector.load %arg8[%c41_119, %c0_120] : memref<304x128xf32, #tpu.memory_space<vmem>>, vector<256x128xf32>
    %208 = vector.broadcast %7 : vector<256x1xf32> to vector<256x128xf32>
    %209 = arith.mulf %207, %208 : vector<256x128xf32>
    %210 = arith.truncf %209 : vector<256x128xf32> to vector<256x128xbf16>
    %c8_121 = arith.constant 8 : index
    %c0_122 = arith.constant 0 : index
    %c0_123 = arith.constant 0 : index
    %211 = vector.load %arg5[%c8_121, %c0_122, %c0_123] : memref<9x128x128xbf16, #tpu.memory_space<vmem>>, vector<1x128x128xbf16>
    %212 = vector.shape_cast %211 : vector<1x128x128xbf16> to vector<128x128xbf16>
    %cst_124 = arith.constant dense<0.000000e+00> : vector<256x128xf32>
    %213 = tpu.matmul %210, %212, %cst_124 {dimension_numbers = #tpu.dot_dimension_numbers<[1], [0], [0], [1], [0, 0, 1, 1], [], []>} : vector<256x128xbf16>, vector<128x128xbf16>, vector<256x128xf32> -> vector<256x128xf32>
    %214 = arith.addf %206, %213 : vector<256x128xf32>
    %c0_125 = arith.constant 0 : index
    %c0_126 = arith.constant 0 : index
    %215 = vector.load %arg6[%c0_125, %c0_126] : memref<1x128xf32, #tpu.memory_space<vmem>>, vector<1x128xf32>
    %216 = vector.broadcast %215 : vector<1x128xf32> to vector<256x128xf32>
    %217 = arith.addf %214, %216 : vector<256x128xf32>
    %cst_127 = arith.constant 1.000000e+00 : f32
    %218 = vector.broadcast %cst_127 : f32 to vector<256x128xf32>
    %219 = arith.mulf %217, %218 : vector<256x128xf32>
    %220 = arith.addf %219, %2 : vector<256x128xf32>
    %221 = tpu.transpose %220, [1, 0] : vector<256x128xf32> -> vector<128x256xf32>
    %c0_128 = arith.constant 0 : index
    %c0_129 = arith.constant 0 : index
    %c0_130 = arith.constant 0 : index
    %222 = vector.load %arg7[%c0_128, %c0_129, %c0_130] : memref<1x128x256xf32, #tpu.memory_space<vmem>>, vector<1x128x256xf32>
    %223 = vector.shape_cast %222 : vector<1x128x256xf32> to vector<128x256xf32>
    %224 = vector.shape_cast %221 : vector<128x256xf32> to vector<1x128x256xf32>
    tpu.vector_store %arg7[%c0_128, %c0_129, %c0_130], %224 {strides = array<i32>} : memref<1x128x256xf32, #tpu.memory_space<vmem>>, vector<1x128x256xf32>,
    return
  }
  func.func @transform_0(%arg0: i32) -> (i32, i32, i32) {
    %c0_i32 = arith.constant 0 : i32
    %c0_i32_0 = arith.constant 0 : i32
    %c0_i32_1 = arith.constant 0 : i32
    return %arg0, %c0_i32, %c0_i32_0 : i32, i32, i32
  }
  func.func @transform_1(%arg0: i32) -> (i32, i32) {
    %c0_i32 = arith.constant 0 : i32
    %c0_i32_0 = arith.constant 0 : i32
    %c0_i32_1 = arith.constant 0 : i32
    return %c0_i32, %c0_i32_0 : i32, i32
  }
  func.func @transform_2(%arg0: i32) -> (i32, i32, i32) {
    %c0_i32 = arith.constant 0 : i32
    %c0_i32_0 = arith.constant 0 : i32
    %c0_i32_1 = arith.constant 0 : i32
    %c0_i32_2 = arith.constant 0 : i32
    return %c0_i32, %c0_i32_0, %c0_i32_1 : i32, i32, i32
  }
  func.func @transform_3(%arg0: i32) -> (i32, i32) {
    %c0_i32 = arith.constant 0 : i32
    %c0_i32_0 = arith.constant 0 : i32
    %c0_i32_1 = arith.constant 0 : i32
    return %c0_i32, %c0_i32_0 : i32, i32
  }
  func.func @transform_4(%arg0: i32) -> (i32, i32, i32) {
    %c0_i32 = arith.constant 0 : i32
    %c0_i32_0 = arith.constant 0 : i32
    %c0_i32_1 = arith.constant 0 : i32
    %c0_i32_2 = arith.constant 0 : i32
    return %c0_i32, %c0_i32_0, %c0_i32_1 : i32, i32, i32
  }
  func.func @transform_5(%arg0: i32) -> (i32, i32) {
    %c0_i32 = arith.constant 0 : i32
    %c0_i32_0 = arith.constant 0 : i32
    %c0_i32_1 = arith.constant 0 : i32
    return %c0_i32, %c0_i32_0 : i32, i32
  }
  func.func @transform_6(%arg0: i32) -> (i32, i32, i32) {
    %c0_i32 = arith.constant 0 : i32
    %c0_i32_0 = arith.constant 0 : i32
    %c0_i32_1 = arith.constant 0 : i32
    return %arg0, %c0_i32, %c0_i32_0 : i32, i32, i32
  }
}

</mosaic_0001>

<bundles_post_ra>
// kernel: res_block_daq.1
= control target key start
LH: loop header
LB: loop body
LE: loop exit
PB: predicated region body
PF: predicated region fallthrough
CT: control target
= control target key end

     0   :  { %s9870_s21 = smov 0   ;;  %s13261_s0 = inlined_call_operand.vmem [shape: f32[2,128,256], index: 0, kind: input, shape index: {}]   ;;  %s13262_s1 = inlined_call_operand.vmem [shape: f32[256,2], index: 1, kind: input, shape index: {}]   ;;  %s13263_s2 = inlined_call_operand.vmem [shape: bf16[9,128,128], index: 2, kind: input, shape index: {}]   ;;  %s13264_s3 = inlined_call_operand.vmem [shape: f32[1,128], index: 3, kind: input, shape index: {}]   ;;  %s13265_s4 = inlined_call_operand.vmem [shape: bf16[9,128,128], index: 4, kind: input, shape index: {}]   ;;  %s13266_s5 = inlined_call_operand.vmem [shape: f32[1,128], index: 5, kind: input, shape index: {}]   ;;  %s13267_s6 = inlined_call_operand.vmem [shape: f32[2,128,256], index: 6, kind: output, shape index: {}]  }
   0x1 LB: > { %s7359_s22 = sadd.s32 4294967295, %s9829_s21   ;;  %p7363_p0 = scmp.ge.s32.totalorder %s9829_s21, 1  ;;  %s9829_s21 = sphi %s9870_s21, %s16_s21  }
   0x2   : > { %p212_p1 = scmp.lt.s32.totalorder %s9829_s21, 3 }
   0x4   : > { %p213_p2 = pnand %p7363_p0, %p212_p1 }
   0x6   : > { %216 = sbr.rel (%p213_p2) target bundleno = 2501 (0x9c5), region = 44 }
   0xd   : > { %p242_p3 = scmp.lt.s32.totalorder %s7359_s22, 1  ;;  %v9831_v32 = vmov 0  }
   0xf   : > { %s14316_s22 = smov (!%p242_p3, %s7359_s22), 1 }
  0x10   : > { %s7772_s23 = sshll.u32 %s14316_s22, 8 }
  0x11   : > { %s9886_s26 = scalar_lea.vmem %s13261_s0, %s7772_s23  ;;  %s13224_s8 = scalar_lea.vmem %s13267_s6, %s7772_s23 }
  0x12   : > { %v253_v0 = vld [vmem:[%s9886_s26] sm:$0xff]  ;;  %v254_v1 = vld [vmem:[%s9886_s26 + $0x8] sm:$0xff]  ;;  %v255_v2 = vld [vmem:[%s9886_s26 + $0x10] sm:$0xff] }
  0x13   : > { %285 = vxpose.xlu0.b32.start [1/16] %v253_v0, 128  ;;  %317 = vxpose.xlu1.b32.start [1/16] %v254_v1, 128  ;;  %v256_v3 = vld [vmem:[%s9886_s26 + $0x18] sm:$0xff]  ;;  %v257_v4 = vld [vmem:[%s9886_s26 + $0x20] sm:$0xff]  ;;  %v258_v5 = vld [vmem:[%s9886_s26 + $0x28] sm:$0xff] }
  0x14   : > { %v259_v6 = vld [vmem:[%s9886_s26 + $0x30] sm:$0xff]  ;;  %v260_v7 = vld [vmem:[%s9886_s26 + $0x38] sm:$0xff]  ;;  %v261_v8 = vld [vmem:[%s9886_s26 + $0x40] sm:$0xff] }
  0x15   : > { %v262_v9 = vld [vmem:[%s9886_s26 + $0x48] sm:$0xff]  ;;  %v263_v10 = vld [vmem:[%s9886_s26 + $0x50] sm:$0xff]  ;;  %v264_v11 = vld [vmem:[%s9886_s26 + $0x58] sm:$0xff] }
  0x16   : > { %v265_v12 = vld [vmem:[%s9886_s26 + $0x60] sm:$0xff]  ;;  %v266_v13 = vld [vmem:[%s9886_s26 + $0x68] sm:$0xff]  ;;  %v267_v14 = vld [vmem:[%s9886_s26 + $0x70] sm:$0xff] }
  0x17   : > { %286 = vxpose.xlu0.b32.cont [2/16] %v255_v2, 128  ;;  %318 = vxpose.xlu1.b32.cont [2/16] %v256_v3, 128  ;;  %v268_v15 = vld [vmem:[%s9886_s26 + $0x78] sm:$0xff]  ;;  %v269_v16 = vld [vmem:[%s9886_s26 + $0x80] sm:$0xff]  ;;  %v270_v17 = vld [vmem:[%s9886_s26 + $0x88] sm:$0xff] }
  0x18   : > { %v271_v18 = vld [vmem:[%s9886_s26 + $0x90] sm:$0xff]  ;;  %v272_v19 = vld [vmem:[%s9886_s26 + $0x98] sm:$0xff]  ;;  %v273_v20 = vld [vmem:[%s9886_s26 + $0xa0] sm:$0xff] }
  0x19   : > { %v274_v21 = vld [vmem:[%s9886_s26 + $0xa8] sm:$0xff]  ;;  %v275_v22 = vld [vmem:[%s9886_s26 + $0xb0] sm:$0xff]  ;;  %v276_v23 = vld [vmem:[%s9886_s26 + $0xb8] sm:$0xff] }
  0x1a   : > { %v277_v24 = vld [vmem:[%s9886_s26 + $0xc0] sm:$0xff]  ;;  %v278_v25 = vld [vmem:[%s9886_s26 + $0xc8] sm:$0xff]  ;;  %v279_v26 = vld [vmem:[%s9886_s26 + $0xd0] sm:$0xff] }
  0x1b   : > { %287 = vxpose.xlu0.b32.cont [3/16] %v257_v4, 128  ;;  %319 = vxpose.xlu1.b32.cont [3/16] %v258_v5, 128  ;;  %v280_v27 = vld [vmem:[%s9886_s26 + $0xd8] sm:$0xff]  ;;  %v281_v28 = vld [vmem:[%s9886_s26 + $0xe0] sm:$0xff]  ;;  %v282_v29 = vld [vmem:[%s9886_s26 + $0xe8] sm:$0xff] }
  0x1c   : > { %v283_v30 = vld [vmem:[%s9886_s26 + $0xf0] sm:$0xff]  ;;  %v284_v31 = vld [vmem:[%s9886_s26 + $0xf8] sm:$0xff] }
  0x1f   : > { %288 = vxpose.xlu0.b32.cont [4/16] %v259_v6, 128  ;;  %320 = vxpose.xlu1.b32.cont [4/16] %v260_v7, 128 }
  0x23   : > { %289 = vxpose.xlu0.b32.cont [5/16] %v261_v8, 128  ;;  %321 = vxpose.xlu1.b32.cont [5/16] %v262_v9, 128 }
  0x27   : > { %290 = vxpose.xlu0.b32.cont [6/16] %v263_v10, 128  ;;  %322 = vxpose.xlu1.b32.cont [6/16] %v264_v11, 128 }
  0x2b   : > { %291 = vxpose.xlu0.b32.cont [7/16] %v265_v12, 128  ;;  %323 = vxpose.xlu1.b32.cont [7/16] %v266_v13, 128 }
  0x2f   : > { %292 = vxpose.xlu0.b32.cont [8/16] %v267_v14, 128  ;;  %324 = vxpose.xlu1.b32.cont [8/16] %v268_v15, 128 }
  0x33   : > { %293 = vxpose.xlu0.b32.cont [9/16] %v269_v16, 128  ;;  %325 = vxpose.xlu1.b32.cont [9/16] %v270_v17, 128 }
  0x37   : > { %294 = vxpose.xlu0.b32.cont [10/16] %v271_v18, 128  ;;  %326 = vxpose.xlu1.b32.cont [10/16] %v272_v19, 128 }
  0x3b   : > { %295 = vxpose.xlu0.b32.cont [11/16] %v273_v20, 128  ;;  %327 = vxpose.xlu1.b32.cont [11/16] %v274_v21, 128 }
  0x3f   : > { %296 = vxpose.xlu0.b32.cont [12/16] %v275_v22, 128  ;;  %328 = vxpose.xlu1.b32.cont [12/16] %v276_v23, 128 }
  0x43   : > { %297 = vxpose.xlu0.b32.cont [13/16] %v277_v24, 128  ;;  %329 = vxpose.xlu1.b32.cont [13/16] %v278_v25, 128 }
  0x47   : > { %298 = vxpose.xlu0.b32.cont [14/16] %v279_v26, 128  ;;  %330 = vxpose.xlu1.b32.cont [14/16] %v280_v27, 128 }
  0x4b   : > { %299 = vxpose.xlu0.b32.cont [15/16] %v281_v28, 128  ;;  %331 = vxpose.xlu1.b32.cont [15/16] %v282_v29, 128 }
  0x4f   : > { %300 = vxpose.xlu0.b32.end [16/16] %v283_v30, 128  ;;  %332 = vxpose.xlu1.b32.end [16/16] %v284_v31, 128 }
  0x6d   : > { %9665 = vset.pattern.permute.xlu1 %v9831_v32 }
  0x78   : > { %9666 = vset.pattern.permute.xlu0 %v9831_v32 }
  0x93   : > { %v9920_v33 = vpop.trf.xlu0  ;;  %v9922_v34 = vpop.trf.xlu1 }
  0x94   : > { %13638 = vst [vmem:[#allocation3_spill] sm:$0xff] %v9920_v33  ;;  %13639 = vst [vmem:[#allocation4_spill] sm:$0xff] %v9922_v34 }
  0x97   : > { %v9924_v35 = vpop.trf.xlu0  ;;  %v9926_v36 = vpop.trf.xlu1 }
  0x98   : > { %13640 = vst [vmem:[#allocation5_spill] sm:$0xff] %v9924_v35  ;;  %13641 = vst [vmem:[#allocation6_spill] sm:$0xff] %v9926_v36 }
  0x9b   : > { %v9928_v37 = vpop.trf.xlu0  ;;  %v9930_v38 = vpop.trf.xlu1 }
  0x9c   : > { %13642 = vst [vmem:[#allocation7_spill] sm:$0xff] %v9928_v37  ;;  %13643 = vst [vmem:[#allocation8_spill] sm:$0xff] %v9930_v38 }
  0x9f   : > { %v9932_v39 = vpop.trf.xlu0  ;;  %v9934_v40 = vpop.trf.xlu1 }
  0xa0   : > { %13644 = vst [vmem:[#allocation9_spill] sm:$0xff] %v9932_v39  ;;  %13645 = vst [vmem:[#allocation10_spill] sm:$0xff] %v9934_v40 }
  0xa3   : > { %v9936_v41 = vpop.trf.xlu0  ;;  %v9938_v42 = vpop.trf.xlu1 }
  0xa4   : > { %13646 = vst [vmem:[#allocation11_spill] sm:$0xff] %v9936_v41  ;;  %13647 = vst [vmem:[#allocation12_spill] sm:$0xff] %v9938_v42  ;;  %v387_v57 = vmin.f32 %v9920_v33, %v9936_v41  ;;  %v428_v58 = vmax.f32 %v9920_v33, %v9936_v41 }
  0xa7   : > { %v9940_v43 = vpop.trf.xlu0  ;;  %v9942_v44 = vpop.trf.xlu1 }
  0xa8   : > { %13648 = vst [vmem:[#allocation13_spill] sm:$0xff] %v9940_v43  ;;  %13649 = vst [vmem:[#allocation14_spill] sm:$0xff] %v9942_v44  ;;  %v388_v61 = vmin.f32 %v9924_v35, %v9940_v43  ;;  %v429_v62 = vmax.f32 %v9924_v35, %v9940_v43 }
  0xab   : > { %v9944_v45 = vpop.trf.xlu0  ;;  %v9946_v46 = vpop.trf.xlu1 }
  0xac   : > { %13650 = vst [vmem:[#allocation15_spill] sm:$0xff] %v9944_v45  ;;  %13651 = vst [vmem:[#allocation16_spill] sm:$0xff] %v9946_v46  ;;  %v389_v6 = vmin.f32 %v9928_v37, %v9944_v45  ;;  %v430_v7 = vmax.f32 %v9928_v37, %v9944_v45 }
  0xaf   : > { %v9948_v47 = vpop.trf.xlu0  ;;  %v9950_v48 = vpop.trf.xlu1 }
  0xb0   : > { %13652 = vst [vmem:[#allocation17_spill] sm:$0xff] %v9948_v47  ;;  %13653 = vst [vmem:[#allocation18_spill] sm:$0xff] %v9950_v48  ;;  %v390_v15 = vmin.f32 %v9932_v39, %v9948_v47  ;;  %v431_v16 = vmax.f32 %v9932_v39, %v9948_v47 }
  0xb3   : > { %v9952_v49 = vpop.trf.xlu0  ;;  %v9954_v50 = vpop.trf.xlu1 }
  0xb4   : > { %13654 = vst [vmem:[#allocation19_spill] sm:$0xff] %v9952_v49  ;;  %13655 = vst [vmem:[#allocation20_spill] sm:$0xff] %v9954_v50  ;;  %v391_v63 = vmin.f32 %v387_v57, %v9952_v49  ;;  %v432_v0 = vmax.f32 %v428_v58, %v9952_v49 }
  0xb7   : > { %v9956_v51 = vpop.trf.xlu0  ;;  %v9958_v52 = vpop.trf.xlu1 }
  0xb8   : > { %13656 = vst [vmem:[#allocation21_spill] sm:$0xff] %v9956_v51  ;;  %13657 = vst [vmem:[#allocation22_spill] sm:$0xff] %v9958_v52  ;;  %v392_v1 = vmin.f32 %v388_v61, %v9956_v51  ;;  %v433_v2 = vmax.f32 %v429_v62, %v9956_v51 }
  0xbb   : > { %v9960_v53 = vpop.trf.xlu0  ;;  %v9962_v54 = vpop.trf.xlu1 }
  0xbc   : > { %13658 = vst [vmem:[#allocation23_spill] sm:$0xff] %v9960_v53  ;;  %13659 = vst [vmem:[#allocation24_spill] sm:$0xff] %v9962_v54  ;;  %v393_v11 = vmin.f32 %v389_v6, %v9960_v53  ;;  %v434_v12 = vmax.f32 %v430_v7, %v9960_v53 }
  0xbf   : > { %v9964_v55 = vpop.trf.xlu0  ;;  %v9966_v56 = vpop.trf.xlu1 }
  0xc0   : > { %13660 = vst [vmem:[#allocation25_spill] sm:$0xff] %v9964_v55  ;;  %13661 = vst [vmem:[#allocation26_spill] sm:$0xff] %v9966_v56  ;;  %v394_v22 = vmin.f32 %v390_v15, %v9964_v55  ;;  %v435_v23 = vmax.f32 %v431_v16, %v9964_v55 }
  0xc3   : > { %v9972_v59 = vpop.trf.xlu0  ;;  %v9974_v60 = vpop.trf.xlu1 }
  0xc4   : > { %13662 = vst [vmem:[#allocation27_spill] sm:$0xff] %v9972_v59  ;;  %13663 = vst [vmem:[#allocation28_spill] sm:$0xff] %v9974_v60  ;;  %v395_v3 = vmin.f32 %v391_v63, %v9972_v59  ;;  %v436_v4 = vmax.f32 %v432_v0, %v9972_v59 }
  0xc6   : > { %v399_v17 = vmin.f32 %v395_v3, %v9922_v34  ;;  %v440_v18 = vmax.f32 %v436_v4, %v9922_v34 }
  0xc7   : > { %v9986_v5 = vpop.trf.xlu0  ;;  %v9994_v10 = vpop.trf.xlu1 }
  0xc8   : > { %13664 = vst [vmem:[#allocation29_spill] sm:$0xff] %v9986_v5  ;;  %v396_v8 = vmin.f32 %v392_v1, %v9986_v5  ;;  %v437_v9 = vmax.f32 %v433_v2, %v9986_v5  ;;  %13665 = vst [vmem:[#allocation30_spill] sm:$0xff] %v9994_v10  ;;  %v444_v30 = vmax.f32 %v440_v18, %v9938_v42 }
  0xc9   : > { %v403_v31 = vmin.f32 %v399_v17, %v9938_v42 }
  0xca   : > { %v400_v13 = vmin.f32 %v396_v8, %v9926_v36  ;;  %v441_v14 = vmax.f32 %v437_v9, %v9926_v36  ;;  %v448_v2 = vmax.f32 %v444_v30, %v9954_v50  ;;  %v10051_v30 = vld [vmem:[%s13262_s1] sm:$0xff] }
  0xcb   : > { %v10006_v19 = vpop.trf.xlu0  ;;  %v10018_v29 = vpop.trf.xlu1  ;;  %v407_v3 = vmin.f32 %v403_v31, %v9954_v50  ;;  %v10057_v31 = vld [vmem:[%s13262_s1 + $0x10] sm:$0xff] }
  0xcc   : > { %13666 = vst [vmem:[#allocation31_spill] sm:$0xff] %v10006_v19  ;;  %v397_v20 = vmin.f32 %v393_v11, %v10006_v19  ;;  %v438_v21 = vmax.f32 %v434_v12, %v10006_v19  ;;  %v445_v26 = vmax.f32 %v441_v14, %v9942_v44  ;;  %v404_v27 = vmin.f32 %v400_v13, %v9942_v44 }
  0xcd   : > { %13668 = vst [vmem:[#allocation33_spill] sm:$0xff] %v10018_v29  ;;  %v452_v15 = vmax.f32 %v448_v2, %v9974_v60  ;;  %v411_v16 = vmin.f32 %v407_v3, %v9974_v60  ;;  %v361_v2 = vld [vmem:[%s13262_s1 + $0x30] sm:$0xff]  ;;  %v10102_v3 = vld [vmem:[%s13262_s1 + $0x88] sm:$0xff] }
  0xce   : > { %v401_v24 = vmin.f32 %v397_v20, %v9930_v38  ;;  %v442_v25 = vmax.f32 %v438_v21, %v9930_v38  ;;  %v449_v0 = vmax.f32 %v445_v26, %v9958_v52  ;;  %v408_v1 = vmin.f32 %v404_v27, %v9958_v52 }
  0xcf   : > { %v10016_v28 = vpop.trf.xlu0  ;;  %v10036_v9 = vpop.trf.xlu1 }
  0xd0   : > { %13667 = vst [vmem:[#allocation32_spill] sm:$0xff] %v10016_v28  ;;  %v398_v32 = vmin.f32 %v394_v22, %v10016_v28  ;;  %v439_v57 = vmax.f32 %v435_v23, %v10016_v28  ;;  %v446_v58 = vmax.f32 %v442_v25, %v9946_v46  ;;  %v405_v61 = vmin.f32 %v401_v24, %v9946_v46 }
  0xd1   : > { %13669 = vst [vmem:[#allocation34_spill] sm:$0xff] %v10036_v9  ;;  %v453_v12 = vmax.f32 %v449_v0, %v9994_v10  ;;  %v412_v14 = vmin.f32 %v408_v1, %v9994_v10  ;;  %v10087_v0 = vld [vmem:[%s13262_s1 + $0x28] sm:$0xff]  ;;  %v10092_v1 = vld [vmem:[%s13262_s1 + $0x78] sm:$0xff] }
  0xd2   : > { %v402_v62 = vmin.f32 %v398_v32, %v9934_v40  ;;  %v443_v63 = vmax.f32 %v439_v57, %v9934_v40  ;;  %v450_v6 = vmax.f32 %v446_v58, %v9962_v54  ;;  %v409_v8 = vmin.f32 %v405_v61, %v9962_v54  ;;  %v356_v32 = vld [vmem:[%s13262_s1 + $0x8] sm:$0xff]  ;;  %v10066_v58 = vld [vmem:[%s13262_s1 + $0x18] sm:$0xff] }
  0xd3   : > { %v456_v22 = vmax.f32 %v452_v15, %v453_v12  ;;  %v415_v24 = vmin.f32 %v411_v16, %v412_v14  ;;  %v9832_v57 = vmov 0.0   ;;  %v10071_v61 = vld [vmem:[%s13262_s1 + $0x58] sm:$0xff]  ;;  %v10138_v14 = vld [vmem:[%s13262_s1 + $0xc8] sm:$0xff]  ;;  %v367_v15 = vld [vmem:[%s13262_s1 + $0x60] sm:$0xff] }
  0xd4   : > { %v447_v4 = vmax.f32 %v443_v63, %v9950_v48  ;;  %v406_v7 = vmin.f32 %v402_v62, %v9950_v48  ;;  %v454_v17 = vmax.f32 %v450_v6, %v10018_v29  ;;  %v413_v20 = vmin.f32 %v409_v8, %v10018_v29  ;;  %351 = vst [vmem:[#allocation2 + $0x10] sm:$0xff] %v9832_v57  ;;  %v359_v62 = vld [vmem:[%s13262_s1 + $0x20] sm:$0xff]  ;;  %v10081_v63 = vld [vmem:[%s13262_s1 + $0x68] sm:$0xff]  ;;  %v10111_v6 = vld [vmem:[%s13262_s1 + $0x98] sm:$0xff] }
  0xd5   : > { %349 = vst [vmem:[#allocation2] sm:$0xff] %v9832_v57  ;;  %350 = vst [vmem:[#allocation2 + $0x8] sm:$0xff] %v9832_v57  ;;  %v10120_v8 = vld [vmem:[%s13262_s1 + $0xa8] sm:$0xff]  ;;  %v10129_v12 = vld [vmem:[%s13262_s1 + $0xb8] sm:$0xff] }
  0xd6   : > { %v451_v11 = vmax.f32 %v447_v4, %v9966_v56  ;;  %v410_v13 = vmin.f32 %v406_v7, %v9966_v56  ;;  %352 = vst [vmem:[#allocation2 + $0x118] sm:$0xff] %v9832_v57  ;;  %353 = vst [vmem:[#allocation2 + $0x120] sm:$0xff] %v9832_v57  ;;  %v362_v4 = vld [vmem:[%s13262_s1 + $0x38] sm:$0xff]  ;;  %v363_v7 = vld [vmem:[%s13262_s1 + $0x40] sm:$0xff] }
  0xd7   : > { %354 = vst [vmem:[#allocation2 + $0x128] sm:$0xff] %v9832_v57  ;;  %v10147_v16 = vld [vmem:[%s13262_s1 + $0xd8] sm:$0xff]  ;;  %v385_v57 = vld [vmem:[%s13262_s1 + $0xf0] sm:$0xff] }
  0xd8   : > { %v455_v18 = vmax.f32 %v451_v11, %v10036_v9  ;;  %v414_v21 = vmin.f32 %v410_v13, %v10036_v9  ;;  %v364_v11 = vld [vmem:[%s13262_s1 + $0x48] sm:$0xff]  ;;  %v365_v13 = vld [vmem:[%s13262_s1 + $0x50] sm:$0xff] }
  0xda   : > { %v457_v23 = vmax.f32 %v454_v17, %v455_v18  ;;  %v416_v25 = vmin.f32 %v413_v20, %v414_v21  ;;  %v369_v17 = vld [vmem:[%s13262_s1 + $0x70] sm:$0xff]  ;;  %v10156_v18 = vld [vmem:[%s13262_s1 + $0xe8] sm:$0xff]  ;;  %v371_v20 = vld [vmem:[%s13262_s1 + $0x80] sm:$0xff] }
  0xdb   : > { %v10165_v21 = vld [vmem:[%s13262_s1 + $0xf8] sm:$0xff] }
  0xdc   : > { %v458_v26 = vmax.f32 %v456_v22, %v457_v23  ;;  %v417_v27 = vmin.f32 %v415_v24, %v416_v25  ;;  %v373_v22 = vld [vmem:[%s13262_s1 + $0x90] sm:$0xff]  ;;  %v9833_v23 = vmov 1   ;;  %v375_v24 = vld [vmem:[%s13262_s1 + $0xa0] sm:$0xff] }
  0xdd   : > { %v377_v25 = vld [vmem:[%s13262_s1 + $0xb0] sm:$0xff] }
  0xde   : > { %459 = vmax.xlane.f32.xlu1 %v458_v26  ;;  %418 = vmin.xlane.f32.xlu0 %v417_v27  ;;  %v379_v26 = vld [vmem:[%s13262_s1 + $0xc0] sm:$0xff]  ;;  %v381_v27 = vld [vmem:[%s13262_s1 + $0xd0] sm:$0xff] }
  0xef   : > { %736 = vperm.xlu1 %9665, %v10051_v30  }
  0xf3   : > { %746 = vperm.xlu1 %9665, %v10057_v31  }
  0xf4   : > { %741 = vperm.xlu0 %9666, %v356_v32  }
  0xf7   : > { %751 = vperm.xlu1 %9665, %v10066_v58  }
  0xf8   : > { %791 = vperm.xlu0 %9666, %v10071_v61  }
  0xfb   : > { %756 = vperm.xlu1 %9665, %v359_v62  }
  0xfc   : > { %801 = vperm.xlu0 %9666, %v10081_v63  }
  0xff   : > { %761 = vperm.xlu1 %9665, %v10087_v0  }
 0x100   : > { %811 = vperm.xlu0 %9666, %v10092_v1  }
 0x103   : > { %766 = vperm.xlu1 %9665, %v361_v2  }
 0x104   : > { %821 = vperm.xlu0 %9666, %v10102_v3  }
 0x107   : > { %771 = vperm.xlu1 %9665, %v362_v4  }
 0x108   : > { %831 = vperm.xlu0 %9666, %v10111_v6  }
 0x10b   : > { %776 = vperm.xlu1 %9665, %v363_v7  }
 0x10c   : > { %841 = vperm.xlu0 %9666, %v10120_v8  }
 0x10f   : > { %781 = vperm.xlu1 %9665, %v364_v11  }
 0x110   : > { %851 = vperm.xlu0 %9666, %v10129_v12  }
 0x113   : > { %786 = vperm.xlu1 %9665, %v365_v13  }
 0x114   : > { %861 = vperm.xlu0 %9666, %v10138_v14  }
 0x117   : > { %796 = vperm.xlu1 %9665, %v367_v15  }
 0x118   : > { %871 = vperm.xlu0 %9666, %v10147_v16  }
 0x11b   : > { %806 = vperm.xlu1 %9665, %v369_v17  }
 0x11c   : > { %881 = vperm.xlu0 %9666, %v10156_v18  }
 0x11f   : > { %816 = vperm.xlu1 %9665, %v371_v20  }
 0x120   : > { %891 = vperm.xlu0 %9666, %v10165_v21  }
 0x123   : > { %826 = vperm.xlu1 %9665, %v373_v22  }
 0x124   : > { %9668 = vset.pattern.permute.xlu0 %v9833_v23 }
 0x125   : > { %1478 = vperm.xlu0 %9668, %v356_v32   ;;  %v383_v32 = vld [vmem:[%s13262_s1 + $0xe0] sm:$0xff] }
 0x127   : > { %836 = vperm.xlu1 %9665, %v375_v24  }
 0x129   : > { %1490 = vperm.xlu0 %9668, %v359_v62   ;;  %v9669_v62 = vld [vmem:[%s13263_s2 + $0x40] sm:$0xff]  }
 0x12a   : > { %8206 = vmatprep.subr.bf16.mxu0 %v9669_v62 }
 0x12b   : > { %846 = vperm.xlu1 %9665, %v377_v25   ;;  %8207 = vmatpush3.bf16.msra.mxu0 %v9669_v62 }
 0x12d   : > { %1498 = vperm.xlu0 %9668, %v361_v2  }
 0x12f   : > { %856 = vperm.xlu1 %9665, %v379_v26  }
 0x131   : > { %1506 = vperm.xlu0 %9668, %v363_v7  }
 0x133   : > { %866 = vperm.xlu1 %9665, %v381_v27  }
 0x135   : > { %1514 = vperm.xlu0 %9668, %v365_v13  }
 0x137   : > { %876 = vperm.xlu1 %9665, %v383_v32  }
 0x139   : > { %1522 = vperm.xlu0 %9668, %v367_v15   ;;  %v9834_v15 = vmov 0.0|0.0  }
 0x13a   : > { %8222 = vmatprep.mubr.bf16.mxu0 %v9834_v15 }
 0x13b   : > { %886 = vperm.xlu1 %9665, %v385_v57  }
 0x13d   : > { %1530 = vperm.xlu0 %9668, %v369_v17  }
 0x13f   : > { %9667 = vset.pattern.permute.xlu1 %v9833_v23 }
 0x140   : > { %1474 = vperm.xlu1 %9667, %v10051_v30   ;;  %v9670_v30 = vld [vmem:[%s13263_s2 + $0x48] sm:$0xff]  }
 0x141   : > { %1538 = vperm.xlu0 %9668, %v371_v20   ;;  %8208 = vmatprep.subr.bf16.mxu0 %v9670_v30 }
 0x142   : > { %8209 = vmatpush3.bf16.msra.mxu0 %v9670_v30 }
 0x144   : > { %1482 = vperm.xlu1 %9667, %v10057_v31   ;;  %v9671_v31 = vld [vmem:[%s13263_s2 + $0x50] sm:$0xff]  }
 0x145   : > { %1546 = vperm.xlu0 %9668, %v373_v22   ;;  %8210 = vmatprep.subr.bf16.mxu0 %v9671_v31 }
 0x146   : > { %8211 = vmatpush3.bf16.msra.mxu0 %v9671_v31 }
 0x148   : > { %1486 = vperm.xlu1 %9667, %v10066_v58   ;;  %v9672_v58 = vld [vmem:[%s13263_s2 + $0x58] sm:$0xff]  }
 0x149   : > { %1554 = vperm.xlu0 %9668, %v375_v24   ;;  %8212 = vmatprep.subr.bf16.mxu0 %v9672_v58 }
 0x14a   : > { %8213 = vmatpush3.bf16.msra.mxu0 %v9672_v58 }
 0x14c   : > { %1494 = vperm.xlu1 %9667, %v10087_v0   ;;  %v9673_v0 = vld [vmem:[%s13263_s2 + $0x60] sm:$0xff]  }
 0x14d   : > { %1562 = vperm.xlu0 %9668, %v377_v25   ;;  %8214 = vmatprep.subr.bf16.mxu0 %v9673_v0 }
 0x14e   : > { %8215 = vmatpush3.bf16.msra.mxu0 %v9673_v0 }
 0x150   : > { %1502 = vperm.xlu1 %9667, %v362_v4  }
 0x151   : > { %1570 = vperm.xlu0 %9668, %v379_v26  }
 0x154   : > { %1510 = vperm.xlu1 %9667, %v364_v11  }
 0x155   : > { %1578 = vperm.xlu0 %9668, %v381_v27  }
 0x158   : > { %1518 = vperm.xlu1 %9667, %v10071_v61   ;;  %v9674_v61 = vld [vmem:[%s13263_s2 + $0x68] sm:$0xff]  }
 0x159   : > { %1586 = vperm.xlu0 %9668, %v383_v32   ;;  %8216 = vmatprep.subr.bf16.mxu0 %v9674_v61 }
 0x15a   : > { %8217 = vmatpush3.bf16.msra.mxu0 %v9674_v61 }
 0x15c   : > { %1526 = vperm.xlu1 %9667, %v10081_v63   ;;  %v9675_v63 = vld [vmem:[%s13263_s2 + $0x70] sm:$0xff]  }
 0x15d   : > { %1594 = vperm.xlu0 %9668, %v385_v57   ;;  %8218 = vmatprep.subr.bf16.mxu0 %v9675_v63 }
 0x15e   : > { %8219 = vmatpush3.bf16.msra.mxu0 %v9675_v63 }
 0x160   : > { %1534 = vperm.xlu1 %9667, %v10092_v1   ;;  %v9676_v1 = vld [vmem:[%s13263_s2 + $0x78] sm:$0xff]  }
 0x161   : > { %8220 = vmatprep.subr.bf16.mxu0 %v9676_v1 }
 0x162   : > { %8221 = vmatpush3.bf16.msra.mxu0 %v9676_v1 }
 0x164   : > { %1542 = vperm.xlu1 %9667, %v10102_v3  }
 0x168   : > { %1550 = vperm.xlu1 %9667, %v10111_v6   ;;  %v10227_v6 = vld [vmem:[%s13263_s2] sm:$0xff]  }
 0x169   : > { %13670 = vst [vmem:[#allocation35_spill] sm:$0xff] %v10227_v6  ;;  %8254 = vmatprep.subr.bf16.mxu0 %v10227_v6 }
 0x16b   : > { %v460_v2 = vpop.xlane.xlu1 %459  ;;  %v419_v4 = vpop.xlane.xlu0 %418 }
 0x16c   : > { %v461_v7 = vrot.slane %v460_v2, 4  ;;  %v420_v11 = vrot.slane %v419_v4, 4  ;;  %1558 = vperm.xlu1 %9667, %v10120_v8  }
 0x16e   : > { %v462_v3 = vmax.f32 %v460_v2, %v461_v7  ;;  %v421_v13 = vmin.f32 %v419_v4, %v420_v11 }
 0x170   : > { %v463_v17 = vrot.slane %v462_v3, 2  ;;  %v422_v20 = vrot.slane %v421_v13, 2  ;;  %1566 = vperm.xlu1 %9667, %v10129_v12  }
 0x172   : > { %v423_v22 = vmin.f32 %v421_v13, %v422_v20  ;;  %v464_v23 = vmax.f32 %v462_v3, %v463_v17 }
 0x174   : > { %1574 = vperm.xlu1 %9667, %v10138_v14   ;;  %v424_v8 = vrot.slane %v423_v22, 1  ;;  %v465_v24 = vrot.slane %v464_v23, 1 }
 0x176   : > { %v425_v25 = vmin.f32 %v423_v22, %v424_v8  ;;  %v466_v26 = vmax.f32 %v464_v23, %v465_v24 }
 0x178   : > { %1582 = vperm.xlu1 %9667, %v10147_v16   ;;  %9582 = vpush %v425_v25 }
 0x179   : > { %9584 = vpush %v466_v26 }
 0x17c   : > { %1590 = vperm.xlu1 %9667, %v10156_v18  }
 0x180   : > { %1598 = vperm.xlu1 %9667, %v10165_v21  }
 0x1a9   : > { %s9583_s25 = spop %9582 }
 0x1aa   : > { %s9585_s26 = spop %9584  ;;  %v10234_v12 = vstv %s9583_s25 }
 0x1ab   : > { %v468_v27 = vstv %s9585_s26  ;;  %v476_v18 = vsub.f32 %v9920_v33, %v10234_v12  ;;  %v477_v21 = vsub.f32 %v9924_v35, %v10234_v12  ;;  %v478_v57 = vsub.f32 %v9928_v37, %v10234_v12 }
 0x1ac   : > { %v469_v32 = vsub.f32 %v468_v27, %v10234_v12  ;;  %v479_v62 = vsub.f32 %v9932_v39, %v10234_v12  ;;  %v480_v30 = vsub.f32 %v9936_v41, %v10234_v12  ;;  %v481_v31 = vsub.f32 %v9940_v43, %v10234_v12 }
 0x1ad   : > { %v482_v58 = vsub.f32 %v9944_v45, %v10234_v12  ;;  %v483_v0 = vsub.f32 %v9948_v47, %v10234_v12  ;;  %v484_v61 = vsub.f32 %v9952_v49, %v10234_v12  ;;  %v485_v63 = vsub.f32 %v9956_v51, %v10234_v12 }
 0x1ae   : > { %v10237_v14 = vmul.f32 0.33333334, %v469_v32  ;;  %v486_v1 = vsub.f32 %v9960_v53, %v10234_v12  ;;  %v487_v2 = vsub.f32 %v9964_v55, %v10234_v12  ;;  %v488_v4 = vsub.f32 %v9972_v59, %v10234_v12 }
 0x1af   : > { %v489_v7 = vsub.f32 %v9986_v5, %v10234_v12  ;;  %v490_v11 = vsub.f32 %v10006_v19, %v10234_v12  ;;  %v491_v3 = vsub.f32 %v10016_v28, %v10234_v12  ;;  %v492_v13 = vsub.f32 %v9922_v34, %v10234_v12 }
 0x1b0   : > { %vm472_vm0 = vcmp.gt.f32.partialorder %v10237_v14, 0.0  ;;  %v493_v15 = vsub.f32 %v9926_v36, %v10234_v12  ;;  %v494_v17 = vsub.f32 %v9930_v38, %v10234_v12  ;;  %v495_v20 = vsub.f32 %v9934_v40, %v10234_v12 }
 0x1b1   : > { %v10243_v16 = vsel %vm472_vm0, %v10237_v14, 1.0  ;;  %v496_v22 = vsub.f32 %v9938_v42, %v10234_v12  ;;  %v497_v23 = vsub.f32 %v9942_v44, %v10234_v12  ;;  %v498_v8 = vsub.f32 %v9946_v46, %v10234_v12 }
 0x1b2   : > { %9813 = vrcp.f32 %v10243_v16  ;;  %v499_v24 = vsub.f32 %v9950_v48, %v10234_v12  ;;  %v500_v25 = vsub.f32 %v9954_v50, %v10234_v12  ;;  %v501_v26 = vsub.f32 %v9958_v52, %v10234_v12  ;;  %v10310_v52 = vpop.permute.xlu1 %736 }
 0x1b3   : > { %v502_v27 = vsub.f32 %v9962_v54, %v10234_v12  ;;  %v503_v32 = vsub.f32 %v9966_v56, %v10234_v12  ;;  %v504_v44 = vsub.f32 %v9974_v60, %v10234_v12  ;;  %v505_v46 = vsub.f32 %v9994_v10, %v10234_v12  ;;  %13671 = vst [vmem:[#allocation36_spill] sm:$0xff] %v10310_v52 }
 0x1b4   : > { %v506_v48 = vsub.f32 %v10018_v29, %v10234_v12  ;;  %v507_v50 = vsub.f32 %v10036_v9, %v10234_v12 }
 0x1bc   : > { %v9814_v6 = vpop.eup %9813 }
 0x1bd   : > { %v10312_v42 = vmul.f32 %v9814_v6, %v476_v18  ;;  %v10314_v54 = vmul.f32 %v9814_v6, %v477_v21  ;;  %v10316_v56 = vmul.f32 %v9814_v6, %v478_v57  ;;  %v10318_v40 = vmul.f32 %v9814_v6, %v479_v62 }
 0x1be   : > { %v10320_v60 = vmul.f32 %v9814_v6, %v480_v30  ;;  %v10322_v38 = vmul.f32 %v9814_v6, %v481_v31  ;;  %v10324_v10 = vmul.f32 %v9814_v6, %v482_v58  ;;  %v10326_v29 = vmul.f32 %v9814_v6, %v483_v0 }
 0x1bf   : > { %v10328_v36 = vmul.f32 %v9814_v6, %v484_v61  ;;  %v10330_v9 = vmul.f32 %v9814_v6, %v485_v63  ;;  %v10332_v18 = vmul.f32 %v9814_v6, %v486_v1  ;;  %v10334_v21 = vmul.f32 %v9814_v6, %v487_v2 }
 0x1c0   : > { %v10336_v57 = vmul.f32 %v9814_v6, %v488_v4  ;;  %v10338_v62 = vmul.f32 %v9814_v6, %v489_v7  ;;  %v10340_v30 = vmul.f32 %v9814_v6, %v490_v11  ;;  %v10342_v31 = vmul.f32 %v9814_v6, %v491_v3  ;;  %v10360_v11 = vpop.permute.xlu1 %746 }
 0x1c1   : > { %v10344_v58 = vmul.f32 %v9814_v6, %v492_v13  ;;  %v10346_v0 = vmul.f32 %v9814_v6, %v493_v15  ;;  %v10348_v61 = vmul.f32 %v9814_v6, %v494_v17  ;;  %v10350_v63 = vmul.f32 %v9814_v6, %v495_v20  ;;  %13672 = vst [vmem:[#allocation37_spill] sm:$0xff] %v10360_v11 }
 0x1c2   : > { %v10352_v1 = vmul.f32 %v9814_v6, %v496_v22  ;;  %v10354_v2 = vmul.f32 %v9814_v6, %v497_v23  ;;  %v10356_v4 = vmul.f32 %v9814_v6, %v498_v8  ;;  %v10358_v7 = vmul.f32 %v9814_v6, %v499_v24 }
 0x1c3   : > { %v10362_v3 = vmul.f32 %v9814_v6, %v500_v25  ;;  %v10364_v13 = vmul.f32 %v9814_v6, %v501_v26  ;;  %v10366_v15 = vmul.f32 %v9814_v6, %v502_v27  ;;  %v10368_v17 = vmul.f32 %v9814_v6, %v503_v32 }
 0x1c4   : > { %v10370_v20 = vmul.f32 %v9814_v6, %v504_v44  ;;  %v10372_v22 = vmul.f32 %v9814_v6, %v505_v46  ;;  %v10374_v23 = vmul.f32 %v9814_v6, %v506_v48  ;;  %v10376_v8 = vmul.f32 %v9814_v6, %v507_v50  ;;  %v10394_v6 = vpop.permute.xlu1 %751 }
 0x1c5   : > { %v9586_v24 = vround.rtne.f32 %v10312_v42  ;;  %v9587_v11 = vround.rtne.f32 %v10314_v54  ;;  %v9588_v25 = vround.rtne.f32 %v10316_v56  ;;  %v9589_v26 = vround.rtne.f32 %v10318_v40  ;;  %13673 = vst [vmem:[#allocation38_spill] sm:$0xff] %v10394_v6 }
 0x1c6   : > { %v9590_v27 = vround.rtne.f32 %v10320_v60  ;;  %v9591_v32 = vround.rtne.f32 %v10322_v38  ;;  %v9592_v44 = vround.rtne.f32 %v10324_v10  ;;  %v9593_v46 = vround.rtne.f32 %v10326_v29 }
 0x1c7   : > { %v9594_v48 = vround.rtne.f32 %v10328_v36  ;;  %v9595_v50 = vround.rtne.f32 %v10330_v9  ;;  %v9596_v42 = vround.rtne.f32 %v10332_v18  ;;  %v9597_v54 = vround.rtne.f32 %v10334_v21 }
 0x1c8   : > { %v9598_v56 = vround.rtne.f32 %v10336_v57  ;;  %v9599_v40 = vround.rtne.f32 %v10338_v62  ;;  %v9600_v60 = vround.rtne.f32 %v10340_v30  ;;  %v9601_v38 = vround.rtne.f32 %v10342_v31  ;;  %v10420_v6 = vpop.permute.xlu1 %756 }
 0x1c9   : > { %v9602_v10 = vround.rtne.f32 %v10344_v58  ;;  %v9603_v36 = vround.rtne.f32 %v10346_v0  ;;  %v9604_v29 = vround.rtne.f32 %v10348_v61  ;;  %v9605_v9 = vround.rtne.f32 %v10350_v63  ;;  %13674 = vst [vmem:[#allocation39_spill] sm:$0xff] %v10420_v6 }
 0x1ca   : > { %v9606_v18 = vround.rtne.f32 %v10352_v1  ;;  %v9607_v21 = vround.rtne.f32 %v10354_v2  ;;  %v9608_v57 = vround.rtne.f32 %v10356_v4  ;;  %v9609_v62 = vround.rtne.f32 %v10358_v7 }
 0x1cb   : > { %v9610_v30 = vround.rtne.f32 %v10362_v3  ;;  %v9611_v31 = vround.rtne.f32 %v10364_v13  ;;  %v9612_v58 = vround.rtne.f32 %v10366_v15  ;;  %v9613_v0 = vround.rtne.f32 %v10368_v17 }
 0x1cc   : > { %v9614_v61 = vround.rtne.f32 %v10370_v20  ;;  %v9615_v63 = vround.rtne.f32 %v10372_v22  ;;  %v9616_v1 = vround.rtne.f32 %v10374_v23  ;;  %v9617_v2 = vround.rtne.f32 %v10376_v8  ;;  %v10446_v6 = vpop.permute.xlu1 %761 }
 0x1cd   : > { %v572_v4 = vmul.f32 %v9586_v24, %v10243_v16  ;;  %v573_v7 = vmul.f32 %v9587_v11, %v10243_v16  ;;  %v574_v3 = vmul.f32 %v9588_v25, %v10243_v16  ;;  %v575_v13 = vmul.f32 %v9589_v26, %v10243_v16  ;;  %13675 = vst [vmem:[#allocation40_spill] sm:$0xff] %v10446_v6 }
 0x1ce   : > { %v576_v15 = vmul.f32 %v9590_v27, %v10243_v16  ;;  %v577_v17 = vmul.f32 %v9591_v32, %v10243_v16  ;;  %v578_v20 = vmul.f32 %v9592_v44, %v10243_v16  ;;  %v579_v22 = vmul.f32 %v9593_v46, %v10243_v16 }
 0x1cf   : > { %v580_v23 = vmul.f32 %v9594_v48, %v10243_v16  ;;  %v581_v8 = vmul.f32 %v9595_v50, %v10243_v16  ;;  %v582_v11 = vmul.f32 %v9596_v42, %v10243_v16  ;;  %v583_v24 = vmul.f32 %v9597_v54, %v10243_v16 }
 0x1d0   : > { %v584_v25 = vmul.f32 %v9598_v56, %v10243_v16  ;;  %v585_v26 = vmul.f32 %v9599_v40, %v10243_v16  ;;  %v586_v27 = vmul.f32 %v9600_v60, %v10243_v16  ;;  %v587_v32 = vmul.f32 %v9601_v38, %v10243_v16 }
 0x1d1   : > { %v588_v44 = vmul.f32 %v9602_v10, %v10243_v16  ;;  %v589_v46 = vmul.f32 %v9603_v36, %v10243_v16  ;;  %v590_v48 = vmul.f32 %v9604_v29, %v10243_v16  ;;  %v591_v50 = vmul.f32 %v9605_v9, %v10243_v16 }
 0x1d2   : > { %v592_v42 = vmul.f32 %v9606_v18, %v10243_v16  ;;  %v593_v54 = vmul.f32 %v9607_v21, %v10243_v16  ;;  %v594_v56 = vmul.f32 %v9608_v57, %v10243_v16  ;;  %v595_v40 = vmul.f32 %v9609_v62, %v10243_v16 }
 0x1d3   : > { %v596_v60 = vmul.f32 %v9610_v30, %v10243_v16  ;;  %v597_v38 = vmul.f32 %v9611_v31, %v10243_v16  ;;  %v598_v10 = vmul.f32 %v9612_v58, %v10243_v16  ;;  %v599_v36 = vmul.f32 %v9613_v0, %v10243_v16 }
 0x1d4   : > { %v600_v29 = vmul.f32 %v9614_v61, %v10243_v16  ;;  %v601_v9 = vmul.f32 %v9615_v63, %v10243_v16  ;;  %v602_v18 = vmul.f32 %v9616_v1, %v10243_v16  ;;  %v603_v21 = vmul.f32 %v9617_v2, %v10243_v16 }
 0x1d5   : > { %v604_v57 = vadd.f32 %v572_v4, %v10234_v12  ;;  %v605_v62 = vadd.f32 %v573_v7, %v10234_v12  ;;  %v606_v30 = vadd.f32 %v574_v3, %v10234_v12  ;;  %v607_v31 = vadd.f32 %v575_v13, %v10234_v12 }
 0x1d6   : > { %v608_v58 = vadd.f32 %v576_v15, %v10234_v12  ;;  %v609_v0 = vadd.f32 %v577_v17, %v10234_v12  ;;  %v610_v61 = vadd.f32 %v578_v20, %v10234_v12  ;;  %v611_v63 = vadd.f32 %v579_v22, %v10234_v12 }
 0x1d7   : > { %v612_v16 = vadd.f32 %v580_v23, %v10234_v12  ;;  %v613_v1 = vadd.f32 %v581_v8, %v10234_v12  ;;  %v614_v2 = vadd.f32 %v582_v11, %v10234_v12  ;;  %v615_v4 = vadd.f32 %v583_v24, %v10234_v12 }
 0x1d8   : > { %v616_v7 = vadd.f32 %v584_v25, %v10234_v12  ;;  %v617_v3 = vadd.f32 %v585_v26, %v10234_v12  ;;  %v618_v13 = vadd.f32 %v586_v27, %v10234_v12  ;;  %v619_v15 = vadd.f32 %v587_v32, %v10234_v12  ;;  %v10472_v26 = vpop.permute.xlu1 %766 }
 0x1d9   : > { %v620_v17 = vadd.f32 %v588_v44, %v10234_v12  ;;  %v621_v20 = vadd.f32 %v589_v46, %v10234_v12  ;;  %v622_v22 = vadd.f32 %v590_v48, %v10234_v12  ;;  %v623_v23 = vadd.f32 %v591_v50, %v10234_v12  ;;  %13676 = vst [vmem:[#allocation41_spill] sm:$0xff] %v10472_v26 }
 0x1da   : > { %v624_v8 = vadd.f32 %v592_v42, %v10234_v12  ;;  %v625_v11 = vadd.f32 %v593_v54, %v10234_v12  ;;  %v626_v24 = vadd.f32 %v594_v56, %v10234_v12  ;;  %v627_v25 = vadd.f32 %v595_v40, %v10234_v12 }
 0x1db   : > { %v628_v27 = vadd.f32 %v596_v60, %v10234_v12  ;;  %v629_v32 = vadd.f32 %v597_v38, %v10234_v12  ;;  %v630_v44 = vadd.f32 %v598_v10, %v10234_v12  ;;  %v631_v46 = vadd.f32 %v599_v36, %v10234_v12 }
 0x1dc   : > { %v632_v48 = vadd.f32 %v600_v29, %v10234_v12  ;;  %v633_v50 = vadd.f32 %v601_v9, %v10234_v12  ;;  %v634_v42 = vadd.f32 %v602_v18, %v10234_v12  ;;  %v635_v54 = vadd.f32 %v603_v21, %v10234_v12 }
 0x1dd   : > { %v10485_v56 = vsel %vm472_vm0, %v604_v57, %v9920_v33  ;;  %v10490_v40 = vsel %vm472_vm0, %v605_v62, %v9924_v35  ;;  %v10495_v60 = vsel %vm472_vm0, %v606_v30, %v9928_v37  ;;  %v10500_v38 = vsel %vm472_vm0, %v607_v31, %v9932_v39 }
 0x1de   : > { %v10505_v12 = vsel %vm472_vm0, %v608_v58, %v9936_v41  ;;  %v10510_v10 = vsel %vm472_vm0, %v609_v0, %v9940_v43  ;;  %v10515_v36 = vsel %vm472_vm0, %v610_v61, %v9944_v45  ;;  %v10520_v29 = vsel %vm472_vm0, %v611_v63, %v9948_v47  ;;  %670 = vst [vmem:[#allocation2 + $0x18] sm:$0xff] %v10485_v56  ;;  %v10574_v0 = vpop.permute.xlu1 %771  ;;  %v13678_v63 = vld [vmem:[#allocation6_spill] sm:$0xff]  ;;  %v9692_v45 = vld [vmem:[%s13263_s2 + $0xb8] sm:$0xff]  }
 0x1df   : > { %671 = vst [vmem:[#allocation2 + $0x20] sm:$0xff] %v10490_v40  ;;  %672 = vst [vmem:[#allocation2 + $0x28] sm:$0xff] %v10495_v60  ;;  %v10529_v9 = vsel %vm472_vm0, %v612_v16, %v9952_v49  ;;  %v10534_v18 = vsel %vm472_vm0, %v613_v1, %v9956_v51  ;;  %v10539_v21 = vsel %vm472_vm0, %v614_v2, %v9960_v53  ;;  %v13679_v1 = vld [vmem:[#allocation8_spill] sm:$0xff] }
 0x1e0   : > { %673 = vst [vmem:[#allocation2 + $0x30] sm:$0xff] %v10500_v38  ;;  %v10544_v57 = vsel %vm472_vm0, %v615_v4, %v9964_v55  ;;  %674 = vst [vmem:[#allocation2 + $0x38] sm:$0xff] %v10505_v12  ;;  %v10553_v62 = vsel %vm472_vm0, %v616_v7, %v9972_v59  ;;  %v10558_v30 = vsel %vm472_vm0, %v617_v3, %v9986_v5  ;;  %v13680_v4 = vld [vmem:[#allocation10_spill] sm:$0xff]  ;;  %v13681_v3 = vld [vmem:[#allocation12_spill] sm:$0xff] }
 0x1e1   : > { %675 = vst [vmem:[#allocation2 + $0x40] sm:$0xff] %v10510_v10  ;;  %676 = vst [vmem:[#allocation2 + $0x48] sm:$0xff] %v10515_v36  ;;  %v10563_v31 = vsel %vm472_vm0, %v618_v13, %v10006_v19  ;;  %v10568_v58 = vsel %vm472_vm0, %v619_v15, %v10016_v28  ;;  %v10579_v61 = vsel %vm472_vm0, %v620_v17, %v9922_v34  ;;  %v13682_v15 = vld [vmem:[#allocation14_spill] sm:$0xff] }
 0x1e2   : > { %677 = vst [vmem:[#allocation2 + $0x50] sm:$0xff] %v10520_v29  ;;  %678 = vst [vmem:[#allocation2 + $0x58] sm:$0xff] %v10529_v9  ;;  %v10584_v16 = vsel %vm472_vm0, %v621_v20, %v13678_v63  ;;  %v10589_v2 = vsel %vm472_vm0, %v622_v22, %v13679_v1  ;;  %v10594_v7 = vsel %vm472_vm0, %v623_v23, %v13680_v4  ;;  %v13683_v20 = vld [vmem:[#allocation16_spill] sm:$0xff]  ;;  %v13684_v23 = vld [vmem:[#allocation18_spill] sm:$0xff] }
 0x1e3   : > { %679 = vst [vmem:[#allocation2 + $0x60] sm:$0xff] %v10534_v18  ;;  %680 = vst [vmem:[#allocation2 + $0x68] sm:$0xff] %v10539_v21  ;;  %v10603_v13 = vsel %vm472_vm0, %v624_v8, %v13681_v3  ;;  %v10608_v17 = vsel %vm472_vm0, %v625_v11, %v13682_v15  ;;  %v10613_v22 = vsel %vm472_vm0, %v626_v24, %v13683_v20  ;;  %v13685_v8 = vld [vmem:[#allocation20_spill] sm:$0xff]  ;;  %v13686_v24 = vld [vmem:[#allocation22_spill] sm:$0xff] }
 0x1e4   : > { %681 = vst [vmem:[#allocation2 + $0x70] sm:$0xff] %v10544_v57  ;;  %13677 = vst [vmem:[#allocation42_spill] sm:$0xff] %v10574_v0  ;;  %v10618_v28 = vsel %vm472_vm0, %v627_v25, %v13684_v23  ;;  %v10627_v11 = vsel %vm472_vm0, %v628_v27, %v13685_v8  ;;  %v10632_v20 = vsel %vm472_vm0, %v629_v32, %v13686_v24  ;;  %v13687_v25 = vld [vmem:[#allocation24_spill] sm:$0xff]  ;;  %v13688_v19 = vld [vmem:[#allocation26_spill] sm:$0xff] }
 0x1e5   : > { %682 = vst [vmem:[#allocation2 + $0x78] sm:$0xff] %v10553_v62  ;;  %683 = vst [vmem:[#allocation2 + $0x80] sm:$0xff] %v10558_v30  ;;  %v10637_v23 = vsel %vm472_vm0, %v630_v44, %v13687_v25  ;;  %v10642_v15 = vsel %vm472_vm0, %v631_v46, %v13688_v19  ;;  %v13689_v27 = vld [vmem:[#allocation28_spill] sm:$0xff]  ;;  %v13690_v44 = vld [vmem:[#allocation30_spill] sm:$0xff]  ;;  %v992_v14 = vpack.c.bf16 %v10500_v38, %v10495_v60 }
 0x1e6   : > { %684 = vst [vmem:[#allocation2 + $0x88] sm:$0xff] %v10563_v31  ;;  %685 = vst [vmem:[#allocation2 + $0x90] sm:$0xff] %v10568_v58  ;;  %v10651_v32 = vsel %vm472_vm0, %v632_v48, %v13689_v27  ;;  %v10656_v25 = vsel %vm472_vm0, %v633_v50, %v13690_v44  ;;  %v13691_v46 = vld [vmem:[#allocation33_spill] sm:$0xff]  ;;  %v13692_v24 = vld [vmem:[#allocation34_spill] sm:$0xff]  ;;  %v991_v48 = vpack.c.bf16 %v10490_v40, %v10485_v56 }
 0x1e7   : > { %686 = vst [vmem:[#allocation2 + $0x98] sm:$0xff] %v10579_v61  ;;  %687 = vst [vmem:[#allocation2 + $0xa0] sm:$0xff] %v10584_v16  ;;  %v668_v19 = vsel %vm472_vm0, %v634_v42, %v13691_v46  ;;  %v669_v8 = vsel %vm472_vm0, %v635_v54, %v13692_v24  ;;  %v9678_v50 = vld [vmem:[%s13263_s2 + $0x8] sm:$0xff]   ;;  %v10677_v42 = vpop.permute.xlu1 %776  ;;  %v13694_v54 = vld [vmem:[#allocation35_spill] sm:$0xff]  ;;  %v993_v40 = vpack.c.bf16 %v10510_v10, %v10505_v12 }
 0x1e8   : > { %688 = vst [vmem:[#allocation2 + $0xa8] sm:$0xff] %v10589_v2  ;;  %689 = vst [vmem:[#allocation2 + $0xb0] sm:$0xff] %v10594_v7  ;;  %8223 = vmatmul.mubr.bf16.vlgmr.msra.gmra.mrb[0].mxu0 %v991_v48  ;;  %v9680_v60 = vld [vmem:[%s13263_s2 + $0x18] sm:$0xff]   ;;  %v994_v38 = vpack.c.bf16 %v10520_v29, %v10515_v36  ;;  %v995_v12 = vpack.c.bf16 %v10534_v18, %v10529_v9  ;;  %v9682_v10 = vld [vmem:[%s13263_s2 + $0x28] sm:$0xff]   ;;  %v996_v36 = vpack.c.bf16 %v10544_v57, %v10539_v21 }
 0x1e9   : > { %690 = vst [vmem:[#allocation2 + $0xb8] sm:$0xff] %v10603_v13  ;;  %691 = vst [vmem:[#allocation2 + $0xc0] sm:$0xff] %v10608_v17  ;;  %8255 = vmatpush3.bf16.msra.mxu0 %v13694_v54  ;;  %8226 = vmatprep.mubr.bf16.mxu0 %v992_v14  ;;  %v9683_v14 = vld [vmem:[%s13263_s2 + $0x30] sm:$0xff]   ;;  %v997_v9 = vpack.c.bf16 %v10558_v30, %v10553_v62  ;;  %v9684_v18 = vld [vmem:[%s13263_s2 + $0x38] sm:$0xff]   ;;  %v998_v21 = vpack.c.bf16 %v10568_v58, %v10563_v31 }
 0x1ea   : > { %692 = vst [vmem:[#allocation2 + $0xc8] sm:$0xff] %v10613_v22  ;;  %693 = vst [vmem:[#allocation2 + $0xd0] sm:$0xff] %v10618_v28  ;;  %8256 = vmatprep.subr.bf16.mxu0 %v9678_v50  ;;  %v9685_v62 = vld [vmem:[%s13263_s2 + $0x80] sm:$0xff]   ;;  %v1000_v31 = vpack.c.bf16 %v10594_v7, %v10589_v2  ;;  %v1003_v2 = vpack.c.bf16 %v10632_v20, %v10627_v11  ;;  %v1004_v7 = vpack.c.bf16 %v10642_v15, %v10637_v23  ;;  %v10790_v24 = vld [vmem:[#allocation2 + $0x4f] sm:$0xff] }
 0x1eb   : > { %694 = vst [vmem:[#allocation2 + $0xd8] sm:$0xff] %v10627_v11  ;;  %695 = vst [vmem:[#allocation2 + $0xe0] sm:$0xff] %v10632_v20  ;;  %v10683_v56 = vpop.permute.xlu1 %781  ;;  %v1005_v20 = vpack.c.bf16 %v10656_v25, %v10651_v32  ;;  %v10759_v11 = vld [vmem:[#allocation2 + $0x17] sm:$0xff]  ;;  %v10812_v3 = vld [vmem:[#allocation2 + $0x5f] sm:$0xff] }
 0x1ec   : > { %696 = vst [vmem:[#allocation2 + $0xe8] sm:$0xff] %v10637_v23  ;;  %697 = vst [vmem:[#allocation2 + $0xf0] sm:$0xff] %v10642_v15  ;;  %v10761_v15 = vld [vmem:[#allocation2 + $0x1f] sm:$0xff]  ;;  %v10810_v5 = vld [vmem:[#allocation2 + $0x57] sm:$0xff] }
 0x1ed   : > { %698 = vst [vmem:[#allocation2 + $0xf8] sm:$0xff] %v10651_v32  ;;  %699 = vst [vmem:[#allocation2 + $0x100] sm:$0xff] %v10656_v25  ;;  %8257 = vmatpush3.bf16.msra.mxu0 %v9678_v50  ;;  %v10709_v50 = vpop.permute.xlu0 %741  ;;  %v13713_v25 = vld [vmem:[#allocation39_spill] sm:$0xff]  ;;  %v9688_v44 = vld [vmem:[%s13263_s2 + $0x98] sm:$0xff]  }
 0x1ee   : > { %700 = vst [vmem:[#allocation2 + $0x108] sm:$0xff] %v668_v19  ;;  %701 = vst [vmem:[#allocation2 + $0x110] sm:$0xff] %v669_v8  ;;  %v9679_v19 = vld [vmem:[%s13263_s2 + $0x10] sm:$0xff]   ;;  %v9681_v8 = vld [vmem:[%s13263_s2 + $0x20] sm:$0xff]  }
 0x1ef   : > { %13693 = vst [vmem:[#allocation43_spill] sm:$0xff] %v10677_v42  ;;  %13695 = vst [vmem:[#allocation35_spill] sm:$0xff] %v10683_v56  ;;  %8258 = vmatprep.subr.bf16.mxu0 %v9679_v19  ;;  %v10695_v48 = vpop.permute.xlu1 %786  ;;  %v10816_v4 = vld [vmem:[#allocation2 + $0x67] sm:$0xff]  ;;  %v10818_v55 = vld [vmem:[#allocation2 + $0x6f] sm:$0xff] }
 0x1f0   : > { %8227 = vmatmul.mubr.bf16.gmra.mrb[4].mxu0 %v993_v40  ;;  %13696 = vst [vmem:[#allocation44_spill] sm:$0xff] %v10695_v48  ;;  %13698 = vst [vmem:[#allocation46_spill] sm:$0xff] %v10709_v50  ;;  %v9690_v1 = vld [vmem:[%s13263_s2 + $0xa8] sm:$0xff]   ;;  %v10838_v63 = vld [vmem:[#allocation2 + $0x77] sm:$0xff] }
 0x1f1   : > { %8230 = vmatprep.mubr.bf16.mxu0 %v994_v38  ;;  %8259 = vmatpush3.bf16.msra.mxu0 %v9679_v19  ;;  %v10720_v54 = vpop.permute.xlu0 %791  ;;  %v999_v19 = vpack.c.bf16 %v10584_v16, %v10579_v61  ;;  %v1001_v38 = vpack.c.bf16 %v10608_v17, %v10603_v13  ;;  %v703_v13 = vld [vmem:[#allocation2 + $0xf] sm:$0xff]  ;;  %v10840_v51 = vld [vmem:[#allocation2 + $0x7f] sm:$0xff]  ;;  %v10844_v49 = vld [vmem:[#allocation2 + $0x87] sm:$0xff] }
 0x1f2   : > { %8260 = vmatprep.subr.bf16.mxu0 %v9680_v60  ;;  %13700 = vst [vmem:[#allocation48_spill] sm:$0xff] %v10720_v54  ;;  %v10846_v47 = vld [vmem:[#allocation2 + $0x8f] sm:$0xff]  ;;  %v10866_v41 = vld [vmem:[#allocation2 + $0x97] sm:$0xff]  ;;  %v10868_v39 = vld [vmem:[#allocation2 + $0x9f] sm:$0xff] }
 0x1f3   : > { %v10704_v29 = vpop.permute.xlu1 %796  ;;  %13724 = vst [vmem:[#allocation69_spill] sm:$0xff] %v10868_v39  ;;  %v10870_v37 = vld [vmem:[#allocation2 + $0xa7] sm:$0xff]  ;;  %v10872_v35 = vld [vmem:[#allocation2 + $0xaf] sm:$0xff] }
 0x1f4   : > { %13697 = vst [vmem:[#allocation45_spill] sm:$0xff] %v10704_v29  ;;  %13725 = vst [vmem:[#allocation70_spill] sm:$0xff] %v10870_v37 }
 0x1f5   : > { %8261 = vmatpush3.bf16.msra.mxu0 %v9680_v60  ;;  %v10731_v58 = vpop.permute.xlu0 %801  ;;  %13726 = vst [vmem:[#allocation71_spill] sm:$0xff] %v10872_v35 }
 0x1f6   : > { %8262 = vmatprep.subr.bf16.mxu0 %v9681_v8  ;;  %13702 = vst [vmem:[#allocation50_spill] sm:$0xff] %v10731_v58 }
 0x1f7   : > { %v10718_v57 = vpop.permute.xlu1 %806 }
 0x1f8   : > { %8231 = vmatmul.mubr.bf16.gmra.mrb[8].mxu0 %v995_v12  ;;  %13699 = vst [vmem:[#allocation47_spill] sm:$0xff] %v10718_v57 }
 0x1f9   : > { %8234 = vmatprep.mubr.bf16.mxu0 %v996_v36  ;;  %8263 = vmatpush3.bf16.msra.mxu0 %v9681_v8  ;;  %v10735_v60 = vpop.permute.xlu0 %811  ;;  %v1002_v8 = vpack.c.bf16 %v10618_v28, %v10613_v22  ;;  %v895_v22 = vmul.f32 %v10709_v50, %v703_v13  ;;  %v9686_v13 = vld [vmem:[%s13263_s2 + $0x88] sm:$0xff]  }
 0x1fa   : > { %8264 = vmatprep.subr.bf16.mxu0 %v9682_v10  ;;  %13704 = vst [vmem:[#allocation52_spill] sm:$0xff] %v10735_v60 }
 0x1fb   : > { %v10725_v30 = vpop.permute.xlu1 %816 }
 0x1fc   : > { %13701 = vst [vmem:[#allocation49_spill] sm:$0xff] %v10725_v30 }
 0x1fd   : > { %8265 = vmatpush3.bf16.msra.mxu0 %v9682_v10  ;;  %v10743_v16 = vpop.permute.xlu0 %821  ;;  %v702_v10 = vld [vmem:[#allocation2 + $0x7] sm:$0xff] }
 0x1fe   : > { %8266 = vmatprep.subr.bf16.mxu0 %v9683_v14  ;;  %13706 = vst [vmem:[#allocation54_spill] sm:$0xff] %v10743_v16  ;;  %v894_v28 = vmul.f32 %v10310_v52, %v702_v10 }
 0x1ff   : > { %v10733_v40 = vpop.permute.xlu1 %826 }
 0x200   : > { %8235 = vmatmul.mubr.bf16.gmra.mrb[12].mxu0 %v997_v9  ;;  %13703 = vst [vmem:[#allocation51_spill] sm:$0xff] %v10733_v40  ;;  %v926_v23 = vpack.c.bf16 %v895_v22, %v894_v28  ;;  %v10765_v9 = vld [vmem:[#allocation2 + $0x27] sm:$0xff]  ;;  %v10784_v28 = vld [vmem:[#allocation2 + $0x37] sm:$0xff]  ;;  %v10786_v22 = vld [vmem:[#allocation2 + $0x3f] sm:$0xff] }
 0x201   : > { %8238 = vmatprep.mubr.bf16.mxu0 %v998_v21  ;;  %8267 = vmatpush3.bf16.msra.mxu0 %v9683_v14  ;;  %v10751_v17 = vpop.permute.xlu0 %831  ;;  %v13711_v21 = vld [vmem:[#allocation37_spill] sm:$0xff]  ;;  %v898_v32 = vmul.f32 %v10765_v9, %v13713_v25 }
 0x202   : > { %8268 = vmatprep.subr.bf16.mxu0 %v9684_v18  ;;  %13708 = vst [vmem:[#allocation56_spill] sm:$0xff] %v10751_v17 }
 0x203   : > { %v10741_v61 = vpop.permute.xlu1 %836 }
 0x204   : > { %13705 = vst [vmem:[#allocation53_spill] sm:$0xff] %v10741_v61 }
 0x205   : > { %8269 = vmatpush3.bf16.msra.mxu0 %v9684_v18  ;;  %v10763_v14 = vpop.permute.xlu0 %841  ;;  %v10767_v18 = vld [vmem:[#allocation2 + $0x2f] sm:$0xff] }
 0x206   : > { %8302 = vmatprep.subr.bf16.mxu0 %v9685_v62  ;;  %13710 = vst [vmem:[#allocation58_spill] sm:$0xff] %v10763_v14 }
 0x207   : > { %v10749_v12 = vpop.permute.xlu1 %846 }
 0x208   : > { %8239 = vmatmul.mubr.bf16.gmra.mrb[16].mxu0 %v999_v19  ;;  %13707 = vst [vmem:[#allocation55_spill] sm:$0xff] %v10749_v12  ;;  %v896_v19 = vmul.f32 %v13711_v21, %v10759_v11 }
 0x209   : > { %8242 = vmatprep.mubr.bf16.mxu0 %v1000_v31  ;;  %v13712_v31 = vld [vmem:[#allocation38_spill] sm:$0xff] }
 0x20b   : > { %v10755_v36 = vpop.permute.xlu1 %856 }
 0x20c   : > { %13709 = vst [vmem:[#allocation57_spill] sm:$0xff] %v10755_v36 }
 0x210   : > { %8243 = vmatmul.mubr.bf16.gmra.mrb[20].mxu0 %v1001_v38  ;;  %v897_v38 = vmul.f32 %v13712_v31, %v10761_v15 }
 0x211   : > { %8246 = vmatprep.mubr.bf16.mxu0 %v1002_v8  ;;  %v899_v8 = vmul.f32 %v10767_v18, %v10446_v6 }
 0x212   : > { %v927_v10 = vpack.c.bf16 %v897_v38, %v896_v19  ;;  %v900_v19 = vmul.f32 %v10784_v28, %v10472_v26  ;;  %v901_v38 = vmul.f32 %v10786_v22, %v10574_v0 }
 0x218   : > { %8247 = vmatmul.mubr.bf16.gmra.mrb[24].mxu0 %v1003_v2  ;;  %v10777_v2 = vpop.permute.xlu1 %866 }
 0x219   : > { %8250 = vmatprep.mubr.bf16.mxu0 %v1004_v7  ;;  %13714 = vst [vmem:[#allocation59_spill] sm:$0xff] %v10777_v2  ;;  %v10779_v7 = vpop.permute.xlu0 %851 }
 0x21a   : > { %13715 = vst [vmem:[#allocation60_spill] sm:$0xff] %v10779_v7 }
 0x21c   : > { %v10792_v46 = vpop.permute.xlu1 %876 }
 0x21d   : > { %13716 = vst [vmem:[#allocation61_spill] sm:$0xff] %v10792_v46 }
 0x220   : > { %8251 = vmatmul.mubr.bf16.gmra.mrb[28].mxu0 %v1005_v20  ;;  %v928_v20 = vpack.c.bf16 %v899_v8, %v898_v32  ;;  %v9687_v32 = vld [vmem:[%s13263_s2 + $0x90] sm:$0xff]   ;;  %v10814_v59 = vpop.permute.xlu1 %886 }
 0x221   : > { %8270 = vmatprep.mubr.bf16.mxu0 %v926_v23  ;;  %v10788_v23 = vld [vmem:[#allocation2 + $0x47] sm:$0xff]  ;;  %13718 = vst [vmem:[#allocation63_spill] sm:$0xff] %v10814_v59 }
 0x222   : > { %v902_v8 = vmul.f32 %v10677_v42, %v10788_v23 }
 0x228   : > { %8271 = vmatmul.mubr.bf16.vlgmr.msra.gmra.mrb[0].mxu0 %v927_v10  ;;  %v10805_v10 = vpop.permute.xlu0 %861 }
 0x229   : > { %8303 = vmatpush3.bf16.msra.mxu0 %v9685_v62  ;;  %8274 = vmatprep.mubr.bf16.mxu0 %v928_v20  ;;  %v903_v62 = vmul.f32 %v10683_v56, %v10790_v24  ;;  %13717 = vst [vmem:[#allocation62_spill] sm:$0xff] %v10805_v10  ;;  %v929_v20 = vpack.c.bf16 %v901_v38, %v900_v19 }
 0x22a   : > { %8304 = vmatprep.subr.bf16.mxu0 %v9686_v13  ;;  %v904_v19 = vmul.f32 %v10695_v48, %v10810_v5  ;;  %v905_v38 = vmul.f32 %v10720_v54, %v10812_v3 }
 0x22b   : > { %v930_v27 = vpack.c.bf16 %v903_v62, %v902_v8  ;;  %v9689_v8 = vld [vmem:[%s13263_s2 + $0xa0] sm:$0xff]   ;;  %v906_v62 = vmul.f32 %v10704_v29, %v10816_v4 }
 0x22d   : > { %8305 = vmatpush3.bf16.msra.mxu0 %v9686_v13  ;;  %v10820_v13 = vpop.permute.xlu0 %871 }
 0x22e   : > { %8306 = vmatprep.subr.bf16.mxu0 %v9687_v32  ;;  %13719 = vst [vmem:[#allocation64_spill] sm:$0xff] %v10820_v13 }
 0x230   : > { %8275 = vmatmul.mubr.bf16.gmra.mrb[4].mxu0 %v929_v20  ;;  %v931_v20 = vpack.c.bf16 %v905_v38, %v904_v19  ;;  %v909_v19 = vmul.f32 %v10735_v60, %v10840_v51  ;;  %v9691_v38 = vld [vmem:[%s13263_s2 + $0xb0] sm:$0xff]  }
 0x231   : > { %8278 = vmatprep.mubr.bf16.mxu0 %v930_v27  ;;  %8307 = vmatpush3.bf16.msra.mxu0 %v9687_v32  ;;  %v907_v27 = vmul.f32 %v10731_v58, %v10818_v55  ;;  %v10833_v32 = vpop.permute.xlu1 %1474  ;;  %v10842_v34 = vpop.permute.xlu0 %881 }
 0x232   : > { %8308 = vmatprep.subr.bf16.mxu0 %v9688_v44  ;;  %13720 = vst [vmem:[#allocation65_spill] sm:$0xff] %v10833_v32  ;;  %13721 = vst [vmem:[#allocation66_spill] sm:$0xff] %v10842_v34 }
 0x233   : > { %v932_v53 = vpack.c.bf16 %v907_v27, %v906_v62  ;;  %v910_v62 = vmul.f32 %v10725_v30, %v10844_v49  ;;  %v911_v27 = vmul.f32 %v10743_v16, %v10846_v47 }
 0x235   : > { %8309 = vmatpush3.bf16.msra.mxu0 %v9688_v44  ;;  %v908_v44 = vmul.f32 %v10718_v57, %v10838_v63  ;;  %v934_v43 = vpack.c.bf16 %v911_v27, %v910_v62  ;;  %v10883_v62 = vld [vmem:[%s13263_s2 + $0xc0] sm:$0xff]   ;;  %v914_v27 = vmul.f32 %v10741_v61, %v10870_v37  ;;  %v10900_v61 = vld [vmem:[#allocation2 + $0xcf] sm:$0xff]  ;;  %v10914_v37 = vld [vmem:[#allocation2 + $0xd7] sm:$0xff] }
 0x236   : > { %8310 = vmatprep.subr.bf16.mxu0 %v9689_v8  ;;  %13732 = vst [vmem:[#allocation77_spill] sm:$0xff] %v10900_v61  ;;  %13735 = vst [vmem:[#allocation80_spill] sm:$0xff] %v10914_v37 }
 0x238   : > { %8279 = vmatmul.mubr.bf16.gmra.mrb[8].mxu0 %v931_v20  ;;  %v10859_v20 = vpop.permute.xlu1 %1482 }
 0x239   : > { %8282 = vmatprep.mubr.bf16.mxu0 %v932_v53  ;;  %8311 = vmatpush3.bf16.msra.mxu0 %v9689_v8  ;;  %13722 = vst [vmem:[#allocation67_spill] sm:$0xff] %v10859_v20  ;;  %v10861_v53 = vpop.permute.xlu0 %891  ;;  %v933_v8 = vpack.c.bf16 %v909_v19, %v908_v44  ;;  %v912_v44 = vmul.f32 %v10733_v40, %v10866_v41  ;;  %v10894_v40 = vld [vmem:[#allocation2 + $0xbf] sm:$0xff] }
 0x23a   : > { %8312 = vmatprep.subr.bf16.mxu0 %v9690_v1  ;;  %13723 = vst [vmem:[#allocation68_spill] sm:$0xff] %v10861_v53  ;;  %v913_v19 = vmul.f32 %v10751_v17, %v10868_v39  ;;  %v10892_v17 = vld [vmem:[#allocation2 + $0xb7] sm:$0xff]  ;;  %13729 = vst [vmem:[#allocation74_spill] sm:$0xff] %v10894_v40  ;;  %v10898_v39 = vld [vmem:[#allocation2 + $0xc7] sm:$0xff] }
 0x23b   : > { %13731 = vst [vmem:[#allocation76_spill] sm:$0xff] %v10898_v39 }
 0x23d   : > { %8313 = vmatpush3.bf16.msra.mxu0 %v9690_v1  ;;  %v10874_v1 = vpop.permute.xlu1 %1486 }
 0x23e   : > { %8314 = vmatprep.subr.bf16.mxu0 %v9691_v38  ;;  %13727 = vst [vmem:[#allocation72_spill] sm:$0xff] %v10874_v1 }
 0x240   : > { %8283 = vmatmul.mubr.bf16.gmra.mrb[12].mxu0 %v933_v8  ;;  %v935_v8 = vpack.c.bf16 %v913_v19, %v912_v44  ;;  %v917_v44 = vmul.f32 %v10779_v7, %v10894_v40  ;;  %v918_v19 = vmul.f32 %v10755_v36, %v10898_v39  ;;  %v10922_v7 = vld [vmem:[#allocation2 + $0xef] sm:$0xff]  ;;  %v920_v36 = vmul.f32 %v10777_v2, %v10914_v37  ;;  %v10936_v39 = vld [vmem:[#allocation2 + $0xf7] sm:$0xff] }
 0x241   : > { %8286 = vmatprep.mubr.bf16.mxu0 %v934_v43  ;;  %8315 = vmatpush3.bf16.msra.mxu0 %v9691_v38  ;;  %v915_v43 = vmul.f32 %v10763_v14, %v10872_v35  ;;  %v10889_v38 = vpop.permute.xlu0 %1478  ;;  %v10896_v16 = vpop.permute.xlu1 %1494  ;;  %13739 = vst [vmem:[#allocation84_spill] sm:$0xff] %v10922_v7  ;;  %v1441_v2 = vld [vmem:[#allocation2 + $0x9] sm:$0xff]  ;;  %v1442_v37 = vld [vmem:[#allocation2 + $0x11] sm:$0xff] }
 0x242   : > { %8316 = vmatprep.subr.bf16.mxu0 %v9692_v45  ;;  %13728 = vst [vmem:[#allocation73_spill] sm:$0xff] %v10889_v38  ;;  %13730 = vst [vmem:[#allocation75_spill] sm:$0xff] %v10896_v16 }
 0x243   : > { %v936_v33 = vpack.c.bf16 %v915_v43, %v914_v27  ;;  %v919_v27 = vmul.f32 %v10805_v10, %v10900_v61 }
 0x245   : > { %8317 = vmatpush3.bf16.msra.mxu0 %v9692_v45  ;;  %v10902_v14 = vpop.permute.xlu0 %1490  ;;  %v916_v45 = vmul.f32 %v10749_v12, %v10892_v17  ;;  %v10912_v43 = vpop.permute.xlu1 %1502  ;;  %v938_v35 = vpack.c.bf16 %v919_v27, %v918_v19  ;;  %v10920_v12 = vld [vmem:[#allocation2 + $0xe7] sm:$0xff] }
 0x246   : > { %8350 = vmatprep.subr.bf16.mxu0 %v10883_v62  ;;  %13733 = vst [vmem:[#allocation78_spill] sm:$0xff] %v10902_v14  ;;  %13734 = vst [vmem:[#allocation79_spill] sm:$0xff] %v10912_v43 }
 0x247   : > { %13738 = vst [vmem:[#allocation83_spill] sm:$0xff] %v10920_v12 }
 0x248   : > { %8287 = vmatmul.mubr.bf16.gmra.mrb[16].mxu0 %v935_v8  ;;  %v937_v8 = vpack.c.bf16 %v917_v44, %v916_v45  ;;  %v922_v45 = vmul.f32 %v10792_v46, %v10920_v12  ;;  %v923_v44 = vmul.f32 %v10842_v34, %v10922_v7  ;;  %v924_v46 = vmul.f32 %v10814_v59, %v10936_v39 }
 0x249   : > { %8290 = vmatprep.mubr.bf16.mxu0 %v936_v33  ;;  %v10916_v33 = vld [vmem:[#allocation2 + $0xdf] sm:$0xff]  ;;  %v10918_v30 = vpop.permute.xlu0 %1498  ;;  %v10932_v19 = vpop.permute.xlu1 %1510  ;;  %v1601_v7 = vmul.f32 %v10833_v32, %v1441_v2 }
 0x24a   : > { %13736 = vst [vmem:[#allocation81_spill] sm:$0xff] %v10916_v33  ;;  %13737 = vst [vmem:[#allocation82_spill] sm:$0xff] %v10918_v30  ;;  %v921_v10 = vmul.f32 %v10820_v13, %v10916_v33  ;;  %v940_v61 = vpack.c.bf16 %v923_v44, %v922_v45  ;;  %v1443_v44 = vld [vmem:[#allocation2 + $0x19] sm:$0xff]  ;;  %v10950_v33 = vld [vmem:[#allocation2 + $0x29] sm:$0xff] }
 0x24b   : > { %13740 = vst [vmem:[#allocation85_spill] sm:$0xff] %v10932_v19  ;;  %v1603_v2 = vmul.f32 %v10859_v20, %v1443_v44  ;;  %v3535_v44 = vld [vmem:[#allocation2 + $0x39] sm:$0xff]  ;;  %v3536_v20 = vld [vmem:[#allocation2 + $0x41] sm:$0xff] }
 0x24d   : > { %v10934_v27 = vpop.permute.xlu0 %1506  ;;  %v10940_v13 = vpop.permute.xlu1 %1518 }
 0x24e   : > { %13741 = vst [vmem:[#allocation86_spill] sm:$0xff] %v10934_v27  ;;  %13742 = vst [vmem:[#allocation87_spill] sm:$0xff] %v10940_v13 }
 0x250   : > { %8291 = vmatmul.mubr.bf16.gmra.mrb[20].mxu0 %v937_v8  ;;  %v939_v8 = vpack.c.bf16 %v921_v10, %v920_v36  ;;  %v1602_v36 = vmul.f32 %v10889_v38, %v1442_v37 }
 0x251   : > { %8294 = vmatprep.mubr.bf16.mxu0 %v938_v35  ;;  %v10938_v35 = vld [vmem:[#allocation2 + $0xff] sm:$0xff]  ;;  %v10948_v10 = vpop.permute.xlu0 %1514  ;;  %v10954_v40 = vpop.permute.xlu1 %1526 }
 0x252   : > { %v925_v34 = vmul.f32 %v10861_v53, %v10938_v35  ;;  %13743 = vst [vmem:[#allocation88_spill] sm:$0xff] %v10948_v10  ;;  %v1633_v12 = vpack.c.bf16 %v1602_v36, %v1601_v7  ;;  %13744 = vst [vmem:[#allocation89_spill] sm:$0xff] %v10954_v40 }
 0x254   : > { %v941_v45 = vpack.c.bf16 %v925_v34, %v924_v46  ;;  %v1605_v34 = vmul.f32 %v10950_v33, %v10902_v14  ;;  %v10975_v14 = vld [vmem:[#allocation2 + $0x51] sm:$0xff] }
 0x255   : > { %v10956_v59 = vpop.permute.xlu0 %1522  ;;  %v10964_v7 = vpop.permute.xlu1 %1534  ;;  %13749 = vst [vmem:[#allocation94_spill] sm:$0xff] %v10975_v14 }
 0x256   : > { %13745 = vst [vmem:[#allocation90_spill] sm:$0xff] %v10956_v59  ;;  %13746 = vst [vmem:[#allocation91_spill] sm:$0xff] %v10964_v7 }
 0x258   : > { %8295 = vmatmul.mubr.bf16.gmra.mrb[24].mxu0 %v939_v8  ;;  %v1444_v8 = vld [vmem:[#allocation2 + $0x21] sm:$0xff] }
 0x259   : > { %8298 = vmatprep.mubr.bf16.mxu0 %v940_v61  ;;  %v10952_v61 = vld [vmem:[#allocation2 + $0x31] sm:$0xff]  ;;  %v1604_v37 = vmul.f32 %v10874_v1, %v1444_v8  ;;  %v10969_v38 = vpop.permute.xlu0 %1530  ;;  %v1608_v8 = vmul.f32 %v3536_v20, %v10912_v43 }
 0x25a   : > { %v1606_v46 = vmul.f32 %v10952_v61, %v10896_v16  ;;  %13747 = vst [vmem:[#allocation92_spill] sm:$0xff] %v10969_v38  ;;  %v10973_v16 = vld [vmem:[#allocation2 + $0x49] sm:$0xff] }
 0x25b   : > { %v1634_v36 = vpack.c.bf16 %v1604_v37, %v1603_v2  ;;  %13748 = vst [vmem:[#allocation93_spill] sm:$0xff] %v10973_v16  ;;  %v9695_v2 = vld [vmem:[%s13263_s2 + $0xd0] sm:$0xff]   ;;  %v1610_v37 = vmul.f32 %v10932_v19, %v10975_v14  ;;  %v10992_v19 = vld [vmem:[#allocation2 + $0x59] sm:$0xff]  ;;  %v10994_v14 = vld [vmem:[#allocation2 + $0x61] sm:$0xff] }
 0x25d   : > { %v10987_v20 = vpop.permute.xlu0 %1538 }
 0x25e   : > { %13751 = vst [vmem:[#allocation96_spill] sm:$0xff] %v10987_v20 }
 0x260   : > { %8299 = vmatmul.mubr.bf16.gmra.mrb[28].mxu0 %v941_v45  ;;  %v9694_v45 = vld [vmem:[%s13263_s2 + $0xc8] sm:$0xff]  }
 0x261   : > { %8318 = vmatprep.mubr.bf16.mxu0 %v1633_v12  ;;  %v1635_v12 = vpack.c.bf16 %v1606_v46, %v1605_v34  ;;  %v10982_v34 = vpop.permute.xlu1 %1542  ;;  %v1607_v46 = vmul.f32 %v3535_v44, %v10918_v30  ;;  %v1612_v44 = vmul.f32 %v10940_v13, %v10994_v14  ;;  %v9698_v13 = vld [vmem:[%s13263_s2 + $0xe8] sm:$0xff]  }
 0x262   : > { %13750 = vst [vmem:[#allocation95_spill] sm:$0xff] %v10982_v34 }
 0x268   : > { %8319 = vmatmul.mubr.bf16.vlgmr.msra.gmra.mrb[0].mxu0 %v1634_v36  ;;  %v1636_v36 = vpack.c.bf16 %v1608_v8, %v1607_v46  ;;  %v11002_v8 = vld [vmem:[#allocation2 + $0x71] sm:$0xff]  ;;  %v11009_v46 = vpop.permute.xlu0 %1546 }
 0x269   : > { %8351 = vmatpush3.bf16.msra.mxu0 %v10883_v62  ;;  %8322 = vmatprep.mubr.bf16.mxu0 %v1635_v12  ;;  %v1609_v62 = vmul.f32 %v10934_v27, %v10973_v16  ;;  %v9696_v12 = vld [vmem:[%s13263_s2 + $0xd8] sm:$0xff]   ;;  %v11000_v27 = vld [vmem:[#allocation2 + $0x69] sm:$0xff]  ;;  %13754 = vst [vmem:[#allocation99_spill] sm:$0xff] %v11002_v8  ;;  %13755 = vst [vmem:[#allocation100_spill] sm:$0xff] %v11009_v46 }
 0x26a   : > { %8352 = vmatprep.subr.bf16.mxu0 %v9694_v45  ;;  %13753 = vst [vmem:[#allocation98_spill] sm:$0xff] %v11000_v27 }
 0x26b   : > { %v1637_v43 = vpack.c.bf16 %v1610_v37, %v1609_v62  ;;  %v9697_v37 = vld [vmem:[%s13263_s2 + $0xe0] sm:$0xff]   ;;  %v1613_v62 = vmul.f32 %v10956_v59, %v11000_v27  ;;  %v9700_v59 = vld [vmem:[%s13263_s2 + $0xf8] sm:$0xff]  }
 0x26d   : > { %8353 = vmatpush3.bf16.msra.mxu0 %v9694_v45  ;;  %v10996_v45 = vpop.permute.xlu1 %1550 }
 0x26e   : > { %8354 = vmatprep.subr.bf16.mxu0 %v9695_v2  ;;  %13752 = vst [vmem:[#allocation97_spill] sm:$0xff] %v10996_v45 }
 0x270   : > { %8323 = vmatmul.mubr.bf16.gmra.mrb[4].mxu0 %v1636_v36 }
 0x271   : > { %8326 = vmatprep.mubr.bf16.mxu0 %v1637_v43  ;;  %8355 = vmatpush3.bf16.msra.mxu0 %v9695_v2  ;;  %v1614_v43 = vmul.f32 %v10954_v40, %v11002_v8  ;;  %v1611_v2 = vmul.f32 %v10948_v10, %v10992_v19  ;;  %v11018_v16 = vpop.permute.xlu1 %1558  ;;  %v11020_v40 = vld [vmem:[#allocation2 + $0x79] sm:$0xff]  ;;  %v11022_v8 = vld [vmem:[#allocation2 + $0x81] sm:$0xff]  ;;  %v11024_v10 = vpop.permute.xlu0 %1554 }
 0x272   : > { %8356 = vmatprep.subr.bf16.mxu0 %v9696_v12  ;;  %13756 = vst [vmem:[#allocation101_spill] sm:$0xff] %v11018_v16  ;;  %13757 = vst [vmem:[#allocation102_spill] sm:$0xff] %v11022_v8 }
 0x273   : > { %v1638_v36 = vpack.c.bf16 %v1612_v44, %v1611_v2  ;;  %v1639_v30 = vpack.c.bf16 %v1614_v43, %v1613_v62  ;;  %13758 = vst [vmem:[#allocation103_spill] sm:$0xff] %v11024_v10  ;;  %v11028_v44 = vld [vmem:[#allocation2 + $0x89] sm:$0xff]  ;;  %v11030_v2 = vld [vmem:[#allocation2 + $0x91] sm:$0xff] }
 0x274   : > { %13759 = vst [vmem:[#allocation104_spill] sm:$0xff] %v11028_v44  ;;  %13760 = vst [vmem:[#allocation105_spill] sm:$0xff] %v11030_v2  ;;  %v9699_v43 = vld [vmem:[%s13263_s2 + $0xf0] sm:$0xff]   ;;  %v1617_v62 = vmul.f32 %v10987_v20, %v11028_v44 }
 0x275   : > { %8357 = vmatpush3.bf16.msra.mxu0 %v9696_v12  ;;  %v1616_v12 = vmul.f32 %v10964_v7, %v11022_v8  ;;  %v11046_v8 = vpop.permute.xlu0 %1562  ;;  %v11054_v20 = vld [vmem:[#allocation2 + $0xa9] sm:$0xff] }
 0x276   : > { %8358 = vmatprep.subr.bf16.mxu0 %v9697_v37  ;;  %13762 = vst [vmem:[#allocation107_spill] sm:$0xff] %v11046_v8  ;;  %13764 = vst [vmem:[#allocation109_spill] sm:$0xff] %v11054_v20 }
 0x278   : > { %8327 = vmatmul.mubr.bf16.gmra.mrb[8].mxu0 %v1638_v36  ;;  %v11041_v36 = vpop.permute.xlu1 %1566 }
 0x279   : > { %8330 = vmatprep.mubr.bf16.mxu0 %v1639_v30  ;;  %8359 = vmatpush3.bf16.msra.mxu0 %v9697_v37  ;;  %v1618_v30 = vmul.f32 %v10982_v34, %v11030_v2  ;;  %v1615_v37 = vmul.f32 %v10969_v38, %v11020_v40  ;;  %13761 = vst [vmem:[#allocation106_spill] sm:$0xff] %v11041_v36  ;;  %v11048_v34 = vld [vmem:[#allocation2 + $0x99] sm:$0xff]  ;;  %v11050_v38 = vld [vmem:[#allocation2 + $0xa1] sm:$0xff] }
 0x27a   : > { %8360 = vmatprep.subr.bf16.mxu0 %v9698_v13  ;;  %13763 = vst [vmem:[#allocation108_spill] sm:$0xff] %v11050_v38  ;;  %v11073_v2 = vld [vmem:[#allocation2 + $0xc1] sm:$0xff] }
 0x27b   : > { %v1640_v7 = vpack.c.bf16 %v1616_v12, %v1615_v37  ;;  %v1641_v27 = vpack.c.bf16 %v1618_v30, %v1617_v62  ;;  %v11056_v12 = vld [vmem:[#allocation2 + $0xb1] sm:$0xff]  ;;  %v9701_v30 = vld [vmem:[%s13263_s2 + $0x100] sm:$0xff]   ;;  %v1621_v37 = vmul.f32 %v11024_v10, %v11054_v20  ;;  %v11069_v62 = vpop.permute.xlu0 %1570 }
 0x27c   : > { %13765 = vst [vmem:[#allocation110_spill] sm:$0xff] %v11056_v12  ;;  %13767 = vst [vmem:[#allocation112_spill] sm:$0xff] %v11069_v62 }
 0x27d   : > { %8361 = vmatpush3.bf16.msra.mxu0 %v9698_v13  ;;  %v1620_v13 = vmul.f32 %v10996_v45, %v11050_v38  ;;  %v11071_v38 = vld [vmem:[#allocation2 + $0xb9] sm:$0xff] }
 0x27e   : > { %8362 = vmatprep.subr.bf16.mxu0 %v9699_v43 }
 0x27f   : > { %v11083_v10 = vpop.permute.xlu0 %1578 }
 0x280   : > { %8331 = vmatmul.mubr.bf16.gmra.mrb[12].mxu0 %v1640_v7  ;;  %v11063_v7 = vpop.permute.xlu1 %1574  ;;  %13770 = vst [vmem:[#allocation115_spill] sm:$0xff] %v11083_v10 }
 0x281   : > { %8334 = vmatprep.mubr.bf16.mxu0 %v1641_v27  ;;  %8363 = vmatpush3.bf16.msra.mxu0 %v9699_v43  ;;  %v1622_v27 = vmul.f32 %v11018_v16, %v11056_v12  ;;  %13766 = vst [vmem:[#allocation111_spill] sm:$0xff] %v11063_v7  ;;  %v1619_v43 = vmul.f32 %v11009_v46, %v11048_v34  ;;  %v11079_v12 = vld [vmem:[#allocation2 + $0xd1] sm:$0xff] }
 0x282   : > { %8364 = vmatprep.subr.bf16.mxu0 %v9700_v59  ;;  %v1624_v46 = vmul.f32 %v11041_v36, %v11073_v2  ;;  %13769 = vst [vmem:[#allocation114_spill] sm:$0xff] %v11079_v12  ;;  %v11093_v36 = vld [vmem:[#allocation2 + $0xe1] sm:$0xff] }
 0x283   : > { %v1642_v45 = vpack.c.bf16 %v1620_v13, %v1619_v43  ;;  %v1643_v44 = vpack.c.bf16 %v1622_v27, %v1621_v37  ;;  %v11095_v20 = vpop.permute.xlu0 %1586 }
 0x284   : > { %v11075_v16 = vpop.permute.xlu1 %1582  ;;  %13773 = vst [vmem:[#allocation118_spill] sm:$0xff] %v11095_v20 }
 0x285   : > { %8365 = vmatpush3.bf16.msra.mxu0 %v9700_v59  ;;  %13768 = vst [vmem:[#allocation113_spill] sm:$0xff] %v11075_v16  ;;  %v1626_v59 = vmul.f32 %v11063_v7, %v11079_v12  ;;  %v1628_v7 = vmul.f32 %v11075_v16, %v11093_v36  ;;  %v11099_v12 = vld [vmem:[#allocation2 + $0xf1] sm:$0xff] }
 0x286   : > { %8398 = vmatprep.subr.bf16.mxu0 %v9701_v30  ;;  %13774 = vst [vmem:[#allocation119_spill] sm:$0xff] %v11099_v12 }
 0x287   : > { %v11113_v16 = vpop.permute.xlu0 %1594 }
 0x288   : > { %8335 = vmatmul.mubr.bf16.gmra.mrb[16].mxu0 %v1642_v45  ;;  %v1623_v45 = vmul.f32 %v11046_v8, %v11071_v38  ;;  %v11091_v37 = vpop.permute.xlu1 %1590  ;;  %v11101_v8 = vld [vmem:[#allocation2 + $0xd9] sm:$0xff]  ;;  %13776 = vst [vmem:[#allocation121_spill] sm:$0xff] %v11113_v16 }
 0x289   : > { %8338 = vmatprep.mubr.bf16.mxu0 %v1643_v44  ;;  %v11087_v44 = vld [vmem:[#allocation2 + $0xc9] sm:$0xff]  ;;  %13772 = vst [vmem:[#allocation117_spill] sm:$0xff] %v11091_v37 }
 0x28a   : > { %13771 = vst [vmem:[#allocation116_spill] sm:$0xff] %v11087_v44  ;;  %v1625_v13 = vmul.f32 %v11069_v62, %v11087_v44  ;;  %v1644_v27 = vpack.c.bf16 %v1624_v46, %v1623_v45  ;;  %v1630_v62 = vmul.f32 %v11091_v37, %v11099_v12  ;;  %v1627_v46 = vmul.f32 %v11083_v10, %v11101_v8  ;;  %v11115_v44 = vld [vmem:[#allocation2 + $0x101] sm:$0xff]  ;;  %v11119_v12 = vld [vmem:[#allocation2 + $0xf9] sm:$0xff] }
 0x28b   : > { %v1939_v10 = vmul.f32 %v10310_v52, %v10759_v11  ;;  %v1944_v11 = vmul.f32 %v10786_v22, %v10446_v6  ;;  %v1947_v22 = vmul.f32 %v10677_v42, %v10810_v5  ;;  %v1950_v5 = vmul.f32 %v10720_v54, %v10818_v55 }
 0x28c   : > { %v1645_v43 = vpack.c.bf16 %v1626_v59, %v1625_v13  ;;  %v11107_v59 = vld [vmem:[#allocation2 + $0xe9] sm:$0xff]  ;;  %v1646_v13 = vpack.c.bf16 %v1628_v7, %v1627_v46  ;;  %v1940_v7 = vmul.f32 %v10709_v50, %v10761_v15  ;;  %v1953_v55 = vmul.f32 %v10718_v57, %v10844_v49  ;;  %v9708_v49 = vld [vmem:[%s13263_s2 + $0x138] sm:$0xff]  }
 0x28d   : > { %v1629_v45 = vmul.f32 %v11095_v20, %v11107_v59 }
 0x290   : > { %8339 = vmatmul.mubr.bf16.gmra.mrb[20].mxu0 %v1644_v27  ;;  %v11111_v27 = vpop.permute.xlu1 %1598 }
 0x291   : > { %8342 = vmatprep.mubr.bf16.mxu0 %v1645_v43  ;;  %13775 = vst [vmem:[#allocation120_spill] sm:$0xff] %v11111_v27  ;;  %v1647_v43 = vpack.c.bf16 %v1630_v62, %v1629_v45  ;;  %v1632_v37 = vmul.f32 %v11111_v27, %v11115_v44  ;;  %v1631_v62 = vmul.f32 %v11113_v16, %v11119_v12 }
 0x292   : > { %v1971_v45 = vpack.c.bf16 %v1940_v7, %v1939_v10  ;;  %v1943_v27 = vmul.f32 %v10784_v28, %v13713_v25  ;;  %v9703_v28 = vld [vmem:[%s13263_s2 + $0x110] sm:$0xff]  }
 0x293   : > { %v1648_v46 = vpack.c.bf16 %v1632_v37, %v1631_v62  ;;  %v9702_v37 = vld [vmem:[%s13263_s2 + $0x108] sm:$0xff]   ;;  %v1951_v62 = vmul.f32 %v10704_v29, %v10838_v63  ;;  %v1954_v63 = vmul.f32 %v10735_v60, %v10846_v47 }
 0x294   : > { %v1973_v10 = vpack.c.bf16 %v1944_v11, %v1943_v27  ;;  %v1948_v27 = vmul.f32 %v10683_v56, %v10812_v3  ;;  %v9705_v3 = vld [vmem:[%s13263_s2 + $0x120] sm:$0xff]   ;;  %v13780_v47 = vld [vmem:[#allocation70_spill] sm:$0xff] }
 0x296   : > { %v1975_v7 = vpack.c.bf16 %v1948_v27, %v1947_v22  ;;  %v13782_v27 = vld [vmem:[#allocation71_spill] sm:$0xff] }
 0x298   : > { %8343 = vmatmul.mubr.bf16.gmra.mrb[24].mxu0 %v1646_v13  ;;  %v1941_v13 = vmul.f32 %v10765_v9, %v13711_v21  ;;  %v1945_v9 = vmul.f32 %v10472_v26, %v10788_v23  ;;  %v9704_v23 = vld [vmem:[%s13263_s2 + $0x118] sm:$0xff]  }
 0x299   : > { %8346 = vmatprep.mubr.bf16.mxu0 %v1647_v43  ;;  %v1942_v43 = vmul.f32 %v10767_v18, %v13712_v31  ;;  %v1946_v18 = vmul.f32 %v10574_v0, %v10790_v24  ;;  %v1949_v24 = vmul.f32 %v10695_v48, %v10816_v4  ;;  %v9706_v4 = vld [vmem:[%s13263_s2 + $0x128] sm:$0xff]  }
 0x29b   : > { %v1972_v15 = vpack.c.bf16 %v1942_v43, %v1941_v13  ;;  %v13777_v43 = vld [vmem:[#allocation49_spill] sm:$0xff] }
 0x29c   : > { %v1955_v11 = vmul.f32 %v13777_v43, %v10866_v41 }
 0x2a0   : > { %8347 = vmatmul.mubr.bf16.gmra.mrb[28].mxu0 %v1648_v46  ;;  %v1952_v46 = vmul.f32 %v10731_v58, %v10840_v51  ;;  %v9707_v51 = vld [vmem:[%s13263_s2 + $0x130] sm:$0xff]  }
 0x2a1   : > { %8366 = vmatprep.mubr.bf16.mxu0 %v1971_v45  ;;  %v1976_v45 = vpack.c.bf16 %v1950_v5, %v1949_v24  ;;  %v13785_v5 = vld [vmem:[#allocation74_spill] sm:$0xff] }
 0x2a2   : > { %v1977_v13 = vpack.c.bf16 %v1952_v46, %v1951_v62 }
 0x2a8   : > { %8367 = vmatmul.mubr.bf16.vlgmr.msra.gmra.mrb[0].mxu0 %v1972_v15  ;;  %v13778_v15 = vld [vmem:[#allocation69_spill] sm:$0xff] }
 0x2a9   : > { %8399 = vmatpush3.bf16.msra.mxu0 %v9701_v30  ;;  %8370 = vmatprep.mubr.bf16.mxu0 %v1973_v10  ;;  %v1974_v30 = vpack.c.bf16 %v1946_v18, %v1945_v9  ;;  %v1978_v9 = vpack.c.bf16 %v1954_v63, %v1953_v55  ;;  %v13789_v63 = vld [vmem:[#allocation77_spill] sm:$0xff] }
 0x2aa   : > { %8400 = vmatprep.subr.bf16.mxu0 %v9702_v37 }
 0x2ad   : > { %8401 = vmatpush3.bf16.msra.mxu0 %v9702_v37  ;;  %v13779_v37 = vld [vmem:[#allocation54_spill] sm:$0xff] }
 0x2ae   : > { %8402 = vmatprep.subr.bf16.mxu0 %v9703_v28  ;;  %v1956_v10 = vmul.f32 %v13779_v37, %v13778_v15  ;;  %v13791_v15 = vld [vmem:[#allocation80_spill] sm:$0xff] }
 0x2b0   : > { %8371 = vmatmul.mubr.bf16.gmra.mrb[4].mxu0 %v1974_v30  ;;  %v1979_v18 = vpack.c.bf16 %v1956_v10, %v1955_v11  ;;  %v13783_v30 = vld [vmem:[#allocation56_spill] sm:$0xff]  ;;  %v13792_v10 = vld [vmem:[#allocation57_spill] sm:$0xff] }
 0x2b1   : > { %8374 = vmatprep.mubr.bf16.mxu0 %v1975_v7  ;;  %8403 = vmatpush3.bf16.msra.mxu0 %v9703_v28  ;;  %v13781_v28 = vld [vmem:[#allocation51_spill] sm:$0xff]  ;;  %v1958_v41 = vmul.f32 %v13783_v30, %v13782_v27  ;;  %v13784_v7 = vld [vmem:[#allocation53_spill] sm:$0xff] }
 0x2b2   : > { %8404 = vmatprep.subr.bf16.mxu0 %v9704_v23  ;;  %v1957_v22 = vmul.f32 %v13781_v28, %v13780_v47  ;;  %v1959_v24 = vmul.f32 %v13784_v7, %v10892_v17  ;;  %v13794_v17 = vld [vmem:[#allocation62_spill] sm:$0xff] }
 0x2b4   : > { %v1980_v46 = vpack.c.bf16 %v1958_v41, %v1957_v22  ;;  %v13796_v22 = vld [vmem:[#allocation59_spill] sm:$0xff] }
 0x2b5   : > { %8405 = vmatpush3.bf16.msra.mxu0 %v9704_v23  ;;  %v9709_v23 = vld [vmem:[%s13263_s2 + $0x140] sm:$0xff]  }
 0x2b6   : > { %8406 = vmatprep.subr.bf16.mxu0 %v9705_v3 }
 0x2b8   : > { %8375 = vmatmul.mubr.bf16.gmra.mrb[8].mxu0 %v1976_v45 }
 0x2b9   : > { %8378 = vmatprep.mubr.bf16.mxu0 %v1977_v13  ;;  %8407 = vmatpush3.bf16.msra.mxu0 %v9705_v3  ;;  %v13786_v3 = vld [vmem:[#allocation58_spill] sm:$0xff]  ;;  %v13788_v13 = vld [vmem:[#allocation55_spill] sm:$0xff] }
 0x2ba   : > { %8408 = vmatprep.subr.bf16.mxu0 %v9706_v4  ;;  %v1960_v62 = vmul.f32 %v13786_v3, %v13785_v5 }
 0x2bc   : > { %v1981_v45 = vpack.c.bf16 %v1960_v62, %v1959_v24  ;;  %v13797_v24 = vld [vmem:[#allocation84_spill] sm:$0xff] }
 0x2bd   : > { %8409 = vmatpush3.bf16.msra.mxu0 %v9706_v4  ;;  %v13787_v4 = vld [vmem:[#allocation76_spill] sm:$0xff] }
 0x2be   : > { %8410 = vmatprep.subr.bf16.mxu0 %v9707_v51  ;;  %v1961_v55 = vmul.f32 %v13788_v13, %v13787_v4  ;;  %v13798_v62 = vld [vmem:[#allocation64_spill] sm:$0xff]  ;;  %v11207_v13 = vld [vmem:[#allocation2 + $0x107] sm:$0xff] }
 0x2c0   : > { %8379 = vmatmul.mubr.bf16.gmra.mrb[12].mxu0 %v1978_v9  ;;  %v1963_v9 = vmul.f32 %v13792_v10, %v13791_v15 }
 0x2c1   : > { %8382 = vmatprep.mubr.bf16.mxu0 %v1979_v18  ;;  %8411 = vmatpush3.bf16.msra.mxu0 %v9707_v51  ;;  %v13790_v51 = vld [vmem:[#allocation60_spill] sm:$0xff]  ;;  %v13793_v18 = vld [vmem:[#allocation81_spill] sm:$0xff] }
 0x2c2   : > { %8412 = vmatprep.subr.bf16.mxu0 %v9708_v49  ;;  %v1962_v11 = vmul.f32 %v13790_v51, %v13789_v63  ;;  %v1964_v47 = vmul.f32 %v13794_v17, %v13793_v18  ;;  %v13800_v63 = vld [vmem:[#allocation66_spill] sm:$0xff] }
 0x2c3   : > { %v1968_v51 = vmul.f32 %v13800_v63, %v10938_v35  ;;  %v2247_v35 = vld [vmem:[#allocation2 + $0x28] sm:$0xff] }
 0x2c4   : > { %v1982_v27 = vpack.c.bf16 %v1962_v11, %v1961_v55  ;;  %v1983_v5 = vpack.c.bf16 %v1964_v47, %v1963_v9  ;;  %v11209_v55 = vld [vmem:[#allocation2 + $0x10f] sm:$0xff]  ;;  %v2245_v47 = vld [vmem:[#allocation2 + $0x18] sm:$0xff] }
 0x2c5   : > { %8413 = vmatpush3.bf16.msra.mxu0 %v9708_v49  ;;  %v13795_v49 = vld [vmem:[#allocation83_spill] sm:$0xff]  ;;  %v1970_v18 = vmul.f32 %v11209_v55, %v10861_v53 }
 0x2c6   : > { %8446 = vmatprep.subr.bf16.mxu0 %v9709_v23  ;;  %v1965_v41 = vmul.f32 %v13796_v22, %v13795_v49  ;;  %v13801_v11 = vld [vmem:[#allocation63_spill] sm:$0xff]  ;;  %v2249_v49 = vld [vmem:[#allocation2 + $0x38] sm:$0xff] }
 0x2c7   : > { %v1969_v9 = vmul.f32 %v11207_v13, %v13801_v11  ;;  %v13819_v11 = vld [vmem:[#allocation75_spill] sm:$0xff] }
 0x2c8   : > { %8383 = vmatmul.mubr.bf16.gmra.mrb[16].mxu0 %v1980_v46  ;;  %v1966_v46 = vmul.f32 %v13798_v62, %v13797_v24 }
 0x2c9   : > { %8386 = vmatprep.mubr.bf16.mxu0 %v1981_v45  ;;  %v13799_v45 = vld [vmem:[#allocation61_spill] sm:$0xff] }
 0x2ca   : > { %v1967_v4 = vmul.f32 %v13799_v45, %v10936_v39  ;;  %v1984_v15 = vpack.c.bf16 %v1966_v46, %v1965_v41  ;;  %v1986_v39 = vpack.c.bf16 %v1970_v18, %v1969_v9  ;;  %v2250_v41 = vld [vmem:[#allocation2 + $0x40] sm:$0xff]  ;;  %v2252_v9 = vld [vmem:[#allocation2 + $0x50] sm:$0xff]  ;;  %v2253_v18 = vld [vmem:[#allocation2 + $0x58] sm:$0xff] }
 0x2cb   : > { %v11220_v46 = vpack.c.bf16 %v2250_v41, %v2249_v49  ;;  %v2257_v49 = vld [vmem:[#allocation2 + $0x78] sm:$0xff]  ;;  %v2258_v41 = vld [vmem:[#allocation2 + $0x80] sm:$0xff] }
 0x2cc   : > { %v1985_v10 = vpack.c.bf16 %v1968_v51, %v1967_v4  ;;  %v2248_v51 = vld [vmem:[#allocation2 + $0x30] sm:$0xff] }
 0x2cd   : > { %v11215_v24 = vpack.c.bf16 %v2248_v51, %v2247_v35  ;;  %13803 = vst [vmem:[#allocation70_spill] sm:$0xff] %v11220_v46  ;;  %v9711_v4 = vld [vmem:[%s13263_s2 + $0x150] sm:$0xff]   ;;  %v2255_v35 = vld [vmem:[#allocation2 + $0x68] sm:$0xff] }
 0x2ce   : > { %v2256_v51 = vld [vmem:[#allocation2 + $0x70] sm:$0xff] }
 0x2cf   : > { %13802 = vst [vmem:[#allocation69_spill] sm:$0xff] %v11215_v24 }
 0x2d0   : > { %8387 = vmatmul.mubr.bf16.gmra.mrb[20].mxu0 %v1982_v27  ;;  %v2246_v27 = vld [vmem:[#allocation2 + $0x20] sm:$0xff] }
 0x2d1   : > { %8390 = vmatprep.mubr.bf16.mxu0 %v1983_v5  ;;  %v2277_v5 = vpack.c.bf16 %v2246_v27, %v2245_v47  ;;  %v2254_v47 = vld [vmem:[#allocation2 + $0x60] sm:$0xff] }
 0x2d8   : > { %8391 = vmatmul.mubr.bf16.gmra.mrb[24].mxu0 %v1984_v15  ;;  %v2251_v15 = vld [vmem:[#allocation2 + $0x48] sm:$0xff] }
 0x2d9   : > { %8394 = vmatprep.mubr.bf16.mxu0 %v1985_v10  ;;  %v9710_v10 = vld [vmem:[%s13263_s2 + $0x148] sm:$0xff]   ;;  %v11227_v27 = vpack.c.bf16 %v2252_v9, %v2251_v15  ;;  %v11244_v9 = vpack.c.bf16 %v2258_v41, %v2257_v49  ;;  %v9716_v49 = vld [vmem:[%s13263_s2 + $0x178] sm:$0xff]  }
 0x2da   : > { %v9714_v15 = vld [vmem:[%s13263_s2 + $0x168] sm:$0xff]  }
 0x2db   : > { %13804 = vst [vmem:[#allocation71_spill] sm:$0xff] %v11227_v27  ;;  %13807 = vst [vmem:[#allocation77_spill] sm:$0xff] %v11244_v9 }
 0x2e0   : > { %8395 = vmatmul.mubr.bf16.gmra.mrb[28].mxu0 %v1986_v39  ;;  %v9712_v39 = vld [vmem:[%s13263_s2 + $0x158] sm:$0xff]  }
 0x2e1   : > { %8414 = vmatprep.mubr.bf16.mxu0 %v2277_v5  ;;  %v9713_v5 = vld [vmem:[%s13263_s2 + $0x160] sm:$0xff]  }
 0x2e8   : > { %8415 = vmatmul.mubr.bf16.vlgmr.msra.gmra.mrb[0].mxu0 %v11215_v24 }
 0x2e9   : > { %8447 = vmatpush3.bf16.msra.mxu0 %v9709_v23  ;;  %8418 = vmatprep.mubr.bf16.mxu0 %v11220_v46  ;;  %v11232_v23 = vpack.c.bf16 %v2254_v47, %v2253_v18  ;;  %v2259_v18 = vld [vmem:[#allocation2 + $0x88] sm:$0xff]  ;;  %v2260_v47 = vld [vmem:[#allocation2 + $0x90] sm:$0xff] }
 0x2ea   : > { %8448 = vmatprep.subr.bf16.mxu0 %v9710_v10  ;;  %v2552_v46 = vld [vmem:[#allocation2 + $0x21] sm:$0xff] }
 0x2eb   : > { %13805 = vst [vmem:[#allocation74_spill] sm:$0xff] %v11232_v23 }
 0x2ed   : > { %8449 = vmatpush3.bf16.msra.mxu0 %v9710_v10  ;;  %v11239_v10 = vpack.c.bf16 %v2256_v51, %v2255_v35  ;;  %v2262_v35 = vld [vmem:[#allocation2 + $0xa0] sm:$0xff]  ;;  %v11251_v51 = vpack.c.bf16 %v2260_v47, %v2259_v18  ;;  %v2264_v18 = vld [vmem:[#allocation2 + $0xb0] sm:$0xff]  ;;  %v2265_v47 = vld [vmem:[#allocation2 + $0xb8] sm:$0xff] }
 0x2ee   : > { %8450 = vmatprep.subr.bf16.mxu0 %v9711_v4 }
 0x2ef   : > { %13806 = vst [vmem:[#allocation76_spill] sm:$0xff] %v11239_v10  ;;  %13808 = vst [vmem:[#allocation80_spill] sm:$0xff] %v11251_v51 }
 0x2f0   : > { %8419 = vmatmul.mubr.bf16.gmra.mrb[4].mxu0 %v11227_v27 }
 0x2f1   : > { %8422 = vmatprep.mubr.bf16.mxu0 %v11232_v23  ;;  %8451 = vmatpush3.bf16.msra.mxu0 %v9711_v4  ;;  %v9715_v4 = vld [vmem:[%s13263_s2 + $0x170] sm:$0xff]  }
 0x2f2   : > { %8452 = vmatprep.subr.bf16.mxu0 %v9712_v39 }
 0x2f5   : > { %8453 = vmatpush3.bf16.msra.mxu0 %v9712_v39  ;;  %v2261_v39 = vld [vmem:[#allocation2 + $0x98] sm:$0xff] }
 0x2f6   : > { %8454 = vmatprep.subr.bf16.mxu0 %v9713_v5  ;;  %v11256_v41 = vpack.c.bf16 %v2262_v35, %v2261_v39  ;;  %v2268_v35 = vld [vmem:[#allocation2 + $0xd0] sm:$0xff] }
 0x2f8   : > { %8423 = vmatmul.mubr.bf16.gmra.mrb[8].mxu0 %v11239_v10  ;;  %13809 = vst [vmem:[#allocation81_spill] sm:$0xff] %v11256_v41 }
 0x2f9   : > { %8426 = vmatprep.mubr.bf16.mxu0 %v11244_v9  ;;  %8455 = vmatpush3.bf16.msra.mxu0 %v9713_v5  ;;  %v9717_v5 = vld [vmem:[%s13263_s2 + $0x180] sm:$0xff]  }
 0x2fa   : > { %8456 = vmatprep.subr.bf16.mxu0 %v9714_v15  ;;  %v2266_v9 = vld [vmem:[#allocation2 + $0xc0] sm:$0xff] }
 0x2fb   : > { %v11265_v39 = vpack.c.bf16 %v2266_v9, %v2265_v47  ;;  %v2273_v9 = vld [vmem:[#allocation2 + $0xf8] sm:$0xff] }
 0x2fd   : > { %8457 = vmatpush3.bf16.msra.mxu0 %v9714_v15  ;;  %v2263_v15 = vld [vmem:[#allocation2 + $0xa8] sm:$0xff]  ;;  %13811 = vst [vmem:[#allocation84_spill] sm:$0xff] %v11265_v39 }
 0x2fe   : > { %8458 = vmatprep.subr.bf16.mxu0 %v9715_v4  ;;  %v11263_v10 = vpack.c.bf16 %v2264_v18, %v2263_v15  ;;  %v2272_v15 = vld [vmem:[#allocation2 + $0xf0] sm:$0xff]  ;;  %v2274_v18 = vld [vmem:[#allocation2 + $0x100] sm:$0xff] }
 0x300   : > { %8427 = vmatmul.mubr.bf16.gmra.mrb[12].mxu0 %v11251_v51  ;;  %13810 = vst [vmem:[#allocation83_spill] sm:$0xff] %v11263_v10  ;;  %v2270_v51 = vld [vmem:[#allocation2 + $0xe0] sm:$0xff] }
 0x301   : > { %8430 = vmatprep.mubr.bf16.mxu0 %v11256_v41  ;;  %8459 = vmatpush3.bf16.msra.mxu0 %v9715_v4  ;;  %v2267_v4 = vld [vmem:[#allocation2 + $0xc8] sm:$0xff]  ;;  %v2269_v41 = vld [vmem:[#allocation2 + $0xd8] sm:$0xff] }
 0x302   : > { %8460 = vmatprep.subr.bf16.mxu0 %v9716_v49  ;;  %v11269_v23 = vpack.c.bf16 %v2268_v35, %v2267_v4  ;;  %v11271_v27 = vpack.c.bf16 %v2270_v51, %v2269_v41  ;;  %v2275_v51 = vld [vmem:[#allocation2 + $0x108] sm:$0xff]  ;;  %v2276_v41 = vld [vmem:[#allocation2 + $0x110] sm:$0xff]  ;;  %v13816_v35 = vld [vmem:[#allocation73_spill] sm:$0xff] }
 0x304   : > { %13812 = vst [vmem:[#allocation122_spill] sm:$0xff] %v11269_v23  ;;  %13813 = vst [vmem:[#allocation123_spill] sm:$0xff] %v11271_v27 }
 0x305   : > { %8461 = vmatpush3.bf16.msra.mxu0 %v9716_v49  ;;  %v2271_v49 = vld [vmem:[#allocation2 + $0xe8] sm:$0xff] }
 0x306   : > { %8494 = vmatprep.subr.bf16.mxu0 %v9717_v5  ;;  %v11275_v47 = vpack.c.bf16 %v2272_v15, %v2271_v49  ;;  %v2555_v49 = vld [vmem:[#allocation2 + $0x39] sm:$0xff]  ;;  %v2556_v15 = vld [vmem:[#allocation2 + $0x41] sm:$0xff] }
 0x308   : > { %8431 = vmatmul.mubr.bf16.gmra.mrb[16].mxu0 %v11263_v10  ;;  %13814 = vst [vmem:[#allocation124_spill] sm:$0xff] %v11275_v47  ;;  %v11277_v10 = vpack.c.bf16 %v2274_v18, %v2273_v9  ;;  %v13817_v9 = vld [vmem:[#allocation67_spill] sm:$0xff] }
 0x309   : > { %8434 = vmatprep.mubr.bf16.mxu0 %v11265_v39  ;;  %v2551_v39 = vld [vmem:[#allocation2 + $0x19] sm:$0xff]  ;;  %v2585_v18 = vmul.f32 %v10950_v33, %v13817_v9 }
 0x30a   : > { %13815 = vst [vmem:[#allocation125_spill] sm:$0xff] %v11277_v10  ;;  %v2583_v4 = vmul.f32 %v2551_v39, %v10833_v32  ;;  %v2588_v39 = vmul.f32 %v2556_v15, %v13819_v11 }
 0x310   : > { %8435 = vmatmul.mubr.bf16.gmra.mrb[20].mxu0 %v11269_v23  ;;  %v11283_v23 = vpack.c.bf16 %v2276_v41, %v2275_v51  ;;  %v13821_v51 = vld [vmem:[#allocation79_spill] sm:$0xff]  ;;  %v13822_v41 = vld [vmem:[#allocation85_spill] sm:$0xff] }
 0x311   : > { %8438 = vmatprep.mubr.bf16.mxu0 %v11271_v27  ;;  %v2584_v27 = vmul.f32 %v2552_v46, %v13816_v35  ;;  %v9718_v46 = vld [vmem:[%s13263_s2 + $0x188] sm:$0xff]  }
 0x313   : > { %v2615_v24 = vpack.c.bf16 %v2584_v27, %v2583_v4  ;;  %v2592_v4 = vmul.f32 %v13822_v41, %v10994_v14  ;;  %v13832_v41 = vld [vmem:[#allocation90_spill] sm:$0xff] }
 0x318   : > { %8439 = vmatmul.mubr.bf16.gmra.mrb[24].mxu0 %v11275_v47  ;;  %v13818_v47 = vld [vmem:[#allocation78_spill] sm:$0xff] }
 0x319   : > { %8442 = vmatprep.mubr.bf16.mxu0 %v11277_v10  ;;  %v2586_v10 = vmul.f32 %v10952_v61, %v10874_v1  ;;  %v2587_v53 = vmul.f32 %v2555_v49, %v13818_v47  ;;  %v9719_v61 = vld [vmem:[%s13263_s2 + $0x190] sm:$0xff]   ;;  %v13824_v49 = vld [vmem:[#allocation82_spill] sm:$0xff] }
 0x31b   : > { %v2616_v32 = vpack.c.bf16 %v2586_v10, %v2585_v18  ;;  %v2617_v27 = vpack.c.bf16 %v2588_v39, %v2587_v53  ;;  %v13823_v10 = vld [vmem:[#allocation93_spill] sm:$0xff]  ;;  %v13825_v53 = vld [vmem:[#allocation86_spill] sm:$0xff]  ;;  %v9720_v18 = vld [vmem:[%s13263_s2 + $0x198] sm:$0xff]  }
 0x31c   : > { %v2589_v15 = vmul.f32 %v13824_v49, %v13823_v10  ;;  %v13828_v10 = vld [vmem:[#allocation102_spill] sm:$0xff] }
 0x320   : > { %8443 = vmatmul.mubr.bf16.gmra.mrb[28].mxu0 %v11283_v23 }
 0x321   : > { %8462 = vmatprep.mubr.bf16.mxu0 %v2615_v24  ;;  %v13820_v24 = vld [vmem:[#allocation94_spill] sm:$0xff] }
 0x322   : > { %v2590_v33 = vmul.f32 %v13821_v51, %v13820_v24  ;;  %v13827_v24 = vld [vmem:[#allocation87_spill] sm:$0xff] }
 0x328   : > { %8463 = vmatmul.mubr.bf16.vlgmr.msra.gmra.mrb[0].mxu0 %v2616_v32  ;;  %v2591_v32 = vmul.f32 %v13825_v53, %v10992_v19  ;;  %v13829_v19 = vld [vmem:[#allocation89_spill] sm:$0xff]  ;;  %v13831_v53 = vld [vmem:[#allocation88_spill] sm:$0xff] }
 0x329   : > { %8495 = vmatpush3.bf16.msra.mxu0 %v9717_v5  ;;  %8466 = vmatprep.mubr.bf16.mxu0 %v2617_v27  ;;  %v2618_v5 = vpack.c.bf16 %v2590_v33, %v2589_v15  ;;  %v13826_v27 = vld [vmem:[#allocation99_spill] sm:$0xff]  ;;  %v2596_v33 = vmul.f32 %v13829_v19, %v13828_v10  ;;  %v13830_v15 = vld [vmem:[#allocation98_spill] sm:$0xff]  ;;  %v13839_v19 = vld [vmem:[#allocation96_spill] sm:$0xff] }
 0x32a   : > { %8496 = vmatprep.subr.bf16.mxu0 %v9718_v46  ;;  %v2619_v39 = vpack.c.bf16 %v2592_v4, %v2591_v32  ;;  %v2594_v14 = vmul.f32 %v13827_v24, %v13826_v27  ;;  %v2593_v49 = vmul.f32 %v13831_v53, %v13830_v15  ;;  %v2595_v4 = vmul.f32 %v13832_v41, %v11020_v40  ;;  %v13834_v27 = vld [vmem:[#allocation91_spill] sm:$0xff]  ;;  %v13835_v40 = vld [vmem:[#allocation108_spill] sm:$0xff] }
 0x32b   : > { %v9723_v15 = vld [vmem:[%s13263_s2 + $0x1b0] sm:$0xff]   ;;  %v13838_v41 = vld [vmem:[#allocation92_spill] sm:$0xff] }
 0x32c   : > { %v2620_v32 = vpack.c.bf16 %v2594_v14, %v2593_v49  ;;  %v13837_v14 = vld [vmem:[#allocation104_spill] sm:$0xff] }
 0x32d   : > { %8497 = vmatpush3.bf16.msra.mxu0 %v9718_v46  ;;  %v9721_v46 = vld [vmem:[%s13263_s2 + $0x1a0] sm:$0xff]   ;;  %v2597_v53 = vmul.f32 %v13838_v41, %v13837_v14  ;;  %v13845_v41 = vld [vmem:[#allocation103_spill] sm:$0xff] }
 0x32e   : > { %8498 = vmatprep.subr.bf16.mxu0 %v9719_v61  ;;  %v9725_v14 = vld [vmem:[%s13263_s2 + $0x1c0] sm:$0xff]  }
 0x330   : > { %8467 = vmatmul.mubr.bf16.gmra.mrb[4].mxu0 %v2618_v5  ;;  %v2621_v5 = vpack.c.bf16 %v2596_v33, %v2595_v4  ;;  %v2599_v33 = vmul.f32 %v13839_v19, %v11048_v34  ;;  %v13842_v34 = vld [vmem:[#allocation101_spill] sm:$0xff] }
 0x331   : > { %8470 = vmatprep.mubr.bf16.mxu0 %v2619_v39  ;;  %8499 = vmatpush3.bf16.msra.mxu0 %v9719_v61  ;;  %v9722_v61 = vld [vmem:[%s13263_s2 + $0x1a8] sm:$0xff]   ;;  %v13833_v39 = vld [vmem:[#allocation105_spill] sm:$0xff] }
 0x332   : > { %8500 = vmatprep.subr.bf16.mxu0 %v9720_v18  ;;  %v2598_v10 = vmul.f32 %v13834_v27, %v13833_v39  ;;  %v13841_v39 = vld [vmem:[#allocation97_spill] sm:$0xff]  ;;  %v13849_v27 = vld [vmem:[#allocation116_spill] sm:$0xff] }
 0x334   : > { %v2622_v4 = vpack.c.bf16 %v2598_v10, %v2597_v53  ;;  %v2604_v53 = vmul.f32 %v13842_v34, %v11073_v2  ;;  %v13844_v10 = vld [vmem:[#allocation100_spill] sm:$0xff]  ;;  %v13850_v2 = vld [vmem:[#allocation107_spill] sm:$0xff] }
 0x335   : > { %8501 = vmatpush3.bf16.msra.mxu0 %v9720_v18  ;;  %v13836_v18 = vld [vmem:[#allocation95_spill] sm:$0xff]  ;;  %v2605_v34 = vmul.f32 %v13850_v2, %v13849_v27 }
 0x336   : > { %8502 = vmatprep.subr.bf16.mxu0 %v9721_v46  ;;  %v2600_v49 = vmul.f32 %v13836_v18, %v13835_v40 }
 0x338   : > { %8471 = vmatmul.mubr.bf16.gmra.mrb[8].mxu0 %v2620_v32  ;;  %v2623_v32 = vpack.c.bf16 %v2600_v49, %v2599_v33  ;;  %v2603_v49 = vmul.f32 %v13845_v41, %v11071_v38 }
 0x339   : > { %8474 = vmatprep.mubr.bf16.mxu0 %v2621_v5  ;;  %8503 = vmatpush3.bf16.msra.mxu0 %v9721_v46  ;;  %v9724_v46 = vld [vmem:[%s13263_s2 + $0x1b8] sm:$0xff]   ;;  %v13840_v5 = vld [vmem:[#allocation110_spill] sm:$0xff] }
 0x33a   : > { %8504 = vmatprep.subr.bf16.mxu0 %v9722_v61  ;;  %v2602_v40 = vmul.f32 %v13841_v39, %v13840_v5  ;;  %v13848_v39 = vld [vmem:[#allocation111_spill] sm:$0xff] }
 0x33b   : > { %v2608_v18 = vmul.f32 %v13848_v39, %v11093_v36  ;;  %v2611_v36 = vmul.f32 %v11095_v20, %v11119_v12 }
 0x33d   : > { %8505 = vmatpush3.bf16.msra.mxu0 %v9722_v61  ;;  %v13843_v61 = vld [vmem:[#allocation109_spill] sm:$0xff] }
 0x33e   : > { %8506 = vmatprep.subr.bf16.mxu0 %v9723_v15  ;;  %v2601_v19 = vmul.f32 %v13844_v10, %v13843_v61  ;;  %v13851_v61 = vld [vmem:[#allocation112_spill] sm:$0xff] }
 0x33f   : > { %v2607_v10 = vmul.f32 %v13851_v61, %v11101_v8  ;;  %v2889_v8 = vld [vmem:[#allocation2 + $0x27] sm:$0xff] }
 0x340   : > { %8475 = vmatmul.mubr.bf16.gmra.mrb[12].mxu0 %v2622_v4  ;;  %v2624_v33 = vpack.c.bf16 %v2602_v40, %v2601_v19  ;;  %v13846_v4 = vld [vmem:[#allocation114_spill] sm:$0xff]  ;;  %v13852_v19 = vld [vmem:[#allocation119_spill] sm:$0xff] }
 0x341   : > { %8478 = vmatprep.mubr.bf16.mxu0 %v2623_v32  ;;  %8507 = vmatpush3.bf16.msra.mxu0 %v9723_v15  ;;  %v2625_v15 = vpack.c.bf16 %v2604_v53, %v2603_v49  ;;  %v13847_v32 = vld [vmem:[#allocation106_spill] sm:$0xff]  ;;  %v2627_v38 = vpack.c.bf16 %v2608_v18, %v2607_v10  ;;  %v13854_v53 = vld [vmem:[#allocation117_spill] sm:$0xff]  ;;  %v13856_v18 = vld [vmem:[#allocation120_spill] sm:$0xff] }
 0x342   : > { %8508 = vmatprep.subr.bf16.mxu0 %v9724_v46  ;;  %v2606_v5 = vmul.f32 %v13847_v32, %v13846_v4  ;;  %v2612_v49 = vmul.f32 %v13854_v53, %v11115_v44  ;;  %v2921_v44 = vmul.f32 %v2889_v8, %v10310_v52 }
 0x344   : > { %v2626_v24 = vpack.c.bf16 %v2606_v5, %v2605_v34  ;;  %v2629_v4 = vpack.c.bf16 %v2612_v49, %v2611_v36  ;;  %v2890_v34 = vld [vmem:[#allocation2 + $0x2f] sm:$0xff] }
 0x345   : > { %8509 = vmatpush3.bf16.msra.mxu0 %v9724_v46  ;;  %v13853_v46 = vld [vmem:[#allocation113_spill] sm:$0xff]  ;;  %v11368_v5 = vld [vmem:[#allocation2 + $0x109] sm:$0xff] }
 0x346   : > { %8542 = vmatprep.subr.bf16.mxu0 %v9725_v14  ;;  %v2610_v40 = vmul.f32 %v13853_v46, %v13852_v19  ;;  %v2613_v12 = vmul.f32 %v11368_v5, %v11113_v16  ;;  %v2894_v49 = vld [vmem:[#allocation2 + $0x4f] sm:$0xff] }
 0x347   : > { %v2926_v8 = vmul.f32 %v2894_v49, %v10446_v6  ;;  %v9727_v49 = vld [vmem:[%s13263_s2 + $0x1d0] sm:$0xff]  }
 0x348   : > { %8479 = vmatmul.mubr.bf16.gmra.mrb[16].mxu0 %v2624_v33  ;;  %v13855_v33 = vld [vmem:[#allocation115_spill] sm:$0xff] }
 0x349   : > { %8482 = vmatprep.mubr.bf16.mxu0 %v2625_v15  ;;  %v2609_v15 = vmul.f32 %v13855_v33, %v11107_v59  ;;  %v2922_v59 = vmul.f32 %v2890_v34, %v10709_v50 }
 0x34b   : > { %v2628_v27 = vpack.c.bf16 %v2610_v40, %v2609_v15  ;;  %v2953_v19 = vpack.c.bf16 %v2922_v59, %v2921_v44  ;;  %v2893_v40 = vld [vmem:[#allocation2 + $0x47] sm:$0xff]  ;;  %v9817_v15 = vld [vmem:[#allocation2 + $0x37] sm:$0xff] }
 0x34c   : > { %v2923_v36 = vmul.f32 %v9817_v15, %v13711_v21  ;;  %v2895_v59 = vld [vmem:[#allocation2 + $0x57] sm:$0xff] }
 0x34d   : > { %v2927_v15 = vmul.f32 %v2895_v59, %v10472_v26  ;;  %v2902_v59 = vld [vmem:[#allocation2 + $0x8f] sm:$0xff] }
 0x350   : > { %8483 = vmatmul.mubr.bf16.gmra.mrb[20].mxu0 %v2626_v24  ;;  %v11364_v24 = vld [vmem:[#allocation2 + $0x111] sm:$0xff] }
 0x351   : > { %8486 = vmatprep.mubr.bf16.mxu0 %v2627_v38  ;;  %v2614_v10 = vmul.f32 %v11364_v24, %v13856_v18  ;;  %v2925_v18 = vmul.f32 %v2893_v40, %v13713_v25 }
 0x353   : > { %v2630_v38 = vpack.c.bf16 %v2614_v10, %v2613_v12  ;;  %v9726_v10 = vld [vmem:[%s13263_s2 + $0x1c8] sm:$0xff]   ;;  %v2955_v44 = vpack.c.bf16 %v2926_v8, %v2925_v18  ;;  %v2896_v12 = vld [vmem:[#allocation2 + $0x5f] sm:$0xff]  ;;  %v2899_v8 = vld [vmem:[#allocation2 + $0x77] sm:$0xff] }
 0x354   : > { %v2928_v40 = vmul.f32 %v2896_v12, %v10574_v0  ;;  %v2931_v12 = vmul.f32 %v2899_v8, %v10695_v48  ;;  %v2906_v8 = vld [vmem:[#allocation2 + $0xaf] sm:$0xff] }
 0x358   : > { %8487 = vmatmul.mubr.bf16.gmra.mrb[24].mxu0 %v2628_v27  ;;  %v9818_v27 = vld [vmem:[#allocation2 + $0x3f] sm:$0xff] }
 0x359   : > { %8490 = vmatprep.mubr.bf16.mxu0 %v2629_v4  ;;  %v2924_v4 = vmul.f32 %v9818_v27, %v13712_v31  ;;  %v2956_v27 = vpack.c.bf16 %v2928_v40, %v2927_v15  ;;  %v2934_v15 = vmul.f32 %v2902_v59, %v10731_v58 }
 0x35b   : > { %v2954_v34 = vpack.c.bf16 %v2924_v4, %v2923_v36 }
 0x360   : > { %8491 = vmatmul.mubr.bf16.gmra.mrb[28].mxu0 %v2630_v38  ;;  %v2897_v38 = vld [vmem:[#allocation2 + $0x67] sm:$0xff] }
 0x361   : > { %8510 = vmatprep.mubr.bf16.mxu0 %v2953_v19  ;;  %v2898_v19 = vld [vmem:[#allocation2 + $0x6f] sm:$0xff]  ;;  %v2929_v36 = vmul.f32 %v2897_v38, %v10677_v42 }
 0x362   : > { %v2930_v18 = vmul.f32 %v2898_v19, %v10683_v56 }
 0x364   : > { %v2957_v4 = vpack.c.bf16 %v2930_v18, %v2929_v36  ;;  %v2903_v18 = vld [vmem:[#allocation2 + $0x97] sm:$0xff] }
 0x368   : > { %8511 = vmatmul.mubr.bf16.vlgmr.msra.gmra.mrb[0].mxu0 %v2954_v34  ;;  %v2900_v34 = vld [vmem:[#allocation2 + $0x7f] sm:$0xff] }
 0x369   : > { %8543 = vmatpush3.bf16.msra.mxu0 %v9725_v14  ;;  %8514 = vmatprep.mubr.bf16.mxu0 %v2955_v44  ;;  %v9728_v14 = vld [vmem:[%s13263_s2 + $0x1d8] sm:$0xff]   ;;  %v2901_v44 = vld [vmem:[#allocation2 + $0x87] sm:$0xff]  ;;  %v2932_v38 = vmul.f32 %v2900_v34, %v10720_v54  ;;  %v2935_v34 = vmul.f32 %v2903_v18, %v10718_v57  ;;  %v2910_v18 = vld [vmem:[#allocation2 + $0xcf] sm:$0xff] }
 0x36a   : > { %8544 = vmatprep.subr.bf16.mxu0 %v9726_v10  ;;  %v2933_v19 = vmul.f32 %v2901_v44, %v10704_v29 }
 0x36b   : > { %v2958_v40 = vpack.c.bf16 %v2932_v38, %v2931_v12  ;;  %v2938_v12 = vmul.f32 %v2906_v8, %v13779_v37  ;;  %v13859_v37 = vld [vmem:[#allocation57_spill] sm:$0xff] }
 0x36c   : > { %v2959_v36 = vpack.c.bf16 %v2934_v15, %v2933_v19  ;;  %v2907_v15 = vld [vmem:[#allocation2 + $0xb7] sm:$0xff] }
 0x36d   : > { %8545 = vmatpush3.bf16.msra.mxu0 %v9726_v10  ;;  %v9729_v10 = vld [vmem:[%s13263_s2 + $0x1e0] sm:$0xff]  }
 0x36e   : > { %8546 = vmatprep.subr.bf16.mxu0 %v9727_v49 }
 0x370   : > { %8515 = vmatmul.mubr.bf16.gmra.mrb[4].mxu0 %v2956_v27  ;;  %v2904_v27 = vld [vmem:[#allocation2 + $0x9f] sm:$0xff] }
 0x371   : > { %8518 = vmatprep.mubr.bf16.mxu0 %v2957_v4  ;;  %8547 = vmatpush3.bf16.msra.mxu0 %v9727_v49  ;;  %v9730_v49 = vld [vmem:[%s13263_s2 + $0x1e8] sm:$0xff]   ;;  %v2936_v44 = vmul.f32 %v2904_v27, %v10735_v60  ;;  %v2939_v27 = vmul.f32 %v2907_v15, %v13781_v28  ;;  %v13857_v15 = vld [vmem:[#allocation55_spill] sm:$0xff] }
 0x372   : > { %8548 = vmatprep.subr.bf16.mxu0 %v9728_v14  ;;  %v2905_v4 = vld [vmem:[#allocation2 + $0xa7] sm:$0xff] }
 0x373   : > { %v2937_v59 = vmul.f32 %v2905_v4, %v13777_v43  ;;  %v2960_v38 = vpack.c.bf16 %v2936_v44, %v2935_v34  ;;  %v2942_v34 = vmul.f32 %v2910_v18, %v13786_v3 }
 0x375   : > { %8549 = vmatpush3.bf16.msra.mxu0 %v9728_v14  ;;  %v9731_v14 = vld [vmem:[%s13263_s2 + $0x1f0] sm:$0xff]   ;;  %v2961_v19 = vpack.c.bf16 %v2938_v12, %v2937_v59 }
 0x376   : > { %8550 = vmatprep.subr.bf16.mxu0 %v9729_v10  ;;  %v2911_v12 = vld [vmem:[#allocation2 + $0xd7] sm:$0xff] }
 0x378   : > { %8519 = vmatmul.mubr.bf16.gmra.mrb[8].mxu0 %v2958_v40  ;;  %v2908_v40 = vld [vmem:[#allocation2 + $0xbf] sm:$0xff] }
 0x379   : > { %8522 = vmatprep.mubr.bf16.mxu0 %v2959_v36  ;;  %8551 = vmatpush3.bf16.msra.mxu0 %v9729_v10  ;;  %v9732_v10 = vld [vmem:[%s13263_s2 + $0x1f8] sm:$0xff]   ;;  %v2909_v36 = vld [vmem:[#allocation2 + $0xc7] sm:$0xff]  ;;  %v2940_v4 = vmul.f32 %v2908_v40, %v13783_v30  ;;  %v2943_v40 = vmul.f32 %v2911_v12, %v13857_v15 }
 0x37a   : > { %8552 = vmatprep.subr.bf16.mxu0 %v9730_v49  ;;  %v2941_v8 = vmul.f32 %v2909_v36, %v13784_v7  ;;  %v13858_v30 = vld [vmem:[#allocation60_spill] sm:$0xff] }
 0x37b   : > { %v2962_v44 = vpack.c.bf16 %v2940_v4, %v2939_v27  ;;  %v2916_v27 = vld [vmem:[#allocation2 + $0xff] sm:$0xff] }
 0x37c   : > { %v2963_v59 = vpack.c.bf16 %v2942_v34, %v2941_v8  ;;  %v2948_v8 = vmul.f32 %v2916_v27, %v13798_v62  ;;  %v2949_v34 = vmul.f32 %v11207_v13, %v13799_v45  ;;  %v9734_v13 = vld [vmem:[%s13263_s2 + $0x208] sm:$0xff]   ;;  %v9736_v27 = vld [vmem:[%s13263_s2 + $0x218] sm:$0xff]  }
 0x37d   : > { %8553 = vmatpush3.bf16.msra.mxu0 %v9730_v49  ;;  %v9733_v49 = vld [vmem:[%s13263_s2 + $0x200] sm:$0xff]  }
 0x37e   : > { %8554 = vmatprep.subr.bf16.mxu0 %v9731_v14 }
 0x380   : > { %8523 = vmatmul.mubr.bf16.gmra.mrb[12].mxu0 %v2960_v38  ;;  %v2912_v38 = vld [vmem:[#allocation2 + $0xdf] sm:$0xff] }
 0x381   : > { %8526 = vmatprep.mubr.bf16.mxu0 %v2961_v19  ;;  %8555 = vmatpush3.bf16.msra.mxu0 %v9731_v14  ;;  %v2913_v14 = vld [vmem:[#allocation2 + $0xe7] sm:$0xff]  ;;  %v2914_v19 = vld [vmem:[#allocation2 + $0xef] sm:$0xff]  ;;  %v2944_v28 = vmul.f32 %v2912_v38, %v13858_v30  ;;  %v2919_v38 = vld [vmem:[#allocation2 + $0x117] sm:$0xff] }
 0x382   : > { %8556 = vmatprep.subr.bf16.mxu0 %v9732_v10  ;;  %v2945_v43 = vmul.f32 %v2913_v14, %v13859_v37  ;;  %v2946_v36 = vmul.f32 %v2914_v19, %v13794_v17  ;;  %v2920_v14 = vld [vmem:[#allocation2 + $0x11f] sm:$0xff] }
 0x383   : > { %v2964_v7 = vpack.c.bf16 %v2944_v28, %v2943_v40 }
 0x384   : > { %v2965_v18 = vpack.c.bf16 %v2946_v36, %v2945_v43  ;;  %v13860_v43 = vld [vmem:[#allocation63_spill] sm:$0xff]  ;;  %v13862_v36 = vld [vmem:[#allocation69_spill] sm:$0xff] }
 0x385   : > { %8557 = vmatpush3.bf16.msra.mxu0 %v9732_v10  ;;  %v2915_v10 = vld [vmem:[#allocation2 + $0xf7] sm:$0xff]  ;;  %v2951_v28 = vmul.f32 %v2919_v38, %v13860_v43  ;;  %v13879_v43 = vld [vmem:[#allocation86_spill] sm:$0xff] }
 0x386   : > { %8590 = vmatprep.subr.bf16.mxu0 %v9733_v49  ;;  %v2947_v4 = vmul.f32 %v2915_v10, %v13796_v22  ;;  %v9735_v10 = vld [vmem:[%s13263_s2 + $0x210] sm:$0xff]   ;;  %v9740_v38 = vld [vmem:[%s13263_s2 + $0x238] sm:$0xff]  }
 0x388   : > { %8527 = vmatmul.mubr.bf16.gmra.mrb[16].mxu0 %v2962_v44  ;;  %v2950_v44 = vmul.f32 %v11209_v55, %v13800_v63  ;;  %v13864_v55 = vld [vmem:[#allocation71_spill] sm:$0xff] }
 0x389   : > { %8530 = vmatprep.mubr.bf16.mxu0 %v2963_v59  ;;  %v2966_v59 = vpack.c.bf16 %v2948_v8, %v2947_v4  ;;  %v13865_v4 = vld [vmem:[#allocation74_spill] sm:$0xff]  ;;  %v13866_v8 = vld [vmem:[#allocation76_spill] sm:$0xff] }
 0x38a   : > { %v2967_v12 = vpack.c.bf16 %v2950_v44, %v2949_v34  ;;  %v9738_v34 = vld [vmem:[%s13263_s2 + $0x228] sm:$0xff]   ;;  %v13867_v44 = vld [vmem:[#allocation77_spill] sm:$0xff] }
 0x390   : > { %8531 = vmatmul.mubr.bf16.gmra.mrb[20].mxu0 %v2964_v7  ;;  %v13861_v7 = vld [vmem:[#allocation68_spill] sm:$0xff] }
 0x391   : > { %8534 = vmatprep.mubr.bf16.mxu0 %v2965_v18  ;;  %v2952_v19 = vmul.f32 %v2920_v14, %v13861_v7  ;;  %v13863_v18 = vld [vmem:[#allocation70_spill] sm:$0xff]  ;;  %v13869_v14 = vld [vmem:[#allocation81_spill] sm:$0xff] }
 0x393   : > { %v2968_v40 = vpack.c.bf16 %v2952_v19, %v2951_v28  ;;  %v13870_v28 = vld [vmem:[#allocation83_spill] sm:$0xff]  ;;  %v13871_v19 = vld [vmem:[#allocation84_spill] sm:$0xff] }
 0x398   : > { %8535 = vmatmul.mubr.bf16.gmra.mrb[24].mxu0 %v2966_v59  ;;  %v13868_v59 = vld [vmem:[#allocation80_spill] sm:$0xff] }
 0x399   : > { %8538 = vmatprep.mubr.bf16.mxu0 %v2967_v12  ;;  %v9739_v12 = vld [vmem:[%s13263_s2 + $0x230] sm:$0xff]  }
 0x3a0   : > { %8539 = vmatmul.mubr.bf16.gmra.mrb[28].mxu0 %v2968_v40  ;;  %v13872_v40 = vld [vmem:[#allocation122_spill] sm:$0xff] }
 0x3a1   : > { %8558 = vmatprep.mubr.bf16.mxu0 %v13862_v36  ;;  %v13873_v36 = vld [vmem:[#allocation123_spill] sm:$0xff] }
 0x3a8   : > { %8559 = vmatmul.mubr.bf16.vlgmr.msra.gmra.mrb[0].mxu0 %v13863_v18  ;;  %v13875_v18 = vld [vmem:[#allocation125_spill] sm:$0xff] }
 0x3a9   : > { %8591 = vmatpush3.bf16.msra.mxu0 %v9733_v49  ;;  %8562 = vmatprep.mubr.bf16.mxu0 %v13864_v55  ;;  %v9737_v49 = vld [vmem:[%s13263_s2 + $0x220] sm:$0xff]   ;;  %v3533_v55 = vld [vmem:[#allocation2 + $0x29] sm:$0xff] }
 0x3aa   : > { %8592 = vmatprep.subr.bf16.mxu0 %v9734_v13 }
 0x3ad   : > { %8593 = vmatpush3.bf16.msra.mxu0 %v9734_v13  ;;  %v13874_v13 = vld [vmem:[#allocation124_spill] sm:$0xff] }
 0x3ae   : > { %8594 = vmatprep.subr.bf16.mxu0 %v9735_v10 }
 0x3b0   : > { %8563 = vmatmul.mubr.bf16.gmra.mrb[4].mxu0 %v13865_v4 }
 0x3b1   : > { %8566 = vmatprep.mubr.bf16.mxu0 %v13866_v8  ;;  %8595 = vmatpush3.bf16.msra.mxu0 %v9735_v10  ;;  %v3534_v10 = vld [vmem:[#allocation2 + $0x31] sm:$0xff] }
 0x3b2   : > { %8596 = vmatprep.subr.bf16.mxu0 %v9736_v27  ;;  %v3566_v8 = vmul.f32 %v3534_v10, %v13816_v35 }
 0x3b5   : > { %8597 = vmatpush3.bf16.msra.mxu0 %v9736_v27  ;;  %v13876_v27 = vld [vmem:[#allocation65_spill] sm:$0xff] }
 0x3b6   : > { %8598 = vmatprep.subr.bf16.mxu0 %v9737_v49  ;;  %v3565_v4 = vmul.f32 %v3533_v55, %v13876_v27  ;;  %v3540_v55 = vld [vmem:[#allocation2 + $0x61] sm:$0xff] }
 0x3b7   : > { %v3572_v10 = vmul.f32 %v3540_v55, %v13821_v51  ;;  %v13882_v51 = vld [vmem:[#allocation88_spill] sm:$0xff] }
 0x3b8   : > { %8567 = vmatmul.mubr.bf16.gmra.mrb[8].mxu0 %v13867_v44  ;;  %v3597_v44 = vpack.c.bf16 %v3566_v8, %v3565_v4  ;;  %v3541_v4 = vld [vmem:[#allocation2 + $0x69] sm:$0xff]  ;;  %v3542_v8 = vld [vmem:[#allocation2 + $0x71] sm:$0xff] }
 0x3b9   : > { %8570 = vmatprep.mubr.bf16.mxu0 %v13868_v59  ;;  %8599 = vmatpush3.bf16.msra.mxu0 %v9737_v49  ;;  %v9819_v49 = vld [vmem:[#allocation2 + $0x10] sm:$0xff] }
 0x3ba   : > { %8600 = vmatprep.subr.bf16.mxu0 %v9738_v34  ;;  %v3537_v59 = vld [vmem:[#allocation2 + $0x49] sm:$0xff] }
 0x3bd   : > { %8601 = vmatpush3.bf16.msra.mxu0 %v9738_v34  ;;  %v11468_v34 = vpack.c.bf16 %v9819_v49, %v9819_v49  ;;  %v13877_v49 = vld [vmem:[#allocation85_spill] sm:$0xff] }
 0x3be   : > { %8602 = vmatprep.subr.bf16.mxu0 %v9739_v12 }
 0x3bf   : > { %8654 = vmatprep.mubr.bf16.mxu1 %v11468_v34 }
 0x3c0   : > { %8571 = vmatmul.mubr.bf16.gmra.mrb[12].mxu0 %v13869_v14 }
 0x3c1   : > { %8574 = vmatprep.mubr.bf16.mxu0 %v13870_v28  ;;  %8603 = vmatpush3.bf16.msra.mxu0 %v9739_v12  ;;  %v3538_v12 = vld [vmem:[#allocation2 + $0x51] sm:$0xff]  ;;  %v9821_v28 = vld [vmem:[#allocation2 + $0x41] sm:$0xff] }
 0x3c2   : > { %8604 = vmatprep.subr.bf16.mxu0 %v9740_v38 }
 0x3c5   : > { %8605 = vmatpush3.bf16.msra.mxu0 %v9740_v38  ;;  %v9820_v38 = vld [vmem:[#allocation2 + $0x39] sm:$0xff] }
 0x3c6   : > { %v3567_v14 = vmul.f32 %v9820_v38, %v13817_v9  ;;  %v13878_v38 = vld [vmem:[#allocation82_spill] sm:$0xff] }
 0x3c8   : > { %8575 = vmatmul.mubr.bf16.gmra.mrb[16].mxu0 %v13871_v19  ;;  %v3568_v19 = vmul.f32 %v9821_v28, %v10874_v1  ;;  %v3573_v28 = vmul.f32 %v3541_v4, %v13879_v43 }
 0x3c9   : > { %8578 = vmatprep.mubr.bf16.mxu0 %v13872_v40  ;;  %v3570_v40 = vmul.f32 %v3538_v12, %v13819_v11  ;;  %v3543_v12 = vld [vmem:[#allocation2 + $0x79] sm:$0xff] }
 0x3ca   : > { %v3575_v11 = vmul.f32 %v3543_v12, %v13882_v51 }
 0x3d0   : > { %8579 = vmatmul.mubr.bf16.gmra.mrb[20].mxu0 %v13873_v36  ;;  %v3598_v36 = vpack.c.bf16 %v3568_v19, %v3567_v14  ;;  %v3544_v14 = vld [vmem:[#allocation2 + $0x81] sm:$0xff]  ;;  %v13880_v19 = vld [vmem:[#allocation87_spill] sm:$0xff] }
 0x3d1   : > { %8582 = vmatprep.mubr.bf16.mxu0 %v13874_v13 }
 0x3d8   : > { %8583 = vmatmul.mubr.bf16.gmra.mrb[24].mxu0 %v13875_v18  ;;  %v3539_v18 = vld [vmem:[#allocation2 + $0x59] sm:$0xff] }
 0x3d9   : > { %8586 = vmatprep.mubr.bf16.mxu0 %v11283_v23  ;;  %v3569_v23 = vmul.f32 %v3537_v59, %v13818_v47  ;;  %v3571_v7 = vmul.f32 %v3539_v18, %v13878_v38  ;;  %v13883_v47 = vld [vmem:[#allocation90_spill] sm:$0xff]  ;;  %v13887_v38 = vld [vmem:[#allocation96_spill] sm:$0xff] }
 0x3db   : > { %v3599_v13 = vpack.c.bf16 %v3570_v40, %v3569_v23  ;;  %v3600_v1 = vpack.c.bf16 %v3572_v10, %v3571_v7  ;;  %v3576_v23 = vmul.f32 %v3544_v14, %v13880_v19  ;;  %v3545_v40 = vld [vmem:[#allocation2 + $0x89] sm:$0xff]  ;;  %v3547_v7 = vld [vmem:[#allocation2 + $0x99] sm:$0xff]  ;;  %v3548_v10 = vld [vmem:[#allocation2 + $0xa1] sm:$0xff] }
 0x3dc   : > { %v13886_v19 = vld [vmem:[#allocation92_spill] sm:$0xff] }
 0x3dd   : > { %v3579_v43 = vmul.f32 %v3547_v7, %v13886_v19 }
 0x3e0   : > { %8587 = vmatmul.mubr.bf16.gmra.mrb[28].mxu0 %v11468_v34  ;;  %v9746_v34 = vld [vmem:[%s13265_s4 + $0x68] sm:$0xff]  }
 0x3e1   : > { %8606 = vmatprep.mubr.bf16.mxu0 %v3597_v44  ;;  %v3574_v44 = vmul.f32 %v3542_v8, %v13877_v49  ;;  %v3577_v8 = vmul.f32 %v3545_v40, %v13883_v47  ;;  %v3602_v49 = vpack.c.bf16 %v3576_v23, %v3575_v11  ;;  %v3551_v11 = vld [vmem:[#allocation2 + $0xb9] sm:$0xff]  ;;  %v3552_v23 = vld [vmem:[#allocation2 + $0xc1] sm:$0xff] }
 0x3e3   : > { %v3601_v59 = vpack.c.bf16 %v3574_v44, %v3573_v28  ;;  %v3549_v44 = vld [vmem:[#allocation2 + $0xa9] sm:$0xff]  ;;  %v3550_v28 = vld [vmem:[#allocation2 + $0xb1] sm:$0xff] }
 0x3e8   : > { %8607 = vmatmul.mubr.bf16.vlgmr.msra.gmra.mrb[0].mxu0 %v3598_v36  ;;  %v3546_v36 = vld [vmem:[#allocation2 + $0x91] sm:$0xff] }
 0x3e9   : > { %8610 = vmatprep.mubr.bf16.mxu0 %v3599_v13  ;;  %v13881_v13 = vld [vmem:[#allocation89_spill] sm:$0xff] }
 0x3ea   : > { %v3578_v55 = vmul.f32 %v3546_v36, %v13881_v13  ;;  %v3581_v36 = vmul.f32 %v3549_v44, %v13887_v38  ;;  %v3558_v44 = vld [vmem:[#allocation2 + $0xf1] sm:$0xff] }
 0x3ec   : > { %v3603_v18 = vpack.c.bf16 %v3578_v55, %v3577_v8  ;;  %v3553_v55 = vld [vmem:[#allocation2 + $0xc9] sm:$0xff]  ;;  %v3554_v8 = vld [vmem:[#allocation2 + $0xd1] sm:$0xff] }
 0x3f0   : > { %8611 = vmatmul.mubr.bf16.gmra.mrb[4].mxu0 %v3600_v1  ;;  %v13884_v1 = vld [vmem:[#allocation91_spill] sm:$0xff] }
 0x3f1   : > { %8614 = vmatprep.mubr.bf16.mxu0 %v3601_v59  ;;  %v3580_v4 = vmul.f32 %v3548_v10, %v13884_v1  ;;  %v13885_v59 = vld [vmem:[#allocation95_spill] sm:$0xff]  ;;  %v13890_v1 = vld [vmem:[#allocation100_spill] sm:$0xff] }
 0x3f2   : > { %v3582_v14 = vmul.f32 %v3550_v28, %v13885_v59  ;;  %v3583_v47 = vmul.f32 %v3551_v11, %v13890_v1  ;;  %v3585_v28 = vmul.f32 %v3553_v55, %v13845_v41  ;;  %v3594_v55 = vmul.f32 %v11364_v24, %v13854_v53 }
 0x3f3   : > { %v3604_v13 = vpack.c.bf16 %v3580_v4, %v3579_v43  ;;  %v3555_v43 = vld [vmem:[#allocation2 + $0xd9] sm:$0xff]  ;;  %v3556_v4 = vld [vmem:[#allocation2 + $0xe1] sm:$0xff] }
 0x3f4   : > { %v3605_v12 = vpack.c.bf16 %v3582_v14, %v3581_v36  ;;  %v3590_v14 = vmul.f32 %v3558_v44, %v13848_v39  ;;  %v3587_v36 = vmul.f32 %v3555_v43, %v13850_v2  ;;  %v3564_v44 = vld [vmem:[#allocation2 + $0x121] sm:$0xff] }
 0x3f8   : > { %8615 = vmatmul.mubr.bf16.gmra.mrb[8].mxu0 %v3602_v49  ;;  %v13888_v49 = vld [vmem:[#allocation97_spill] sm:$0xff] }
 0x3f9   : > { %8618 = vmatprep.mubr.bf16.mxu0 %v3603_v18  ;;  %v3584_v40 = vmul.f32 %v3552_v23, %v13888_v49  ;;  %v13889_v18 = vld [vmem:[#allocation101_spill] sm:$0xff] }
 0x3fa   : > { %v3586_v10 = vmul.f32 %v3554_v8, %v13889_v18 }
 0x3fb   : > { %v3606_v59 = vpack.c.bf16 %v3584_v40, %v3583_v47  ;;  %v3560_v47 = vld [vmem:[#allocation2 + $0x101] sm:$0xff]  ;;  %v3559_v40 = vld [vmem:[#allocation2 + $0xf9] sm:$0xff] }
 0x3fc   : > { %v3607_v7 = vpack.c.bf16 %v3586_v10, %v3585_v28  ;;  %v3591_v10 = vmul.f32 %v3559_v40, %v13855_v33  ;;  %v3593_v28 = vmul.f32 %v11368_v5, %v11095_v20 }
 0x3fe   : > { %v3611_v43 = vpack.c.bf16 %v3594_v55, %v3593_v28 }
 0x400   : > { %8619 = vmatmul.mubr.bf16.gmra.mrb[12].mxu0 %v3604_v13  ;;  %v3588_v13 = vmul.f32 %v3556_v4, %v13847_v32  ;;  %v3563_v4 = vld [vmem:[#allocation2 + $0x119] sm:$0xff] }
 0x401   : > { %8622 = vmatprep.mubr.bf16.mxu0 %v3605_v12  ;;  %v3557_v12 = vld [vmem:[#allocation2 + $0xe9] sm:$0xff] }
 0x402   : > { %v3589_v23 = vmul.f32 %v3557_v12, %v13851_v61  ;;  %v3608_v8 = vpack.c.bf16 %v3588_v13, %v3587_v36  ;;  %v3595_v13 = vmul.f32 %v3563_v4, %v11113_v16 }
 0x404   : > { %v3609_v11 = vpack.c.bf16 %v3590_v14, %v3589_v23  ;;  %v13891_v14 = vld [vmem:[#allocation120_spill] sm:$0xff] }
 0x405   : > { %v3596_v36 = vmul.f32 %v3564_v44, %v13891_v14  ;;  %v11506_v44 = vld [vmem:[%s13264_s3] ss:$0 sm:$0xff] }
 0x407   : > { %v3612_v12 = vpack.c.bf16 %v3596_v36, %v3595_v13 }
 0x408   : > { %8623 = vmatmul.mubr.bf16.gmra.mrb[16].mxu0 %v3606_v59  ;;  %v3592_v59 = vmul.f32 %v3560_v47, %v13853_v46 }
 0x409   : > { %8626 = vmatprep.mubr.bf16.mxu0 %v3607_v7 }
 0x40a   : > { %v3610_v7 = vpack.c.bf16 %v3592_v59, %v3591_v10 }
 0x410   : > { %8627 = vmatmul.mubr.bf16.gmra.mrb[20].mxu0 %v3608_v8 }
 0x411   : > { %8630 = vmatprep.mubr.bf16.mxu0 %v3609_v11 }
 0x418   : > { %8631 = vmatmul.mubr.bf16.gmra.mrb[24].mxu0 %v3610_v7 }
 0x419   : > { %8634 = vmatprep.mubr.bf16.mxu0 %v3611_v43 }
 0x420   : > { %8635 = vmatmul.mubr.bf16.gmra.mrb[28].mxu0 %v3612_v12 }
 0x4bb   : > { %v8608_v23 = vpop.f32.mrb[0].mxu0 }
 0x4bc   : > { %v3712_v8 = vpop.f32.mrb[1].mxu0  ;;  %v3880_v16 = vadd.f32 %v8608_v23, %v11506_v44 }
 0x4bd   : > { %v8609_v24 = vpop.f32.mrb[2].mxu0  ;;  %v3878_v46 = vadd.f32 %v11506_v44, %v3712_v8 }
 0x4be   : > { %v3715_v11 = vpop.f32.mrb[3].mxu0  ;;  %v3881_v61 = vadd.f32 %v8609_v24, %v11506_v44  ;;  %v11522_v49 = vmax.f32 %v3880_v16, 0.0 }
 0x4bf   : > { %v3879_v32 = vadd.f32 %v11506_v44, %v3715_v11  ;;  %v11524_v8 = vmax.f32 %v3878_v46, 0.0 }
 0x4c0   : > { %v11529_v11 = vmax.f32 %v3881_v61, 0.0 }
 0x4c3   : > { %v8612_v47 = vpop.f32.mrb[4].mxu0 }
 0x4c4   : > { %v3728_v40 = vpop.f32.mrb[5].mxu0  ;;  %v3884_v13 = vadd.f32 %v8612_v47, %v11506_v44 }
 0x4c5   : > { %v8613_v53 = vpop.f32.mrb[6].mxu0  ;;  %v3882_v12 = vadd.f32 %v11506_v44, %v3728_v40 }
 0x4c6   : > { %v3731_v5 = vpop.f32.mrb[7].mxu0  ;;  %v3885_v33 = vadd.f32 %v8613_v53, %v11506_v44  ;;  %v11516_v41 = vmax.f32 %v3884_v13, 0.0 }
 0x4c7   : > { %v3883_v2 = vadd.f32 %v11506_v44, %v3731_v5  ;;  %v11519_v40 = vmax.f32 %v3882_v12, 0.0  ;;  %v11531_v5 = vmax.f32 %v3879_v32, 0.0 }
 0x4c8   : > { %v11526_v53 = vmax.f32 %v3885_v33, 0.0  ;;  %v3944_v12 = vmin.f32 %v11522_v49, %v11516_v41  ;;  %v3985_v16 = vmax.f32 %v11522_v49, %v11516_v41 }
 0x4c9   : > { %v11533_v13 = vmax.f32 %v3883_v2, 0.0  ;;  %v3942_v61 = vmin.f32 %v11524_v8, %v11519_v40  ;;  %v3983_v32 = vmax.f32 %v11524_v8, %v11519_v40 }
 0x4ca   : > { %v3945_v1 = vmin.f32 %v11529_v11, %v11526_v53 }
 0x4cb   : > { %v8616_v59 = vpop.f32.mrb[8].mxu0  ;;  %v3943_v51 = vmin.f32 %v11531_v5, %v11533_v13 }
 0x4cc   : > { %v3744_v55 = vpop.f32.mrb[9].mxu0  ;;  %v3888_v47 = vadd.f32 %v8616_v59, %v11506_v44 }
 0x4cd   : > { %v8617_v10 = vpop.f32.mrb[10].mxu0  ;;  %v3886_v23 = vadd.f32 %v11506_v44, %v3744_v55 }
 0x4ce   : > { %v3747_v28 = vpop.f32.mrb[11].mxu0  ;;  %v3889_v24 = vadd.f32 %v8617_v10, %v11506_v44  ;;  %v11540_v46 = vmax.f32 %v3888_v47, 0.0  ;;  %v3986_v47 = vmax.f32 %v11529_v11, %v11526_v53 }
 0x4cf   : > { %v3887_v59 = vadd.f32 %v11506_v44, %v3747_v28  ;;  %v11547_v2 = vmax.f32 %v3886_v23, 0.0  ;;  %v3984_v23 = vmax.f32 %v11531_v5, %v11533_v13 }
 0x4d0   : > { %v11554_v38 = vmax.f32 %v3889_v24, 0.0  ;;  %v3948_v27 = vmin.f32 %v3944_v12, %v11540_v46  ;;  %v3989_v63 = vmax.f32 %v3985_v16, %v11540_v46 }
 0x4d1   : > { %v11561_v9 = vmax.f32 %v3887_v59, 0.0  ;;  %v3946_v45 = vmin.f32 %v3942_v61, %v11547_v2  ;;  %v3987_v62 = vmax.f32 %v3983_v32, %v11547_v2 }
 0x4d2   : > { %v3949_v17 = vmin.f32 %v3945_v1, %v11554_v38 }
 0x4d3   : > { %v8620_v7 = vpop.f32.mrb[12].mxu0  ;;  %v3947_v16 = vmin.f32 %v3943_v51, %v11561_v9 }
 0x4d4   : > { %v3760_v43 = vpop.f32.mrb[13].mxu0  ;;  %v3892_v33 = vadd.f32 %v8620_v7, %v11506_v44 }
 0x4d5   : > { %v8621_v20 = vpop.f32.mrb[14].mxu0  ;;  %v3890_v10 = vadd.f32 %v11506_v44, %v3760_v43 }
 0x4d6   : > { %v3763_v4 = vpop.f32.mrb[15].mxu0  ;;  %v3893_v7 = vadd.f32 %v8621_v20, %v11506_v44  ;;  %v11566_v24 = vmax.f32 %v3892_v33, 0.0 }
 0x4d7   : > { %v3891_v43 = vadd.f32 %v11506_v44, %v3763_v4  ;;  %v11571_v22 = vmax.f32 %v3890_v10, 0.0  ;;  %v3990_v4 = vmax.f32 %v3986_v47, %v11554_v38 }
 0x4d8   : > { %v11576_v37 = vmax.f32 %v3893_v7, 0.0  ;;  %v3952_v32 = vmin.f32 %v3948_v27, %v11566_v24  ;;  %v3993_v7 = vmax.f32 %v3989_v63, %v11566_v24 }
 0x4d9   : > { %v11581_v33 = vmax.f32 %v3891_v43, 0.0  ;;  %v3991_v51 = vmax.f32 %v3987_v62, %v11571_v22 }
 0x4da   : > { %v3994_v27 = vmax.f32 %v3990_v4, %v11576_v37 }
 0x4db   : > { %v8624_v36 = vpop.f32.mrb[16].mxu0 }
 0x4dc   : > { %v3776_v14 = vpop.f32.mrb[17].mxu0  ;;  %v3896_v20 = vadd.f32 %v8624_v36, %v11506_v44  ;;  %v3988_v36 = vmax.f32 %v3984_v23, %v11561_v9 }
 0x4dd   : > { %v8625_v39 = vpop.f32.mrb[18].mxu0  ;;  %v3894_v59 = vadd.f32 %v11506_v44, %v3776_v14 }
 0x4de   : > { %v3779_v18 = vpop.f32.mrb[19].mxu0  ;;  %v3897_v12 = vadd.f32 %v8625_v39, %v11506_v44  ;;  %v11585_v10 = vmax.f32 %v3896_v20, 0.0  ;;  %v3950_v39 = vmin.f32 %v3946_v45, %v11571_v22  ;;  %v3992_v63 = vmax.f32 %v3988_v36, %v11581_v33 }
 0x4df   : > { %v3895_v61 = vadd.f32 %v11506_v44, %v3779_v18  ;;  %v11592_v23 = vmax.f32 %v3894_v59, 0.0  ;;  %v3953_v18 = vmin.f32 %v3949_v17, %v11576_v37 }
 0x4e0   : > { %13892 = vst [vmem:[#allocation94_spill] sm:$0xff] %v11585_v10  ;;  %v11596_v20 = vmax.f32 %v3897_v12, 0.0  ;;  %v3956_v59 = vmin.f32 %v3952_v32, %v11585_v10 }
 0x4e1   : > { %v11601_v15 = vmax.f32 %v3895_v61, 0.0  ;;  %v3954_v12 = vmin.f32 %v3950_v39, %v11592_v23  ;;  %v3995_v61 = vmax.f32 %v3991_v51, %v11592_v23 }
 0x4e2   : > { %13893 = vst [vmem:[#allocation93_spill] sm:$0xff] %v11596_v20 }
 0x4e3   : > { %v8628_v55 = vpop.f32.mrb[20].mxu0  ;;  %13894 = vst [vmem:[#allocation99_spill] sm:$0xff] %v11601_v15 }
 0x4e4   : > { %v3792_v28 = vpop.f32.mrb[21].mxu0  ;;  %v3900_v1 = vadd.f32 %v8628_v55, %v11506_v44 }
 0x4e5   : > { %v8629_v19 = vpop.f32.mrb[22].mxu0  ;;  %v3898_v14 = vadd.f32 %v11506_v44, %v3792_v28  ;;  %v3951_v28 = vmin.f32 %v3947_v16, %v11581_v33 }
 0x4e6   : > { %v3795_v35 = vpop.f32.mrb[23].mxu0  ;;  %v3901_v55 = vadd.f32 %v8629_v19, %v11506_v44  ;;  %v11605_v3 = vmax.f32 %v3900_v1, 0.0  ;;  %v3997_v19 = vmax.f32 %v3993_v7, %v11585_v10  ;;  %v3998_v1 = vmax.f32 %v3994_v27, %v11596_v20 }
 0x4e7   : > { %v3899_v62 = vadd.f32 %v11506_v44, %v3795_v35  ;;  %v11607_v17 = vmax.f32 %v3898_v14, 0.0  ;;  %v3957_v35 = vmin.f32 %v3953_v18, %v11596_v20  ;;  %v3955_v14 = vmin.f32 %v3951_v28, %v11601_v15 }
 0x4e8   : > { %13895 = vst [vmem:[#allocation102_spill] sm:$0xff] %v11605_v3  ;;  %v11616_v60 = vmax.f32 %v3901_v55, 0.0  ;;  %v3960_v39 = vmin.f32 %v3956_v59, %v11605_v3 }
 0x4e9   : > { %13896 = vst [vmem:[#allocation98_spill] sm:$0xff] %v11607_v17  ;;  %v11622_v7 = vmax.f32 %v3899_v62, 0.0  ;;  %v3958_v51 = vmin.f32 %v3954_v12, %v11607_v17  ;;  %v3999_v55 = vmax.f32 %v3995_v61, %v11607_v17 }
 0x4ea   : > { %13897 = vst [vmem:[#allocation105_spill] sm:$0xff] %v11616_v60  ;;  %v3961_v62 = vmin.f32 %v3957_v35, %v11616_v60  ;;  %v4002_v59 = vmax.f32 %v3998_v1, %v11616_v60 }
 0x4eb   : > { %v8632_v47 = vpop.f32.mrb[24].mxu0  ;;  %13898 = vst [vmem:[#allocation108_spill] sm:$0xff] %v11622_v7  ;;  %v3959_v12 = vmin.f32 %v3955_v14, %v11622_v7 }
 0x4ec   : > { %v3808_v43 = vpop.f32.mrb[25].mxu0  ;;  %v3904_v4 = vadd.f32 %v8632_v47, %v11506_v44  ;;  %v3996_v47 = vmax.f32 %v3992_v63, %v11601_v15 }
 0x4ed   : > { %v8633_v30 = vpop.f32.mrb[26].mxu0  ;;  %v3902_v16 = vadd.f32 %v11506_v44, %v3808_v43 }
 0x4ee   : > { %v3811_v45 = vpop.f32.mrb[27].mxu0  ;;  %v3905_v36 = vadd.f32 %v8633_v30, %v11506_v44  ;;  %v4001_v30 = vmax.f32 %v3997_v19, %v11605_v3  ;;  %v11627_v43 = vmax.f32 %v3904_v4, 0.0  ;;  %v4000_v61 = vmax.f32 %v3996_v47, %v11622_v7 }
 0x4ef   : > { %v3903_v32 = vadd.f32 %v11506_v44, %v3811_v45  ;;  %v11630_v45 = vmax.f32 %v3902_v16, 0.0 }
 0x4f0   : > { %13899 = vst [vmem:[#allocation104_spill] sm:$0xff] %v11627_v43  ;;  %v11632_v27 = vmax.f32 %v3905_v36, 0.0 }
 0x4f1   : > { %13900 = vst [vmem:[#allocation110_spill] sm:$0xff] %v11630_v45  ;;  %v11637_v57 = vmax.f32 %v3903_v32, 0.0  ;;  %v3964_v32 = vmin.f32 %v3960_v39, %v11627_v43  ;;  %v4003_v1 = vmax.f32 %v3999_v55, %v11630_v45 }
 0x4f2   : > { %13901 = vst [vmem:[#allocation109_spill] sm:$0xff] %v11632_v27  ;;  %v3965_v47 = vmin.f32 %v3961_v62, %v11632_v27 }
 0x4f3   : > { %v8636_v18 = vpop.f32.mrb[28].mxu0  ;;  %13902 = vst [vmem:[#allocation114_spill] sm:$0xff] %v11637_v57 }
 0x4f4   : > { %v3908_v28 = vadd.f32 %v8636_v18, %v11506_v44  ;;  %v3824_v63 = vpop.f32.mrb[29].mxu0  ;;  %v4005_v18 = vmax.f32 %v4001_v30, %v11627_v43  ;;  %v3962_v30 = vmin.f32 %v3958_v51, %v11630_v45 }
 0x4f5   : > { %v3906_v19 = vadd.f32 %v11506_v44, %v3824_v63  ;;  %v8637_v4 = vpop.f32.mrb[30].mxu0  ;;  %v4006_v63 = vmax.f32 %v4002_v59, %v11632_v27 }
 0x4f6   : > { %v11642_v16 = vmax.f32 %v3908_v28, 0.0  ;;  %v3909_v36 = vadd.f32 %v8637_v4, %v11506_v44  ;;  %v3827_v58 = vpop.f32.mrb[31].mxu0  ;;  %v4004_v28 = vmax.f32 %v4000_v61, %v11637_v57 }
 0x4f7   : > { %v11646_v29 = vmax.f32 %v3906_v19, 0.0  ;;  %v3907_v35 = vadd.f32 %v11506_v44, %v3827_v58  ;;  %v3963_v19 = vmin.f32 %v3959_v12, %v11637_v57 }
 0x4f8   : > { %13903 = vst [vmem:[#allocation116_spill] sm:$0xff] %v11642_v16  ;;  %v11652_v14 = vmax.f32 %v3909_v36, 0.0  ;;  %v4009_v58 = vmax.f32 %v4005_v18, %v11642_v16  ;;  %v3968_v39 = vmin.f32 %v3964_v32, %v11642_v16  ;;  %v9741_v32 = vld [vmem:[%s13265_s4 + $0x40] sm:$0xff]  }
 0x4f9   : > { %13904 = vst [vmem:[#allocation119_spill] sm:$0xff] %v11646_v29  ;;  %v11656_v4 = vmax.f32 %v3907_v35, 0.0  ;;  %v4007_v59 = vmax.f32 %v4003_v1, %v11646_v29  ;;  %v3966_v61 = vmin.f32 %v3962_v30, %v11646_v29  ;;  %8638 = vmatprep.subr.bf16.mxu1 %v9741_v32  ;;  %v9742_v30 = vld [vmem:[%s13265_s4 + $0x48] sm:$0xff]  }
 0x4fa   : > { %v4010_v44 = vmax.f32 %v4006_v63, %v11652_v14  ;;  %v3969_v55 = vmin.f32 %v3965_v47, %v11652_v14  ;;  %8639 = vmatpush3.bf16.msra.mxu1 %v9741_v32  ;;  %v11696_v32 = vld [vmem:[%s13265_s4] sm:$0xff]  }
 0x4fb   : > { %13905 = vst [vmem:[#allocation69_spill] sm:$0xff] %v11656_v4  ;;  %v4008_v62 = vmax.f32 %v4004_v28, %v11656_v4  ;;  %v3967_v36 = vmin.f32 %v3963_v19, %v11656_v4  ;;  %8640 = vmatprep.subr.bf16.mxu1 %v9742_v30  ;;  %13906 = vst [vmem:[#allocation70_spill] sm:$0xff] %v11696_v32 }
 0x4fc   : > { %v4012_v35 = vmax.f32 %v4009_v58, %v4010_v44  ;;  %v3971_v51 = vmin.f32 %v3968_v39, %v3969_v55  ;;  %v9744_v39 = vld [vmem:[%s13265_s4 + $0x58] sm:$0xff]  }
 0x4fd   : > { %v4011_v54 = vmax.f32 %v4007_v59, %v4008_v62  ;;  %v3970_v12 = vmin.f32 %v3966_v61, %v3967_v36  ;;  %v9745_v36 = vld [vmem:[%s13265_s4 + $0x60] sm:$0xff]  }
 0x4fe   : > { %8641 = vmatpush3.bf16.msra.mxu1 %v9742_v30 }
 0x4ff   : > { %v4013_v48 = vmax.f32 %v4011_v54, %v4012_v35  ;;  %v3972_v18 = vmin.f32 %v3970_v12, %v3971_v51  ;;  %v9743_v54 = vld [vmem:[%s13265_s4 + $0x50] sm:$0xff]  }
 0x500   : > { %8642 = vmatprep.subr.bf16.mxu1 %v9743_v54  ;;  %v9747_v12 = vld [vmem:[%s13265_s4 + $0x70] sm:$0xff]  }
 0x501   : > { %4014 = vmax.xlane.f32.xlu1 %v4013_v48  ;;  %3973 = vmin.xlane.f32.xlu0 %v3972_v18  ;;  %v9748_v18 = vld [vmem:[%s13265_s4 + $0x78] sm:$0xff]  }
 0x502   : > { %8643 = vmatpush3.bf16.msra.mxu1 %v9743_v54 }
 0x503   : > { %8644 = vmatprep.subr.bf16.mxu1 %v9744_v39 }
 0x506   : > { %8645 = vmatpush3.bf16.msra.mxu1 %v9744_v39 }
 0x507   : > { %8646 = vmatprep.subr.bf16.mxu1 %v9745_v36 }
 0x50a   : > { %8647 = vmatpush3.bf16.msra.mxu1 %v9745_v36 }
 0x50b   : > { %8648 = vmatprep.subr.bf16.mxu1 %v9746_v34 }
 0x50e   : > { %8649 = vmatpush3.bf16.msra.mxu1 %v9746_v34 }
 0x50f   : > { %8650 = vmatprep.subr.bf16.mxu1 %v9747_v12 }
 0x512   : > { %8651 = vmatpush3.bf16.msra.mxu1 %v9747_v12 }
 0x513   : > { %8652 = vmatprep.subr.bf16.mxu1 %v9748_v18 }
 0x516   : > { %8653 = vmatpush3.bf16.msra.mxu1 %v9748_v18 }
 0x517   : > { %8686 = vmatprep.subr.bf16.mxu1 %v11696_v32 }
 0x58e   : > { %v4015_v1 = vpop.xlane.xlu1 %4014  ;;  %v3974_v63 = vpop.xlane.xlu0 %3973 }
 0x58f   : > { %v4016_v47 = vrot.slane %v4015_v1, 4  ;;  %v3975_v28 = vrot.slane %v3974_v63, 4 }
 0x591   : > { %v4017_v48 = vmax.f32 %v4015_v1, %v4016_v47  ;;  %v3976_v19 = vmin.f32 %v3974_v63, %v3975_v28 }
 0x593   : > { %v4018_v58 = vrot.slane %v4017_v48, 2  ;;  %v3977_v44 = vrot.slane %v3976_v19, 2 }
 0x595   : > { %v3978_v55 = vmin.f32 %v3976_v19, %v3977_v44  ;;  %v4019_v59 = vmax.f32 %v4017_v48, %v4018_v58 }
 0x597   : > { %v3979_v62 = vrot.slane %v3978_v55, 1  ;;  %v4020_v61 = vrot.slane %v4019_v59, 1 }
 0x599   : > { %v3980_v35 = vmin.f32 %v3978_v55, %v3979_v62  ;;  %v4021_v51 = vmax.f32 %v4019_v59, %v4020_v61 }
 0x59b   : > { %9618 = vpush %v3980_v35 }
 0x59c   : > { %9620 = vpush %v4021_v51 }
 0x5cc   : > { %s9619_s26 = spop %9618 }
 0x5cd   : > { %s9621_s27 = spop %9620  ;;  %v11699_v1 = vstv %s9619_s26 }
 0x5ce   : > { %v4023_v63 = vstv %s9621_s27  ;;  %v4030_v54 = vsub.f32 %v11524_v8, %v11699_v1  ;;  %v4031_v48 = vsub.f32 %v11531_v5, %v11699_v1  ;;  %v4032_v19 = vsub.f32 %v11522_v49, %v11699_v1 }
 0x5cf   : > { %v4024_v47 = vsub.f32 %v4023_v63, %v11699_v1  ;;  %v4033_v58 = vsub.f32 %v11529_v11, %v11699_v1  ;;  %v4034_v44 = vsub.f32 %v11519_v40, %v11699_v1  ;;  %v4035_v39 = vsub.f32 %v11533_v13, %v11699_v1 }
 0x5d0   : > { %v4036_v55 = vsub.f32 %v11516_v41, %v11699_v1  ;;  %v4037_v59 = vsub.f32 %v11526_v53, %v11699_v1  ;;  %v4038_v62 = vsub.f32 %v11547_v2, %v11699_v1  ;;  %v4039_v61 = vsub.f32 %v11561_v9, %v11699_v1 }
 0x5d1   : > { %v11702_v28 = vmul.f32 0.33333334, %v4024_v47  ;;  %v4040_v36 = vsub.f32 %v11540_v46, %v11699_v1  ;;  %v4041_v35 = vsub.f32 %v11554_v38, %v11699_v1  ;;  %v4042_v51 = vsub.f32 %v11571_v22, %v11699_v1 }
 0x5d2   : > { %v4043_v34 = vsub.f32 %v11581_v33, %v11699_v1  ;;  %v4044_v12 = vsub.f32 %v11566_v24, %v11699_v1  ;;  %v4045_v18 = vsub.f32 %v11576_v37, %v11699_v1  ;;  %v4046_v63 = vsub.f32 %v11592_v23, %v11699_v1 }
 0x5d3   : > { %vm4026_vm1 = vcmp.gt.f32.partialorder %v11702_v28, 0.0  ;;  %v4047_v47 = vsub.f32 %v11601_v15, %v11699_v1  ;;  %v4048_v56 = vsub.f32 %v11585_v10, %v11699_v1  ;;  %v4049_v42 = vsub.f32 %v11596_v20, %v11699_v1 }
 0x5d4   : > { %v11708_v30 = vsel %vm4026_vm1, %v11702_v28, 1.0  ;;  %v4050_v0 = vsub.f32 %v11607_v17, %v11699_v1  ;;  %v4051_v26 = vsub.f32 %v11622_v7, %v11699_v1  ;;  %v4052_v6 = vsub.f32 %v11605_v3, %v11699_v1  ;;  %v9750_v28 = vld [vmem:[%s13265_s4 + $0x8] sm:$0xff]  }
 0x5d5   : > { %9815 = vrcp.f32 %v11708_v30  ;;  %v4053_v25 = vsub.f32 %v11616_v60, %v11699_v1  ;;  %v4054_v31 = vsub.f32 %v11630_v45, %v11699_v1  ;;  %v4055_v21 = vsub.f32 %v11637_v57, %v11699_v1 }
 0x5d6   : > { %v4056_v50 = vsub.f32 %v11627_v43, %v11699_v1  ;;  %v4057_v52 = vsub.f32 %v11632_v27, %v11699_v1  ;;  %v4058_v7 = vsub.f32 %v11646_v29, %v11699_v1  ;;  %v4059_v3 = vsub.f32 %v11656_v4, %v11699_v1 }
 0x5d7   : > { %v4060_v60 = vsub.f32 %v11642_v16, %v11699_v1  ;;  %v4061_v45 = vsub.f32 %v11652_v14, %v11699_v1 }
 0x5df   : > { %v9816_v32 = vpop.eup %9815 }
 0x5e0   : > { %v11775_v57 = vmul.f32 %v9816_v32, %v4030_v54  ;;  %v11777_v17 = vmul.f32 %v9816_v32, %v4031_v48  ;;  %v11779_v43 = vmul.f32 %v9816_v32, %v4032_v19  ;;  %v11781_v27 = vmul.f32 %v9816_v32, %v4033_v58 }
 0x5e1   : > { %v11783_v20 = vmul.f32 %v9816_v32, %v4034_v44  ;;  %v11785_v29 = vmul.f32 %v9816_v32, %v4035_v39  ;;  %v11787_v10 = vmul.f32 %v9816_v32, %v4036_v55  ;;  %v11789_v4 = vmul.f32 %v9816_v32, %v4037_v59 }
 0x5e2   : > { %v11791_v16 = vmul.f32 %v9816_v32, %v4038_v62  ;;  %v11793_v15 = vmul.f32 %v9816_v32, %v4039_v61  ;;  %v11795_v54 = vmul.f32 %v9816_v32, %v4040_v36  ;;  %v11797_v48 = vmul.f32 %v9816_v32, %v4041_v35 }
 0x5e3   : > { %v11799_v19 = vmul.f32 %v9816_v32, %v4042_v51  ;;  %v11801_v58 = vmul.f32 %v9816_v32, %v4043_v34  ;;  %v11803_v44 = vmul.f32 %v9816_v32, %v4044_v12  ;;  %v11805_v39 = vmul.f32 %v9816_v32, %v4045_v18 }
 0x5e4   : > { %v11807_v55 = vmul.f32 %v9816_v32, %v4046_v63  ;;  %v11809_v59 = vmul.f32 %v9816_v32, %v4047_v47  ;;  %v11811_v62 = vmul.f32 %v9816_v32, %v4048_v56  ;;  %v11813_v61 = vmul.f32 %v9816_v32, %v4049_v42 }
 0x5e5   : > { %v11815_v36 = vmul.f32 %v9816_v32, %v4050_v0  ;;  %v11817_v35 = vmul.f32 %v9816_v32, %v4051_v26  ;;  %v11819_v51 = vmul.f32 %v9816_v32, %v4052_v6  ;;  %v11821_v34 = vmul.f32 %v9816_v32, %v4053_v25 }
 0x5e6   : > { %v11823_v12 = vmul.f32 %v9816_v32, %v4054_v31  ;;  %v11825_v18 = vmul.f32 %v9816_v32, %v4055_v21  ;;  %v11827_v63 = vmul.f32 %v9816_v32, %v4056_v50  ;;  %v11829_v47 = vmul.f32 %v9816_v32, %v4057_v52 }
 0x5e7   : > { %v11831_v56 = vmul.f32 %v9816_v32, %v4058_v7  ;;  %v11833_v42 = vmul.f32 %v9816_v32, %v4059_v3  ;;  %v11835_v0 = vmul.f32 %v9816_v32, %v4060_v60  ;;  %v11837_v26 = vmul.f32 %v9816_v32, %v4061_v45 }
 0x5e8   : > { %v9622_v6 = vround.rtne.f32 %v11775_v57  ;;  %v9623_v25 = vround.rtne.f32 %v11777_v17  ;;  %v9624_v31 = vround.rtne.f32 %v11779_v43  ;;  %v9625_v21 = vround.rtne.f32 %v11781_v27 }
 0x5e9   : > { %v9626_v50 = vround.rtne.f32 %v11783_v20  ;;  %v9627_v52 = vround.rtne.f32 %v11785_v29  ;;  %v9628_v7 = vround.rtne.f32 %v11787_v10  ;;  %v9629_v3 = vround.rtne.f32 %v11789_v4 }
 0x5ea   : > { %v9630_v60 = vround.rtne.f32 %v11791_v16  ;;  %v9631_v45 = vround.rtne.f32 %v11793_v15  ;;  %v9632_v57 = vround.rtne.f32 %v11795_v54  ;;  %v9633_v17 = vround.rtne.f32 %v11797_v48 }
 0x5eb   : > { %v9634_v43 = vround.rtne.f32 %v11799_v19  ;;  %v9635_v27 = vround.rtne.f32 %v11801_v58  ;;  %v9636_v20 = vround.rtne.f32 %v11803_v44  ;;  %v9637_v29 = vround.rtne.f32 %v11805_v39 }
 0x5ec   : > { %v9638_v10 = vround.rtne.f32 %v11807_v55  ;;  %v9639_v4 = vround.rtne.f32 %v11809_v59  ;;  %v9640_v16 = vround.rtne.f32 %v11811_v62  ;;  %v9641_v15 = vround.rtne.f32 %v11813_v61 }
 0x5ed   : > { %v9642_v32 = vround.rtne.f32 %v11815_v36  ;;  %v9643_v54 = vround.rtne.f32 %v11817_v35  ;;  %v9644_v48 = vround.rtne.f32 %v11819_v51  ;;  %v9645_v19 = vround.rtne.f32 %v11821_v34 }
 0x5ee   : > { %v9646_v58 = vround.rtne.f32 %v11823_v12  ;;  %v9647_v44 = vround.rtne.f32 %v11825_v18  ;;  %v9648_v39 = vround.rtne.f32 %v11827_v63  ;;  %v9649_v55 = vround.rtne.f32 %v11829_v47 }
 0x5ef   : > { %v9650_v59 = vround.rtne.f32 %v11831_v56  ;;  %v9651_v62 = vround.rtne.f32 %v11833_v42  ;;  %v9652_v61 = vround.rtne.f32 %v11835_v0  ;;  %v9653_v36 = vround.rtne.f32 %v11837_v26 }
 0x5f0   : > { %v4126_v35 = vmul.f32 %v9622_v6, %v11708_v30  ;;  %v4127_v51 = vmul.f32 %v9623_v25, %v11708_v30  ;;  %v4128_v34 = vmul.f32 %v9624_v31, %v11708_v30  ;;  %v4129_v12 = vmul.f32 %v9625_v21, %v11708_v30 }
 0x5f1   : > { %v4130_v18 = vmul.f32 %v9626_v50, %v11708_v30  ;;  %v4131_v63 = vmul.f32 %v9627_v52, %v11708_v30  ;;  %v4132_v47 = vmul.f32 %v9628_v7, %v11708_v30  ;;  %v4133_v56 = vmul.f32 %v9629_v3, %v11708_v30 }
 0x5f2   : > { %v4134_v42 = vmul.f32 %v9630_v60, %v11708_v30  ;;  %v4135_v0 = vmul.f32 %v9631_v45, %v11708_v30  ;;  %v4136_v26 = vmul.f32 %v9632_v57, %v11708_v30  ;;  %v4137_v6 = vmul.f32 %v9633_v17, %v11708_v30 }
 0x5f3   : > { %v4138_v25 = vmul.f32 %v9634_v43, %v11708_v30  ;;  %v4139_v31 = vmul.f32 %v9635_v27, %v11708_v30  ;;  %v4140_v21 = vmul.f32 %v9636_v20, %v11708_v30  ;;  %v4141_v50 = vmul.f32 %v9637_v29, %v11708_v30 }
 0x5f4   : > { %v4142_v52 = vmul.f32 %v9638_v10, %v11708_v30  ;;  %v4143_v7 = vmul.f32 %v9639_v4, %v11708_v30  ;;  %v4144_v3 = vmul.f32 %v9640_v16, %v11708_v30  ;;  %v4145_v60 = vmul.f32 %v9641_v15, %v11708_v30 }
 0x5f5   : > { %v4146_v45 = vmul.f32 %v9642_v32, %v11708_v30  ;;  %v4147_v57 = vmul.f32 %v9643_v54, %v11708_v30  ;;  %v4148_v17 = vmul.f32 %v9644_v48, %v11708_v30  ;;  %v4149_v43 = vmul.f32 %v9645_v19, %v11708_v30 }
 0x5f6   : > { %v4150_v27 = vmul.f32 %v9646_v58, %v11708_v30  ;;  %v4151_v20 = vmul.f32 %v9647_v44, %v11708_v30  ;;  %v4152_v29 = vmul.f32 %v9648_v39, %v11708_v30  ;;  %v4153_v10 = vmul.f32 %v9649_v55, %v11708_v30 }
 0x5f7   : > { %v4154_v4 = vmul.f32 %v9650_v59, %v11708_v30  ;;  %v4155_v16 = vmul.f32 %v9651_v62, %v11708_v30  ;;  %v4156_v15 = vmul.f32 %v9652_v61, %v11708_v30  ;;  %v4157_v32 = vmul.f32 %v9653_v36, %v11708_v30 }
 0x5f8   : > { %v4158_v54 = vadd.f32 %v4126_v35, %v11699_v1  ;;  %v4159_v48 = vadd.f32 %v4127_v51, %v11699_v1  ;;  %v4160_v19 = vadd.f32 %v4128_v34, %v11699_v1  ;;  %v4161_v58 = vadd.f32 %v4129_v12, %v11699_v1 }
 0x5f9   : > { %v4162_v44 = vadd.f32 %v4130_v18, %v11699_v1  ;;  %v4163_v39 = vadd.f32 %v4131_v63, %v11699_v1  ;;  %v4164_v55 = vadd.f32 %v4132_v47, %v11699_v1  ;;  %v4165_v59 = vadd.f32 %v4133_v56, %v11699_v1 }
 0x5fa   : > { %v4166_v62 = vadd.f32 %v4134_v42, %v11699_v1  ;;  %v4167_v30 = vadd.f32 %v4135_v0, %v11699_v1  ;;  %v4168_v61 = vadd.f32 %v4136_v26, %v11699_v1  ;;  %v4169_v36 = vadd.f32 %v4137_v6, %v11699_v1 }
 0x5fb   : > { %v4170_v35 = vadd.f32 %v4138_v25, %v11699_v1  ;;  %v4171_v51 = vadd.f32 %v4139_v31, %v11699_v1  ;;  %v4172_v34 = vadd.f32 %v4140_v21, %v11699_v1  ;;  %v4173_v12 = vadd.f32 %v4141_v50, %v11699_v1 }
 0x5fc   : > { %v4174_v18 = vadd.f32 %v4142_v52, %v11699_v1  ;;  %v4175_v63 = vadd.f32 %v4143_v7, %v11699_v1  ;;  %v4176_v47 = vadd.f32 %v4144_v3, %v11699_v1  ;;  %v4177_v56 = vadd.f32 %v4145_v60, %v11699_v1 }
 0x5fd   : > { %v4178_v42 = vadd.f32 %v4146_v45, %v11699_v1  ;;  %v4179_v0 = vadd.f32 %v4147_v57, %v11699_v1  ;;  %v4180_v26 = vadd.f32 %v4148_v17, %v11699_v1  ;;  %v4181_v6 = vadd.f32 %v4149_v43, %v11699_v1 }
 0x5fe   : > { %v4182_v25 = vadd.f32 %v4150_v27, %v11699_v1  ;;  %v4183_v31 = vadd.f32 %v4151_v20, %v11699_v1  ;;  %v4184_v21 = vadd.f32 %v4152_v29, %v11699_v1  ;;  %v4185_v50 = vadd.f32 %v4153_v10, %v11699_v1  ;;  %v13909_v27 = vld [vmem:[#allocation93_spill] sm:$0xff]  ;;  %v13911_v10 = vld [vmem:[#allocation108_spill] sm:$0xff] }
 0x5ff   : > { %v4186_v52 = vadd.f32 %v4154_v4, %v11699_v1  ;;  %v4187_v7 = vadd.f32 %v4155_v16, %v11699_v1  ;;  %v4188_v3 = vadd.f32 %v4156_v15, %v11699_v1  ;;  %v4189_v60 = vadd.f32 %v4157_v32, %v11699_v1  ;;  %v13912_v16 = vld [vmem:[#allocation102_spill] sm:$0xff]  ;;  %v13913_v32 = vld [vmem:[#allocation105_spill] sm:$0xff] }
 0x600   : > { %v11938_v45 = vsel %vm4026_vm1, %v4158_v54, %v11524_v8  ;;  %v11943_v57 = vsel %vm4026_vm1, %v4159_v48, %v11531_v5  ;;  %v11948_v17 = vsel %vm4026_vm1, %v4160_v19, %v11522_v49  ;;  %v11953_v43 = vsel %vm4026_vm1, %v4161_v58, %v11529_v11  ;;  %v13914_v48 = vld [vmem:[#allocation110_spill] sm:$0xff] }
 0x601   : > { %v11958_v8 = vsel %vm4026_vm1, %v4162_v44, %v11519_v40  ;;  %v11963_v5 = vsel %vm4026_vm1, %v4163_v39, %v11533_v13  ;;  %v11968_v49 = vsel %vm4026_vm1, %v4164_v55, %v11516_v41  ;;  %v11973_v11 = vsel %vm4026_vm1, %v4165_v59, %v11526_v53  ;;  %4224 = vst [vmem:[#allocation2 + $0x18] sm:$0xff] %v11938_v45  ;;  %v13915_v58 = vld [vmem:[#allocation114_spill] sm:$0xff]  ;;  %v13916_v39 = vld [vmem:[#allocation104_spill] sm:$0xff]  ;;  %v13917_v59 = vld [vmem:[#allocation109_spill] sm:$0xff] }
 0x602   : > { %4225 = vst [vmem:[#allocation2 + $0x20] sm:$0xff] %v11943_v57  ;;  %4226 = vst [vmem:[#allocation2 + $0x28] sm:$0xff] %v11948_v17  ;;  %v11982_v40 = vsel %vm4026_vm1, %v4166_v62, %v11547_v2  ;;  %v11987_v41 = vsel %vm4026_vm1, %v4167_v30, %v11561_v9  ;;  %v11992_v53 = vsel %vm4026_vm1, %v4168_v61, %v11540_v46  ;;  %v13918_v30 = vld [vmem:[#allocation119_spill] sm:$0xff] }
 0x603   : > { %4227 = vst [vmem:[#allocation2 + $0x30] sm:$0xff] %v11953_v43  ;;  %v11997_v13 = vsel %vm4026_vm1, %v4169_v36, %v11554_v38  ;;  %4228 = vst [vmem:[#allocation2 + $0x38] sm:$0xff] %v11958_v8  ;;  %v12006_v9 = vsel %vm4026_vm1, %v4170_v35, %v11571_v22  ;;  %v12011_v46 = vsel %vm4026_vm1, %v4171_v51, %v11581_v33  ;;  %v13919_v36 = vld [vmem:[#allocation69_spill] sm:$0xff]  ;;  %v13920_v51 = vld [vmem:[#allocation116_spill] sm:$0xff] }
 0x604   : > { %4229 = vst [vmem:[#allocation2 + $0x40] sm:$0xff] %v11963_v5  ;;  %4230 = vst [vmem:[#allocation2 + $0x48] sm:$0xff] %v11968_v49  ;;  %v12016_v38 = vsel %vm4026_vm1, %v4172_v34, %v11566_v24  ;;  %v12021_v2 = vsel %vm4026_vm1, %v4173_v12, %v11576_v37  ;;  %v12030_v22 = vsel %vm4026_vm1, %v4174_v18, %v11592_v23  ;;  %v13907_v24 = vld [vmem:[#allocation99_spill] sm:$0xff]  ;;  %v13908_v37 = vld [vmem:[#allocation94_spill] sm:$0xff] }
 0x605   : > { %4231 = vst [vmem:[#allocation2 + $0x50] sm:$0xff] %v11973_v11  ;;  %4232 = vst [vmem:[#allocation2 + $0x58] sm:$0xff] %v11982_v40  ;;  %v12035_v33 = vsel %vm4026_vm1, %v4175_v63, %v13907_v24  ;;  %v12040_v1 = vsel %vm4026_vm1, %v4176_v47, %v13908_v37  ;;  %v12045_v20 = vsel %vm4026_vm1, %v4177_v56, %v13909_v27  ;;  %v13910_v23 = vld [vmem:[#allocation98_spill] sm:$0xff]  ;;  %v9751_v47 = vld [vmem:[%s13265_s4 + $0x10] sm:$0xff]  }
 0x606   : > { %4233 = vst [vmem:[#allocation2 + $0x60] sm:$0xff] %v11987_v41  ;;  %4234 = vst [vmem:[#allocation2 + $0x68] sm:$0xff] %v11992_v53  ;;  %v12054_v29 = vsel %vm4026_vm1, %v4178_v42, %v13910_v23  ;;  %v12059_v4 = vsel %vm4026_vm1, %v4179_v0, %v13911_v10  ;;  %v12064_v15 = vsel %vm4026_vm1, %v4180_v26, %v13912_v16  ;;  %v13921_v63 = vld [vmem:[#allocation70_spill] sm:$0xff]  ;;  %v9752_v42 = vld [vmem:[%s13265_s4 + $0x18] sm:$0xff]  }
 0x607   : > { %4235 = vst [vmem:[#allocation2 + $0x70] sm:$0xff] %v11997_v13  ;;  %4236 = vst [vmem:[#allocation2 + $0x78] sm:$0xff] %v12006_v9  ;;  %v12069_v54 = vsel %vm4026_vm1, %v4181_v6, %v13913_v32  ;;  %v12078_v19 = vsel %vm4026_vm1, %v4182_v25, %v13914_v48  ;;  %v12083_v44 = vsel %vm4026_vm1, %v4183_v31, %v13915_v58  ;;  %v9753_v26 = vld [vmem:[%s13265_s4 + $0x20] sm:$0xff]   ;;  %v9754_v25 = vld [vmem:[%s13265_s4 + $0x28] sm:$0xff]  }
 0x608   : > { %4237 = vst [vmem:[#allocation2 + $0x80] sm:$0xff] %v12011_v46  ;;  %4238 = vst [vmem:[#allocation2 + $0x88] sm:$0xff] %v12016_v38  ;;  %v12088_v55 = vsel %vm4026_vm1, %v4184_v21, %v13916_v39  ;;  %v12093_v62 = vsel %vm4026_vm1, %v4185_v50, %v13917_v59  ;;  %v12102_v61 = vsel %vm4026_vm1, %v4186_v52, %v13918_v30  ;;  %v9755_v21 = vld [vmem:[%s13265_s4 + $0x30] sm:$0xff]   ;;  %v13930_v27 = vld [vmem:[#allocation38_spill] sm:$0xff] }
 0x609   : > { %4239 = vst [vmem:[#allocation2 + $0x90] sm:$0xff] %v12021_v2  ;;  %4240 = vst [vmem:[#allocation2 + $0x98] sm:$0xff] %v12030_v22  ;;  %v12107_v35 = vsel %vm4026_vm1, %v4187_v7, %v13919_v36  ;;  %v4222_v34 = vsel %vm4026_vm1, %v4188_v3, %v13920_v51  ;;  %v4223_v12 = vsel %vm4026_vm1, %v4189_v60, %v11652_v14  ;;  %v12152_v50 = vld [vmem:[#allocation2 + $0x17] sm:$0xff]  ;;  %v12159_v3 = vld [vmem:[#allocation2 + $0x1f] sm:$0xff] }
 0x60a   : > { %4241 = vst [vmem:[#allocation2 + $0xa0] sm:$0xff] %v12035_v33  ;;  %4242 = vst [vmem:[#allocation2 + $0xa8] sm:$0xff] %v12040_v1  ;;  %v4385_v18 = vpack.c.bf16 %v11943_v57, %v11938_v45  ;;  %v4386_v14 = vpack.c.bf16 %v11953_v43, %v11948_v17  ;;  %v4387_v56 = vpack.c.bf16 %v11963_v5, %v11958_v8  ;;  %v9756_v7 = vld [vmem:[%s13265_s4 + $0x38] sm:$0xff]   ;;  %v12163_v45 = vld [vmem:[#allocation2 + $0x27] sm:$0xff] }
 0x60b   : > { %4243 = vst [vmem:[#allocation2 + $0xb0] sm:$0xff] %v12045_v20  ;;  %4244 = vst [vmem:[#allocation2 + $0xb8] sm:$0xff] %v12054_v29  ;;  %v4388_v0 = vpack.c.bf16 %v11973_v11, %v11968_v49  ;;  %v4389_v6 = vpack.c.bf16 %v11987_v41, %v11982_v40  ;;  %v4390_v31 = vpack.c.bf16 %v11997_v13, %v11992_v53  ;;  %v12165_v57 = vld [vmem:[#allocation2 + $0x2f] sm:$0xff]  ;;  %v12167_v17 = vld [vmem:[#allocation2 + $0x37] sm:$0xff] }
 0x60c   : > { %4245 = vst [vmem:[#allocation2 + $0xc0] sm:$0xff] %v12059_v4  ;;  %4246 = vst [vmem:[#allocation2 + $0xc8] sm:$0xff] %v12064_v15  ;;  %8655 = vmatmul.mubr.bf16.vlgmr.msra.gmra.mrb[0].mxu1 %v4385_v18  ;;  %v4391_v52 = vpack.c.bf16 %v12011_v46, %v12006_v9  ;;  %v4392_v60 = vpack.c.bf16 %v12021_v2, %v12016_v38  ;;  %v12169_v43 = vld [vmem:[#allocation2 + $0x3f] sm:$0xff]  ;;  %v12171_v8 = vld [vmem:[#allocation2 + $0x47] sm:$0xff]  ;;  %v4393_v40 = vpack.c.bf16 %v12035_v33, %v12030_v22 }
 0x60d   : > { %4247 = vst [vmem:[#allocation2 + $0xd0] sm:$0xff] %v12069_v54  ;;  %4248 = vst [vmem:[#allocation2 + $0xd8] sm:$0xff] %v12078_v19  ;;  %8687 = vmatpush3.bf16.msra.mxu1 %v13921_v63  ;;  %8658 = vmatprep.mubr.bf16.mxu1 %v4386_v14  ;;  %v12173_v5 = vld [vmem:[#allocation2 + $0x4f] sm:$0xff]  ;;  %v13922_v49 = vld [vmem:[#allocation36_spill] sm:$0xff]  ;;  %v4394_v38 = vpack.c.bf16 %v12045_v20, %v12040_v1  ;;  %v12208_v23 = vmul.f32 %v12165_v57, %v13930_v27 }
 0x60e   : > { %4249 = vst [vmem:[#allocation2 + $0xe0] sm:$0xff] %v12083_v44  ;;  %4250 = vst [vmem:[#allocation2 + $0xe8] sm:$0xff] %v12088_v55  ;;  %8688 = vmatprep.subr.bf16.mxu1 %v9750_v28  ;;  %v12177_v11 = vmul.f32 %v12152_v50, %v13922_v49  ;;  %v12181_v41 = vld [vmem:[#allocation2 + $0x57] sm:$0xff]  ;;  %v12183_v53 = vld [vmem:[#allocation2 + $0x5f] sm:$0xff] }
 0x60f   : > { %4251 = vst [vmem:[#allocation2 + $0xf0] sm:$0xff] %v12093_v62  ;;  %4252 = vst [vmem:[#allocation2 + $0xf8] sm:$0xff] %v12102_v61  ;;  %v12185_v13 = vld [vmem:[#allocation2 + $0x67] sm:$0xff]  ;;  %v12198_v22 = vld [vmem:[#allocation2 + $0x6f] sm:$0xff] }
 0x610   : > { %4253 = vst [vmem:[#allocation2 + $0x100] sm:$0xff] %v12107_v35  ;;  %4254 = vst [vmem:[#allocation2 + $0x108] sm:$0xff] %v4222_v34  ;;  %v13924_v9 = vld [vmem:[#allocation46_spill] sm:$0xff]  ;;  %v12196_v2 = vld [vmem:[%s13265_s4 + $0x80] sm:$0xff]  }
 0x611   : > { %4255 = vst [vmem:[#allocation2 + $0x110] sm:$0xff] %v4223_v12  ;;  %8689 = vmatpush3.bf16.msra.mxu1 %v9750_v28  ;;  %13923 = vst [vmem:[#allocation71_spill] sm:$0xff] %v12177_v11  ;;  %v12189_v46 = vmul.f32 %v12159_v3, %v13924_v9  ;;  %v12200_v24 = vld [vmem:[#allocation2 + $0x77] sm:$0xff]  ;;  %v13928_v33 = vld [vmem:[#allocation37_spill] sm:$0xff] }
 0x612   : > { %8690 = vmatprep.subr.bf16.mxu1 %v9751_v47  ;;  %13926 = vst [vmem:[#allocation76_spill] sm:$0xff] %v12198_v22  ;;  %13927 = vst [vmem:[#allocation77_spill] sm:$0xff] %v12200_v24  ;;  %v12204_v37 = vmul.f32 %v12163_v45, %v13928_v33  ;;  %v13932_v10 = vld [vmem:[#allocation39_spill] sm:$0xff]  ;;  %v12214_v20 = vld [vmem:[#allocation2 + $0x7f] sm:$0xff] }
 0x613   : > { %13925 = vst [vmem:[#allocation74_spill] sm:$0xff] %v12189_v46  ;;  %13931 = vst [vmem:[#allocation81_spill] sm:$0xff] %v12208_v23  ;;  %v12212_v1 = vmul.f32 %v12167_v17, %v13932_v10  ;;  %v12216_v16 = vld [vmem:[#allocation2 + $0x87] sm:$0xff]  ;;  %v12218_v32 = vld [vmem:[#allocation2 + $0x8f] sm:$0xff] }
 0x614   : > { %8659 = vmatmul.mubr.bf16.gmra.mrb[4].mxu1 %v4387_v56  ;;  %13929 = vst [vmem:[#allocation80_spill] sm:$0xff] %v12204_v37  ;;  %13934 = vst [vmem:[#allocation84_spill] sm:$0xff] %v12214_v20  ;;  %v13937_v58 = vld [vmem:[#allocation40_spill] sm:$0xff]  ;;  %v13939_v59 = vld [vmem:[#allocation41_spill] sm:$0xff] }
 0x615   : > { %8662 = vmatprep.mubr.bf16.mxu1 %v4388_v0  ;;  %8691 = vmatpush3.bf16.msra.mxu1 %v9751_v47  ;;  %13933 = vst [vmem:[#allocation83_spill] sm:$0xff] %v12212_v1  ;;  %13935 = vst [vmem:[#allocation122_spill] sm:$0xff] %v12216_v16  ;;  %v12224_v39 = vmul.f32 %v12169_v43, %v13937_v58  ;;  %v12228_v30 = vmul.f32 %v12171_v8, %v13939_v59  ;;  %v13941_v36 = vld [vmem:[#allocation42_spill] sm:$0xff]  ;;  %v12234_v34 = vld [vmem:[#allocation2 + $0x97] sm:$0xff] }
 0x616   : > { %8692 = vmatprep.subr.bf16.mxu1 %v9752_v42  ;;  %13936 = vst [vmem:[#allocation123_spill] sm:$0xff] %v12218_v32  ;;  %v12232_v51 = vmul.f32 %v12173_v5, %v13941_v36  ;;  %13943 = vst [vmem:[#allocation94_spill] sm:$0xff] %v12234_v34  ;;  %v12236_v12 = vld [vmem:[#allocation2 + $0x9f] sm:$0xff]  ;;  %v12238_v18 = vld [vmem:[#allocation2 + $0xa7] sm:$0xff] }
 0x617   : > { %13938 = vst [vmem:[#allocation124_spill] sm:$0xff] %v12224_v39  ;;  %13940 = vst [vmem:[#allocation125_spill] sm:$0xff] %v12228_v30  ;;  %v13946_v28 = vld [vmem:[#allocation43_spill] sm:$0xff]  ;;  %v12273_v48 = vld [vmem:[#allocation2 + $0xc7] sm:$0xff] }
 0x618   : > { %13942 = vst [vmem:[#allocation99_spill] sm:$0xff] %v12232_v51  ;;  %13944 = vst [vmem:[#allocation93_spill] sm:$0xff] %v12236_v12  ;;  %v12244_v63 = vmul.f32 %v12181_v41, %v13946_v28  ;;  %v13948_v47 = vld [vmem:[#allocation35_spill] sm:$0xff]  ;;  %v13965_v39 = vld [vmem:[#allocation52_spill] sm:$0xff] }
 0x619   : > { %8693 = vmatpush3.bf16.msra.mxu1 %v9752_v42  ;;  %13945 = vst [vmem:[#allocation98_spill] sm:$0xff] %v12238_v18  ;;  %v12248_v56 = vmul.f32 %v12183_v53, %v13948_v47  ;;  %v13950_v42 = vld [vmem:[#allocation44_spill] sm:$0xff]  ;;  %13959 = vst [vmem:[#allocation69_spill] sm:$0xff] %v12273_v48  ;;  %v12275_v37 = vld [vmem:[#allocation2 + $0xcf] sm:$0xff]  ;;  %v12289_v23 = vmul.f32 %v12218_v32, %v13965_v39 }
 0x61a   : > { %8694 = vmatprep.subr.bf16.mxu1 %v9753_v26  ;;  %13947 = vst [vmem:[#allocation108_spill] sm:$0xff] %v12244_v63  ;;  %v12252_v0 = vmul.f32 %v12185_v13, %v13950_v42  ;;  %13960 = vst [vmem:[#allocation116_spill] sm:$0xff] %v12275_v37  ;;  %v13963_v51 = vld [vmem:[#allocation47_spill] sm:$0xff]  ;;  %v12293_v46 = vld [vmem:[#allocation2 + $0xdf] sm:$0xff] }
 0x61b   : > { %13949 = vst [vmem:[#allocation102_spill] sm:$0xff] %v12248_v56  ;;  %v12285_v1 = vmul.f32 %v12216_v16, %v13963_v51  ;;  %13966 = vst [vmem:[#allocation38_spill] sm:$0xff] %v12289_v23  ;;  %v12291_v11 = vld [vmem:[#allocation2 + $0xd7] sm:$0xff]  ;;  %v13970_v63 = vld [vmem:[#allocation49_spill] sm:$0xff] }
 0x61c   : > { %8663 = vmatmul.mubr.bf16.gmra.mrb[8].mxu1 %v4389_v6  ;;  %13951 = vst [vmem:[#allocation105_spill] sm:$0xff] %v12252_v0  ;;  %v12256_v6 = vld [vmem:[#allocation2 + $0xb7] sm:$0xff]  ;;  %13967 = vst [vmem:[#allocation39_spill] sm:$0xff] %v12291_v11  ;;  %v12301_v56 = vmul.f32 %v12234_v34, %v13970_v63  ;;  %v12311_v39 = vld [vmem:[#allocation2 + $0xef] sm:$0xff] }
 0x61d   : > { %8666 = vmatprep.mubr.bf16.mxu1 %v4390_v31  ;;  %8695 = vmatpush3.bf16.msra.mxu1 %v9753_v26  ;;  %v12254_v26 = vld [vmem:[#allocation2 + $0xaf] sm:$0xff]  ;;  %13953 = vst [vmem:[#allocation114_spill] sm:$0xff] %v12256_v6  ;;  %13964 = vst [vmem:[#allocation37_spill] sm:$0xff] %v12285_v1  ;;  %v13987_v1 = vld [vmem:[#allocation60_spill] sm:$0xff] }
 0x61e   : > { %8696 = vmatprep.subr.bf16.mxu1 %v9754_v25  ;;  %13952 = vst [vmem:[#allocation110_spill] sm:$0xff] %v12254_v26  ;;  %v13961_v31 = vld [vmem:[#allocation50_spill] sm:$0xff]  ;;  %13968 = vst [vmem:[#allocation40_spill] sm:$0xff] %v12293_v46  ;;  %v13974_v51 = vld [vmem:[#allocation51_spill] sm:$0xff]  ;;  %v12341_v23 = vmul.f32 %v12275_v37, %v13987_v1 }
 0x61f   : > { %v12281_v30 = vmul.f32 %v12214_v20, %v13961_v31  ;;  %13971 = vst [vmem:[#allocation42_spill] sm:$0xff] %v12301_v56  ;;  %v13972_v20 = vld [vmem:[#allocation54_spill] sm:$0xff]  ;;  %v12309_v32 = vmul.f32 %v12238_v18, %v13974_v51  ;;  %13976 = vst [vmem:[#allocation44_spill] sm:$0xff] %v12311_v39  ;;  %v13995_v1 = vld [vmem:[#allocation64_spill] sm:$0xff] }
 0x620   : > { %v12305_v16 = vmul.f32 %v12236_v12, %v13972_v20  ;;  %v13980_v12 = vld [vmem:[#allocation53_spill] sm:$0xff]  ;;  %v13983_v51 = vld [vmem:[#allocation58_spill] sm:$0xff]  ;;  %13988 = vst [vmem:[#allocation130_spill] sm:$0xff] %v12341_v23 }
 0x621   : > { %8697 = vmatpush3.bf16.msra.mxu1 %v9754_v25  ;;  %13962 = vst [vmem:[#allocation70_spill] sm:$0xff] %v12281_v30  ;;  %13975 = vst [vmem:[#allocation35_spill] sm:$0xff] %v12309_v32  ;;  %v12325_v20 = vmul.f32 %v12256_v6, %v13980_v12  ;;  %v13989_v30 = vld [vmem:[#allocation57_spill] sm:$0xff]  ;;  %v13991_v18 = vld [vmem:[#allocation62_spill] sm:$0xff] }
 0x622   : > { %8698 = vmatprep.subr.bf16.mxu1 %v9755_v21  ;;  %13973 = vst [vmem:[#allocation43_spill] sm:$0xff] %v12305_v16  ;;  %v12347_v6 = vmul.f32 %v12291_v11, %v13989_v30  ;;  %v12351_v56 = vmul.f32 %v12293_v46, %v13991_v18  ;;  %v13993_v16 = vld [vmem:[#allocation59_spill] sm:$0xff]  ;;  %v13997_v32 = vld [vmem:[#allocation61_spill] sm:$0xff]  ;;  %v13999_v11 = vld [vmem:[#allocation66_spill] sm:$0xff] }
 0x623   : > { %13981 = vst [vmem:[#allocation126_spill] sm:$0xff] %v12325_v20  ;;  %v12379_v23 = vld [vmem:[#allocation2 + $0x19] sm:$0xff]  ;;  %v12381_v20 = vld [vmem:[#allocation2 + $0x21] sm:$0xff] }
 0x624   : > { %8667 = vmatmul.mubr.bf16.gmra.mrb[12].mxu1 %v4391_v52  ;;  %13990 = vst [vmem:[#allocation131_spill] sm:$0xff] %v12347_v6  ;;  %13992 = vst [vmem:[#allocation132_spill] sm:$0xff] %v12351_v56  ;;  %v4396_v6 = vpack.c.bf16 %v12069_v54, %v12064_v15  ;;  %v12389_v56 = vld [vmem:[#allocation2 + $0x31] sm:$0xff]  ;;  %v12393_v37 = vld [vmem:[#allocation2 + $0x41] sm:$0xff]  ;;  %v4397_v15 = vpack.c.bf16 %v12083_v44, %v12078_v19  ;;  %v4398_v54 = vpack.c.bf16 %v12093_v62, %v12088_v55 }
 0x625   : > { %8670 = vmatprep.mubr.bf16.mxu1 %v4392_v60  ;;  %8699 = vmatpush3.bf16.msra.mxu1 %v9755_v21  ;;  %v13954_v21 = vld [vmem:[#allocation48_spill] sm:$0xff]  ;;  %v13956_v60 = vld [vmem:[#allocation45_spill] sm:$0xff]  ;;  %14001 = vst [vmem:[#allocation135_spill] sm:$0xff] %v12379_v23  ;;  %14002 = vst [vmem:[#allocation136_spill] sm:$0xff] %v12381_v20 }
 0x626   : > { %8700 = vmatprep.subr.bf16.mxu1 %v9756_v7  ;;  %v12264_v52 = vmul.f32 %v12198_v22, %v13954_v21  ;;  %v12268_v14 = vmul.f32 %v12200_v24, %v13956_v60  ;;  %v12295_v24 = vld [vmem:[#allocation2 + $0xe7] sm:$0xff]  ;;  %v12313_v22 = vld [vmem:[#allocation2 + $0xf7] sm:$0xff]  ;;  %14004 = vst [vmem:[#allocation138_spill] sm:$0xff] %v12389_v56  ;;  %14006 = vst [vmem:[#allocation140_spill] sm:$0xff] %v12393_v37 }
 0x627   : > { %13969 = vst [vmem:[#allocation41_spill] sm:$0xff] %v12295_v24  ;;  %13977 = vst [vmem:[#allocation48_spill] sm:$0xff] %v12313_v22  ;;  %v14018_v44 = vld [vmem:[#allocation67_spill] sm:$0xff]  ;;  %v14020_v62 = vld [vmem:[#allocation72_spill] sm:$0xff] }
 0x628   : > { %13955 = vst [vmem:[#allocation104_spill] sm:$0xff] %v12264_v52  ;;  %13957 = vst [vmem:[#allocation109_spill] sm:$0xff] %v12268_v14  ;;  %v13978_v52 = vld [vmem:[#allocation56_spill] sm:$0xff]  ;;  %v13985_v14 = vld [vmem:[#allocation55_spill] sm:$0xff] }
 0x629   : > { %8701 = vmatpush3.bf16.msra.mxu1 %v9756_v7  ;;  %v12271_v7 = vld [vmem:[#allocation2 + $0xbf] sm:$0xff]  ;;  %v12321_v34 = vmul.f32 %v12254_v26, %v13978_v52  ;;  %v12337_v0 = vmul.f32 %v12273_v48, %v13985_v14  ;;  %v4257_v48 = vld [vmem:[#allocation2 + $0xf] sm:$0xff] }
 0x62a   : > { %8734 = vmatprep.subr.bf16.mxu1 %v12196_v2  ;;  %13958 = vst [vmem:[#allocation119_spill] sm:$0xff] %v12271_v7  ;;  %v12333_v25 = vmul.f32 %v12271_v7, %v13983_v51  ;;  %v12355_v7 = vmul.f32 %v12295_v24, %v13993_v16  ;;  %v4256_v16 = vld [vmem:[#allocation2 + $0x7] sm:$0xff]  ;;  %v12409_v46 = vmul.f32 %v4257_v48, %v13924_v9  ;;  %v12461_v18 = vld [vmem:[#allocation2 + $0x99] sm:$0xff] }
 0x62b   : > { %13979 = vst [vmem:[#allocation45_spill] sm:$0xff] %v12321_v34  ;;  %13986 = vst [vmem:[#allocation129_spill] sm:$0xff] %v12337_v0  ;;  %v12367_v34 = vmul.f32 %v12313_v22, %v13997_v32  ;;  %v4395_v0 = vpack.c.bf16 %v12059_v4, %v12054_v29  ;;  %v12396_v29 = vmul.f32 %v4256_v16, %v13922_v49  ;;  %v12398_v4 = vld [vmem:[#allocation2 + $0x49] sm:$0xff]  ;;  %v14012_v49 = vld [vmem:[#allocation65_spill] sm:$0xff] }
 0x62c   : > { %8671 = vmatmul.mubr.bf16.gmra.mrb[16].mxu1 %v4393_v40  ;;  %v12327_v40 = vld [vmem:[#allocation2 + $0xff] sm:$0xff]  ;;  %13984 = vst [vmem:[#allocation128_spill] sm:$0xff] %v12333_v25  ;;  %13994 = vst [vmem:[#allocation133_spill] sm:$0xff] %v12355_v7  ;;  %v12383_v25 = vld [vmem:[#allocation2 + $0x29] sm:$0xff]  ;;  %v12433_v48 = vmul.f32 %v12389_v56, %v14020_v62 }
 0x62d   : > { %8674 = vmatprep.mubr.bf16.mxu1 %v4394_v38  ;;  %13982 = vst [vmem:[#allocation127_spill] sm:$0xff] %v12327_v40  ;;  %v12363_v38 = vmul.f32 %v12311_v39, %v13995_v1  ;;  %13998 = vst [vmem:[#allocation61_spill] sm:$0xff] %v12367_v34  ;;  %v12373_v24 = vmul.f32 %v12327_v40, %v13999_v11  ;;  %v12391_v40 = vld [vmem:[#allocation2 + $0x39] sm:$0xff]  ;;  %v12400_v7 = vld [vmem:[#allocation2 + $0x51] sm:$0xff]  ;;  %v12417_v34 = vmul.f32 %v12379_v23, %v14012_v49 }
 0x62e   : > { %14003 = vst [vmem:[#allocation137_spill] sm:$0xff] %v12383_v25  ;;  %14005 = vst [vmem:[#allocation139_spill] sm:$0xff] %v12391_v40  ;;  %v12413_v16 = vld [vmem:[#allocation2 + $0x69] sm:$0xff]  ;;  %v14016_v22 = vld [vmem:[#allocation73_spill] sm:$0xff]  ;;  %v12429_v55 = vmul.f32 %v12383_v25, %v14018_v44 }
 0x62f   : > { %13996 = vst [vmem:[#allocation134_spill] sm:$0xff] %v12363_v38  ;;  %14000 = vst [vmem:[#allocation66_spill] sm:$0xff] %v12373_v24  ;;  %v12402_v38 = vld [vmem:[#allocation2 + $0x59] sm:$0xff]  ;;  %v12419_v24 = vld [vmem:[#allocation2 + $0x71] sm:$0xff]  ;;  %v12425_v19 = vmul.f32 %v12381_v20, %v14016_v22 }
 0x630   : > { %14007 = vst [vmem:[#allocation141_spill] sm:$0xff] %v12398_v4  ;;  %14008 = vst [vmem:[#allocation142_spill] sm:$0xff] %v12400_v7  ;;  %v14022_v9 = vld [vmem:[#allocation78_spill] sm:$0xff]  ;;  %v12443_v1 = vld [vmem:[#allocation2 + $0x91] sm:$0xff] }
 0x631   : > { %14009 = vst [vmem:[#allocation143_spill] sm:$0xff] %v12402_v38  ;;  %14011 = vst [vmem:[#allocation145_spill] sm:$0xff] %v12413_v16  ;;  %v12437_v23 = vmul.f32 %v12391_v40, %v14022_v9  ;;  %v12439_v49 = vld [vmem:[#allocation2 + $0x81] sm:$0xff]  ;;  %v12441_v39 = vld [vmem:[#allocation2 + $0x89] sm:$0xff] }
 0x632   : > { %14013 = vst [vmem:[#allocation146_spill] sm:$0xff] %v12417_v34  ;;  %14014 = vst [vmem:[#allocation147_spill] sm:$0xff] %v12419_v24  ;;  %v14027_v20 = vld [vmem:[#allocation75_spill] sm:$0xff]  ;;  %v14029_v25 = vld [vmem:[#allocation82_spill] sm:$0xff] }
 0x633   : > { %14017 = vst [vmem:[#allocation149_spill] sm:$0xff] %v12425_v19  ;;  %14019 = vst [vmem:[#allocation150_spill] sm:$0xff] %v12429_v55  ;;  %v12447_v22 = vmul.f32 %v12393_v37, %v14027_v20  ;;  %v12451_v44 = vmul.f32 %v12398_v4, %v14029_v25  ;;  %v14031_v56 = vld [vmem:[#allocation79_spill] sm:$0xff]  ;;  %v14033_v40 = vld [vmem:[#allocation86_spill] sm:$0xff] }
 0x634   : > { %8675 = vmatmul.mubr.bf16.gmra.mrb[20].mxu1 %v4395_v0  ;;  %v12411_v0 = vld [vmem:[#allocation2 + $0x61] sm:$0xff]  ;;  %14021 = vst [vmem:[#allocation151_spill] sm:$0xff] %v12433_v48  ;;  %14023 = vst [vmem:[#allocation152_spill] sm:$0xff] %v12437_v23  ;;  %v12455_v62 = vmul.f32 %v12400_v7, %v14031_v56  ;;  %v12459_v9 = vmul.f32 %v12402_v38, %v14033_v40  ;;  %v12465_v14 = vld [vmem:[#allocation2 + $0xa9] sm:$0xff] }
 0x635   : > { %8678 = vmatprep.mubr.bf16.mxu1 %v4396_v6  ;;  %14010 = vst [vmem:[#allocation144_spill] sm:$0xff] %v12411_v0  ;;  %v12421_v6 = vld [vmem:[#allocation2 + $0x79] sm:$0xff]  ;;  %14024 = vst [vmem:[#allocation153_spill] sm:$0xff] %v12439_v49  ;;  %v12463_v30 = vld [vmem:[#allocation2 + $0xa1] sm:$0xff] }
 0x636   : > { %14015 = vst [vmem:[#allocation148_spill] sm:$0xff] %v12421_v6  ;;  %14025 = vst [vmem:[#allocation154_spill] sm:$0xff] %v12441_v39  ;;  %v14038_v25 = vld [vmem:[#allocation85_spill] sm:$0xff]  ;;  %v14040_v56 = vld [vmem:[#allocation88_spill] sm:$0xff] }
 0x637   : > { %14026 = vst [vmem:[#allocation155_spill] sm:$0xff] %v12443_v1  ;;  %14028 = vst [vmem:[#allocation156_spill] sm:$0xff] %v12447_v22  ;;  %v12473_v7 = vmul.f32 %v12411_v0, %v14038_v25  ;;  %v12477_v38 = vmul.f32 %v12413_v16, %v14040_v56  ;;  %v12479_v40 = vld [vmem:[#allocation2 + $0xb1] sm:$0xff]  ;;  %v12481_v20 = vld [vmem:[#allocation2 + $0xb9] sm:$0xff] }
 0x638   : > { %14030 = vst [vmem:[#allocation157_spill] sm:$0xff] %v12451_v44  ;;  %14032 = vst [vmem:[#allocation158_spill] sm:$0xff] %v12455_v62  ;;  %v14043_v34 = vld [vmem:[#allocation87_spill] sm:$0xff]  ;;  %v14045_v55 = vld [vmem:[#allocation90_spill] sm:$0xff] }
 0x639   : > { %14034 = vst [vmem:[#allocation159_spill] sm:$0xff] %v12459_v9  ;;  %14035 = vst [vmem:[#allocation160_spill] sm:$0xff] %v12461_v18  ;;  %v12489_v4 = vmul.f32 %v12419_v24, %v14043_v34  ;;  %v12493_v48 = vmul.f32 %v12421_v6, %v14045_v55  ;;  %v12495_v19 = vld [vmem:[#allocation2 + $0xc1] sm:$0xff]  ;;  %v12497_v16 = vld [vmem:[#allocation2 + $0xc9] sm:$0xff] }
 0x63a   : > { %14036 = vst [vmem:[#allocation161_spill] sm:$0xff] %v12463_v30  ;;  %14037 = vst [vmem:[#allocation162_spill] sm:$0xff] %v12465_v14  ;;  %v12499_v0 = vld [vmem:[#allocation2 + $0xd1] sm:$0xff]  ;;  %v14050_v23 = vld [vmem:[#allocation89_spill] sm:$0xff] }
 0x63b   : > { %14039 = vst [vmem:[#allocation163_spill] sm:$0xff] %v12473_v7  ;;  %14041 = vst [vmem:[#allocation164_spill] sm:$0xff] %v12477_v38  ;;  %v12505_v37 = vmul.f32 %v12439_v49, %v14050_v23  ;;  %v14052_v44 = vld [vmem:[#allocation92_spill] sm:$0xff]  ;;  %v14054_v22 = vld [vmem:[#allocation91_spill] sm:$0xff] }
 0x63c   : > { %14042 = vst [vmem:[#allocation165_spill] sm:$0xff] %v12481_v20  ;;  %14044 = vst [vmem:[#allocation166_spill] sm:$0xff] %v12489_v4  ;;  %v12509_v62 = vmul.f32 %v12441_v39, %v14052_v44  ;;  %v12513_v6 = vmul.f32 %v12443_v1, %v14054_v22  ;;  %v12515_v24 = vld [vmem:[#allocation2 + $0xd9] sm:$0xff]  ;;  %v12517_v55 = vld [vmem:[#allocation2 + $0xe1] sm:$0xff]  ;;  %8679 = vmatmul.mubr.bf16.gmra.mrb[24].mxu1 %v4397_v15 }
 0x63d   : > { %14046 = vst [vmem:[#allocation167_spill] sm:$0xff] %v12493_v48  ;;  %14047 = vst [vmem:[#allocation168_spill] sm:$0xff] %v12495_v19  ;;  %v12519_v34 = vld [vmem:[#allocation2 + $0xe9] sm:$0xff]  ;;  %v14059_v9 = vld [vmem:[#allocation96_spill] sm:$0xff]  ;;  %8682 = vmatprep.mubr.bf16.mxu1 %v4398_v54 }
 0x63e   : > { %14048 = vst [vmem:[#allocation169_spill] sm:$0xff] %v12497_v16  ;;  %14049 = vst [vmem:[#allocation170_spill] sm:$0xff] %v12499_v0  ;;  %v12525_v7 = vmul.f32 %v12461_v18, %v14059_v9  ;;  %v14061_v49 = vld [vmem:[#allocation95_spill] sm:$0xff]  ;;  %v14063_v44 = vld [vmem:[#allocation100_spill] sm:$0xff] }
 0x63f   : > { %14051 = vst [vmem:[#allocation171_spill] sm:$0xff] %v12505_v37  ;;  %14053 = vst [vmem:[#allocation172_spill] sm:$0xff] %v12509_v62  ;;  %v12529_v39 = vmul.f32 %v12463_v30, %v14061_v49  ;;  %v12533_v1 = vmul.f32 %v12465_v14, %v14063_v44  ;;  %v12535_v22 = vld [vmem:[#allocation2 + $0xf1] sm:$0xff]  ;;  %v12537_v23 = vld [vmem:[#allocation2 + $0xf9] sm:$0xff] }
 0x640   : > { %14055 = vst [vmem:[#allocation173_spill] sm:$0xff] %v12513_v6  ;;  %14056 = vst [vmem:[#allocation174_spill] sm:$0xff] %v12515_v24  ;;  %v14065_v4 = vld [vmem:[#allocation97_spill] sm:$0xff]  ;;  %v14067_v30 = vld [vmem:[#allocation103_spill] sm:$0xff] }
 0x641   : > { %14057 = vst [vmem:[#allocation175_spill] sm:$0xff] %v12517_v55  ;;  %14058 = vst [vmem:[#allocation176_spill] sm:$0xff] %v12519_v34  ;;  %v12545_v18 = vmul.f32 %v12479_v40, %v14065_v4  ;;  %v12549_v49 = vmul.f32 %v12481_v20, %v14067_v30  ;;  %v12551_v15 = vld [vmem:[#allocation2 + $0x101] sm:$0xff]  ;;  %v14069_v48 = vld [vmem:[#allocation107_spill] sm:$0xff] }
 0x642   : > { %14060 = vst [vmem:[#allocation96_spill] sm:$0xff] %v12525_v7  ;;  %14062 = vst [vmem:[#allocation177_spill] sm:$0xff] %v12529_v39  ;;  %v14068_v44 = vld [vmem:[#allocation101_spill] sm:$0xff]  ;;  %v12561_v38 = vmul.f32 %v12497_v16, %v14069_v48  ;;  %v14071_v62 = vld [vmem:[#allocation106_spill] sm:$0xff]  ;;  %v4292_v16 = vmul.f32 %v12163_v45, %v13932_v10  ;;  %v4294_v45 = vmul.f32 %v12167_v17, %v13939_v59 }
 0x643   : > { %14064 = vst [vmem:[#allocation178_spill] sm:$0xff] %v12533_v1  ;;  %14066 = vst [vmem:[#allocation179_spill] sm:$0xff] %v12545_v18  ;;  %v12557_v26 = vmul.f32 %v12495_v19, %v14068_v44  ;;  %v12565_v6 = vmul.f32 %v12499_v0, %v14071_v62  ;;  %v14073_v37 = vld [vmem:[#allocation112_spill] sm:$0xff]  ;;  %v14075_v14 = vld [vmem:[#allocation111_spill] sm:$0xff]  ;;  %v4399_v0 = vpack.c.bf16 %v12107_v35, %v12102_v61 }
 0x644   : > { %14070 = vst [vmem:[#allocation101_spill] sm:$0xff] %v12561_v38  ;;  %v12571_v20 = vmul.f32 %v12515_v24, %v14073_v37  ;;  %v12575_v7 = vmul.f32 %v12517_v55, %v14075_v14  ;;  %v14076_v39 = vld [vmem:[#allocation115_spill] sm:$0xff]  ;;  %v14077_v62 = vld [vmem:[#allocation113_spill] sm:$0xff]  ;;  %v14078_v1 = vld [vmem:[#allocation118_spill] sm:$0xff]  ;;  %v4290_v55 = vmul.f32 %v12152_v50, %v13928_v33  ;;  %v4293_v61 = vmul.f32 %v12165_v57, %v13937_v58 }
 0x645   : > { %14072 = vst [vmem:[#allocation107_spill] sm:$0xff] %v12565_v6  ;;  %v12579_v19 = vmul.f32 %v12519_v34, %v14076_v39  ;;  %v12587_v54 = vmul.f32 %v12535_v22, %v14077_v62  ;;  %v12591_v18 = vmul.f32 %v12537_v23, %v14078_v1  ;;  %v14080_v24 = vld [vmem:[#allocation117_spill] sm:$0xff]  ;;  %v4320_v6 = vpack.c.bf16 %v12409_v46, %v12396_v29  ;;  %v12617_v38 = vld [vmem:[#allocation2 + $0x10f] sm:$0xff]  ;;  %v9760_v17 = vld [vmem:[%s13265_s4 + $0x98] sm:$0xff]  }
 0x646   : > { %14074 = vst [vmem:[#allocation180_spill] sm:$0xff] %v12571_v20  ;;  %v12597_v34 = vmul.f32 %v12551_v15, %v14080_v24  ;;  %8683 = vmatmul.mubr.bf16.gmra.mrb[28].mxu1 %v4399_v0  ;;  %v4291_v20 = vmul.f32 %v12159_v3, %v13930_v27  ;;  %v12615_v35 = vld [vmem:[#allocation2 + $0x107] sm:$0xff]  ;;  %v4322_v29 = vpack.c.bf16 %v4293_v61, %v4292_v16 }
 0x647   : > { %14079 = vst [vmem:[#allocation118_spill] sm:$0xff] %v12591_v18  ;;  %8702 = vmatprep.mubr.bf16.mxu1 %v4320_v6  ;;  %v9758_v46 = vld [vmem:[%s13265_s4 + $0x88] sm:$0xff]   ;;  %v12624_v50 = vmul.f32 %v12615_v35, %v13997_v32  ;;  %v12628_v3 = vmul.f32 %v12617_v38, %v13999_v11  ;;  %v4295_v57 = vmul.f32 %v12169_v43, %v13941_v36  ;;  %v9761_v61 = vld [vmem:[%s13265_s4 + $0xa0] sm:$0xff]  }
 0x648   : > { %v4321_v18 = vpack.c.bf16 %v4291_v20, %v4290_v55  ;;  %v9759_v20 = vld [vmem:[%s13265_s4 + $0x90] sm:$0xff]   ;;  %v4296_v0 = vmul.f32 %v12171_v8, %v13946_v28  ;;  %v4298_v8 = vmul.f32 %v12181_v41, %v13950_v42 }
 0x649   : > { %14081 = vst [vmem:[#allocation117_spill] sm:$0xff] %v12624_v50  ;;  %14082 = vst [vmem:[#allocation181_spill] sm:$0xff] %v12628_v3  ;;  %v4323_v16 = vpack.c.bf16 %v4295_v57, %v4294_v45  ;;  %v12647_v6 = vld [vmem:[#allocation2 + $0x109] sm:$0xff]  ;;  %v12649_v55 = vld [vmem:[#allocation2 + $0x111] sm:$0xff] }
 0x64a   : > { %v12664_v57 = vmul.f32 %v12647_v6, %v14078_v1  ;;  %v12668_v41 = vmul.f32 %v12649_v55, %v14080_v24  ;;  %v14091_v3 = vld [vmem:[#allocation54_spill] sm:$0xff] }
 0x64c   : > { %14085 = vst [vmem:[#allocation182_spill] sm:$0xff] %v12668_v41  ;;  %v14101_v41 = vld [vmem:[#allocation119_spill] sm:$0xff] }
 0x64e   : > { %8703 = vmatmul.mubr.bf16.vlgmr.msra.gmra.mrb[0].mxu1 %v4321_v18  ;;  %v14089_v18 = vld [vmem:[#allocation84_spill] sm:$0xff] }
 0x64f   : > { %8735 = vmatpush3.bf16.msra.mxu1 %v12196_v2  ;;  %8706 = vmatprep.mubr.bf16.mxu1 %v4322_v29  ;;  %v4297_v2 = vmul.f32 %v12173_v5, %v13948_v47  ;;  %v4299_v5 = vmul.f32 %v12183_v53, %v13954_v21  ;;  %v14083_v29 = vld [vmem:[#allocation76_spill] sm:$0xff] }
 0x650   : > { %8736 = vmatprep.subr.bf16.mxu1 %v9758_v46  ;;  %v4301_v45 = vmul.f32 %v14083_v29, %v13961_v31  ;;  %14084 = vst [vmem:[#allocation76_spill] sm:$0xff] %v12664_v57  ;;  %v14088_v29 = vld [vmem:[#allocation52_spill] sm:$0xff]  ;;  %v14095_v57 = vld [vmem:[#allocation93_spill] sm:$0xff] }
 0x651   : > { %v4324_v43 = vpack.c.bf16 %v4297_v2, %v4296_v0  ;;  %v4325_v53 = vpack.c.bf16 %v4299_v5, %v4298_v8  ;;  %v14086_v2 = vld [vmem:[#allocation47_spill] sm:$0xff]  ;;  %v4303_v50 = vmul.f32 %v14089_v18, %v14088_v29  ;;  %v14090_v8 = vld [vmem:[#allocation122_spill] sm:$0xff] }
 0x652   : > { %v4304_v5 = vmul.f32 %v14090_v8, %v13970_v63  ;;  %v14093_v18 = vld [vmem:[#allocation51_spill] sm:$0xff]  ;;  %v4307_v8 = vmul.f32 %v14095_v57, %v13978_v52  ;;  %v14104_v29 = vld [vmem:[#allocation62_spill] sm:$0xff] }
 0x653   : > { %8737 = vmatpush3.bf16.msra.mxu1 %v9758_v46  ;;  %v4300_v46 = vmul.f32 %v12185_v13, %v13956_v60  ;;  %v14092_v13 = vld [vmem:[#allocation123_spill] sm:$0xff] }
 0x654   : > { %8738 = vmatprep.subr.bf16.mxu1 %v9759_v20 }
 0x655   : > { %v4326_v0 = vpack.c.bf16 %v4301_v45, %v4300_v46  ;;  %v4305_v46 = vmul.f32 %v14092_v13, %v14091_v3  ;;  %v14103_v3 = vld [vmem:[#allocation69_spill] sm:$0xff] }
 0x656   : > { %8707 = vmatmul.mubr.bf16.gmra.mrb[4].mxu1 %v4323_v16  ;;  %v14087_v16 = vld [vmem:[#allocation77_spill] sm:$0xff] }
 0x657   : > { %8710 = vmatprep.mubr.bf16.mxu1 %v4324_v43  ;;  %8739 = vmatpush3.bf16.msra.mxu1 %v9759_v20  ;;  %v9762_v20 = vld [vmem:[%s13265_s4 + $0xa8] sm:$0xff]   ;;  %v4302_v43 = vmul.f32 %v14087_v16, %v14086_v2 }
 0x658   : > { %8740 = vmatprep.subr.bf16.mxu1 %v9760_v17 }
 0x659   : > { %v4327_v45 = vpack.c.bf16 %v4303_v50, %v4302_v43  ;;  %v9765_v50 = vld [vmem:[%s13265_s4 + $0xc0] sm:$0xff]   ;;  %v14097_v43 = vld [vmem:[#allocation110_spill] sm:$0xff] }
 0x65b   : > { %8741 = vmatpush3.bf16.msra.mxu1 %v9760_v17  ;;  %v9763_v17 = vld [vmem:[%s13265_s4 + $0xb0] sm:$0xff]  }
 0x65c   : > { %8742 = vmatprep.subr.bf16.mxu1 %v9761_v61 }
 0x65e   : > { %8711 = vmatmul.mubr.bf16.gmra.mrb[8].mxu1 %v4325_v53  ;;  %v4328_v53 = vpack.c.bf16 %v4305_v46, %v4304_v5  ;;  %v4309_v5 = vmul.f32 %v14097_v43, %v13983_v51 }
 0x65f   : > { %8714 = vmatprep.mubr.bf16.mxu1 %v4326_v0  ;;  %8743 = vmatpush3.bf16.msra.mxu1 %v9761_v61  ;;  %v9764_v61 = vld [vmem:[%s13265_s4 + $0xb8] sm:$0xff]   ;;  %v14094_v0 = vld [vmem:[#allocation94_spill] sm:$0xff] }
 0x660   : > { %8744 = vmatprep.subr.bf16.mxu1 %v9762_v20  ;;  %v4306_v16 = vmul.f32 %v14094_v0, %v14093_v18  ;;  %v14100_v0 = vld [vmem:[#allocation60_spill] sm:$0xff]  ;;  %v14102_v18 = vld [vmem:[#allocation57_spill] sm:$0xff] }
 0x661   : > { %v4311_v52 = vmul.f32 %v14101_v41, %v14100_v0  ;;  %v4312_v63 = vmul.f32 %v14103_v3, %v14102_v18  ;;  %v14111_v41 = vld [vmem:[#allocation44_spill] sm:$0xff] }
 0x662   : > { %v4329_v46 = vpack.c.bf16 %v4307_v8, %v4306_v16  ;;  %v14107_v16 = vld [vmem:[#allocation39_spill] sm:$0xff]  ;;  %v4317_v0 = vmul.f32 %v14111_v41, %v13999_v11  ;;  %v14122_v41 = vld [vmem:[#allocation78_spill] sm:$0xff] }
 0x663   : > { %8745 = vmatpush3.bf16.msra.mxu1 %v9762_v20  ;;  %v14096_v20 = vld [vmem:[#allocation98_spill] sm:$0xff]  ;;  %v14118_v11 = vld [vmem:[#allocation67_spill] sm:$0xff] }
 0x664   : > { %8746 = vmatprep.subr.bf16.mxu1 %v9763_v17  ;;  %v4308_v13 = vmul.f32 %v14096_v20, %v13980_v12  ;;  %v14105_v20 = vld [vmem:[#allocation116_spill] sm:$0xff] }
 0x665   : > { %v4313_v12 = vmul.f32 %v14105_v20, %v14104_v29  ;;  %v4836_v20 = vld [vmem:[#allocation2 + $0x11] sm:$0xff] }
 0x666   : > { %8715 = vmatmul.mubr.bf16.gmra.mrb[12].mxu1 %v4327_v45  ;;  %v14098_v45 = vld [vmem:[#allocation55_spill] sm:$0xff] }
 0x667   : > { %8718 = vmatprep.mubr.bf16.mxu1 %v4328_v53  ;;  %8747 = vmatpush3.bf16.msra.mxu1 %v9763_v17  ;;  %v4330_v17 = vpack.c.bf16 %v4309_v5, %v4308_v13  ;;  %v14099_v53 = vld [vmem:[#allocation114_spill] sm:$0xff]  ;;  %v4332_v43 = vpack.c.bf16 %v4313_v12, %v4312_v63  ;;  %v14108_v13 = vld [vmem:[#allocation64_spill] sm:$0xff]  ;;  %v14112_v12 = vld [vmem:[#allocation63_spill] sm:$0xff] }
 0x668   : > { %8748 = vmatprep.subr.bf16.mxu1 %v9764_v61  ;;  %v4310_v57 = vmul.f32 %v14099_v53, %v14098_v45  ;;  %v14109_v5 = vld [vmem:[#allocation40_spill] sm:$0xff]  ;;  %v14124_v45 = vld [vmem:[#allocation75_spill] sm:$0xff] }
 0x669   : > { %v14113_v63 = vld [vmem:[#allocation48_spill] sm:$0xff] }
 0x66a   : > { %v4331_v2 = vpack.c.bf16 %v4311_v52, %v4310_v57  ;;  %v4318_v52 = vmul.f32 %v14113_v63, %v14112_v12  ;;  %v14115_v57 = vld [vmem:[#allocation127_spill] sm:$0xff] }
 0x66b   : > { %8749 = vmatpush3.bf16.msra.mxu1 %v9764_v61  ;;  %v14106_v61 = vld [vmem:[#allocation59_spill] sm:$0xff] }
 0x66c   : > { %8782 = vmatprep.subr.bf16.mxu1 %v9765_v50  ;;  %v4314_v8 = vmul.f32 %v14107_v16, %v14106_v61  ;;  %v4835_v16 = vld [vmem:[#allocation2 + $0x9] sm:$0xff]  ;;  %v14116_v61 = vld [vmem:[#allocation73_spill] sm:$0xff] }
 0x66e   : > { %8719 = vmatmul.mubr.bf16.gmra.mrb[16].mxu1 %v4329_v46  ;;  %v4315_v46 = vmul.f32 %v14109_v5, %v14108_v13  ;;  %v4868_v5 = vmul.f32 %v4836_v20, %v14116_v61  ;;  %v14117_v13 = vld [vmem:[#allocation65_spill] sm:$0xff]  ;;  %v9766_v20 = vld [vmem:[%s13265_s4 + $0xc8] sm:$0xff]  }
 0x66f   : > { %8722 = vmatprep.mubr.bf16.mxu1 %v4330_v17  ;;  %v14110_v17 = vld [vmem:[#allocation41_spill] sm:$0xff]  ;;  %v4867_v29 = vmul.f32 %v4835_v16, %v14117_v13 }
 0x670   : > { %v4316_v53 = vmul.f32 %v14110_v17, %v13997_v32  ;;  %v4333_v3 = vpack.c.bf16 %v4315_v46, %v4314_v8  ;;  %v14120_v46 = vld [vmem:[#allocation72_spill] sm:$0xff] }
 0x671   : > { %v4899_v17 = vpack.c.bf16 %v4868_v5, %v4867_v29  ;;  %v14128_v5 = vld [vmem:[#allocation79_spill] sm:$0xff] }
 0x672   : > { %v4334_v18 = vpack.c.bf16 %v4317_v0, %v4316_v53  ;;  %v14119_v0 = vld [vmem:[#allocation135_spill] sm:$0xff] }
 0x673   : > { %v4869_v8 = vmul.f32 %v14119_v0, %v14118_v11  ;;  %v9767_v0 = vld [vmem:[%s13265_s4 + $0xd0] sm:$0xff]  }
 0x676   : > { %8723 = vmatmul.mubr.bf16.gmra.mrb[20].mxu1 %v4331_v2  ;;  %v14114_v2 = vld [vmem:[#allocation68_spill] sm:$0xff] }
 0x677   : > { %8726 = vmatprep.mubr.bf16.mxu1 %v4332_v43  ;;  %v4319_v43 = vmul.f32 %v14115_v57, %v14114_v2  ;;  %v14125_v57 = vld [vmem:[#allocation138_spill] sm:$0xff] }
 0x678   : > { %v4872_v51 = vmul.f32 %v14125_v57, %v14124_v45  ;;  %v14133_v57 = vld [vmem:[#allocation143_spill] sm:$0xff] }
 0x679   : > { %v4335_v32 = vpack.c.bf16 %v4319_v43, %v4318_v52  ;;  %v14126_v52 = vld [vmem:[#allocation82_spill] sm:$0xff]  ;;  %v14127_v43 = vld [vmem:[#allocation139_spill] sm:$0xff] }
 0x67a   : > { %v4873_v16 = vmul.f32 %v14127_v43, %v14126_v52  ;;  %v14134_v43 = vld [vmem:[#allocation87_spill] sm:$0xff] }
 0x67e   : > { %8727 = vmatmul.mubr.bf16.gmra.mrb[24].mxu1 %v4333_v3  ;;  %v14123_v3 = vld [vmem:[#allocation137_spill] sm:$0xff] }
 0x67f   : > { %8730 = vmatprep.mubr.bf16.mxu1 %v4334_v18  ;;  %v14121_v18 = vld [vmem:[#allocation136_spill] sm:$0xff]  ;;  %v4871_v63 = vmul.f32 %v14123_v3, %v14122_v41  ;;  %v14132_v3 = vld [vmem:[#allocation142_spill] sm:$0xff] }
 0x680   : > { %v4870_v53 = vmul.f32 %v14121_v18, %v14120_v46  ;;  %v14131_v18 = vld [vmem:[#allocation141_spill] sm:$0xff] }
 0x681   : > { %v4901_v29 = vpack.c.bf16 %v4872_v51, %v4871_v63  ;;  %v4876_v51 = vmul.f32 %v14132_v3, %v14038_v25  ;;  %v14138_v25 = vld [vmem:[#allocation89_spill] sm:$0xff] }
 0x682   : > { %v4900_v31 = vpack.c.bf16 %v4870_v53, %v4869_v8  ;;  %v14130_v8 = vld [vmem:[#allocation86_spill] sm:$0xff] }
 0x683   : > { %v4875_v53 = vmul.f32 %v14131_v18, %v14130_v8  ;;  %v14139_v8 = vld [vmem:[#allocation147_spill] sm:$0xff] }
 0x685   : > { %v4903_v63 = vpack.c.bf16 %v4876_v51, %v4875_v53  ;;  %v4880_v53 = vmul.f32 %v14139_v8, %v14138_v25  ;;  %v9771_v8 = vld [vmem:[%s13265_s4 + $0xf0] sm:$0xff]  }
 0x686   : > { %8731 = vmatmul.mubr.bf16.gmra.mrb[28].mxu1 %v4335_v32  ;;  %v14129_v32 = vld [vmem:[#allocation140_spill] sm:$0xff]  ;;  %v14146_v25 = vld [vmem:[#allocation155_spill] sm:$0xff] }
 0x687   : > { %8750 = vmatprep.mubr.bf16.mxu1 %v4899_v17  ;;  %v4874_v17 = vmul.f32 %v14129_v32, %v14128_v5  ;;  %v14135_v32 = vld [vmem:[#allocation144_spill] sm:$0xff] }
 0x688   : > { %v4878_v18 = vmul.f32 %v14135_v32, %v14134_v43  ;;  %v14142_v43 = vld [vmem:[#allocation91_spill] sm:$0xff] }
 0x68e   : > { %8751 = vmatmul.mubr.bf16.vlgmr.msra.gmra.mrb[0].mxu1 %v4900_v31  ;;  %v4902_v31 = vpack.c.bf16 %v4874_v17, %v4873_v16  ;;  %v14136_v16 = vld [vmem:[#allocation90_spill] sm:$0xff]  ;;  %v14137_v17 = vld [vmem:[#allocation145_spill] sm:$0xff] }
 0x68f   : > { %8783 = vmatpush3.bf16.msra.mxu1 %v9765_v50  ;;  %8754 = vmatprep.mubr.bf16.mxu1 %v4901_v29  ;;  %v9768_v50 = vld [vmem:[%s13265_s4 + $0xd8] sm:$0xff]   ;;  %v4877_v29 = vmul.f32 %v14133_v57, %v14040_v56  ;;  %v4879_v3 = vmul.f32 %v14137_v17, %v14136_v16  ;;  %v14143_v56 = vld [vmem:[#allocation153_spill] sm:$0xff] }
 0x690   : > { %8784 = vmatprep.subr.bf16.mxu1 %v9766_v20  ;;  %v14141_v57 = vld [vmem:[#allocation148_spill] sm:$0xff]  ;;  %v4882_v17 = vmul.f32 %v14143_v56, %v14142_v43  ;;  %v14149_v43 = vld [vmem:[#allocation161_spill] sm:$0xff] }
 0x691   : > { %v4904_v51 = vpack.c.bf16 %v4878_v18, %v4877_v29  ;;  %v14145_v18 = vld [vmem:[#allocation95_spill] sm:$0xff]  ;;  %v14147_v56 = vld [vmem:[#allocation100_spill] sm:$0xff] }
 0x693   : > { %8785 = vmatpush3.bf16.msra.mxu1 %v9766_v20  ;;  %v9769_v20 = vld [vmem:[%s13265_s4 + $0xe0] sm:$0xff]  }
 0x694   : > { %8786 = vmatprep.subr.bf16.mxu1 %v9767_v0 }
 0x696   : > { %8755 = vmatmul.mubr.bf16.gmra.mrb[4].mxu1 %v4902_v31  ;;  %v4905_v31 = vpack.c.bf16 %v4880_v53, %v4879_v3  ;;  %v4884_v3 = vmul.f32 %v14146_v25, %v14145_v18  ;;  %v9773_v25 = vld [vmem:[%s13265_s4 + $0x100] sm:$0xff]  }
 0x697   : > { %8758 = vmatprep.mubr.bf16.mxu1 %v4903_v63  ;;  %8787 = vmatpush3.bf16.msra.mxu1 %v9767_v0  ;;  %v9770_v0 = vld [vmem:[%s13265_s4 + $0xe8] sm:$0xff]   ;;  %v14140_v63 = vld [vmem:[#allocation92_spill] sm:$0xff] }
 0x698   : > { %8788 = vmatprep.subr.bf16.mxu1 %v9768_v50  ;;  %v4881_v32 = vmul.f32 %v14141_v57, %v14140_v63 }
 0x69a   : > { %v4906_v53 = vpack.c.bf16 %v4882_v17, %v4881_v32  ;;  %v4888_v17 = vmul.f32 %v12479_v40, %v14068_v44 }
 0x69b   : > { %8789 = vmatpush3.bf16.msra.mxu1 %v9768_v50  ;;  %v14144_v50 = vld [vmem:[#allocation154_spill] sm:$0xff] }
 0x69c   : > { %8790 = vmatprep.subr.bf16.mxu1 %v9769_v20  ;;  %v4883_v29 = vmul.f32 %v14144_v50, %v14059_v9  ;;  %v4886_v50 = vmul.f32 %v14149_v43, %v14065_v4  ;;  %v14154_v4 = vld [vmem:[#allocation169_spill] sm:$0xff] }
 0x69e   : > { %8759 = vmatmul.mubr.bf16.gmra.mrb[8].mxu1 %v4904_v51  ;;  %v4907_v51 = vpack.c.bf16 %v4884_v3, %v4883_v29  ;;  %v14151_v3 = vld [vmem:[#allocation165_spill] sm:$0xff] }
 0x69f   : > { %8762 = vmatprep.mubr.bf16.mxu1 %v4905_v31  ;;  %8791 = vmatpush3.bf16.msra.mxu1 %v9769_v20  ;;  %v9772_v20 = vld [vmem:[%s13265_s4 + $0xf8] sm:$0xff]   ;;  %v4889_v43 = vmul.f32 %v14151_v3, %v14069_v48 }
 0x6a0   : > { %8792 = vmatprep.subr.bf16.mxu1 %v9770_v0  ;;  %v14148_v31 = vld [vmem:[#allocation160_spill] sm:$0xff] }
 0x6a1   : > { %v4885_v57 = vmul.f32 %v14148_v31, %v14147_v56  ;;  %v4891_v56 = vmul.f32 %v14154_v4, %v14073_v37  ;;  %v14213_v37 = vld [vmem:[#allocation152_spill] sm:$0xff] }
 0x6a3   : > { %8793 = vmatpush3.bf16.msra.mxu1 %v9770_v0  ;;  %v14150_v0 = vld [vmem:[#allocation162_spill] sm:$0xff]  ;;  %v4908_v29 = vpack.c.bf16 %v4886_v50, %v4885_v57  ;;  %v14157_v50 = vld [vmem:[#allocation175_spill] sm:$0xff] }
 0x6a4   : > { %8794 = vmatprep.subr.bf16.mxu1 %v9771_v8  ;;  %v4887_v32 = vmul.f32 %v14150_v0, %v14067_v30  ;;  %v14155_v0 = vld [vmem:[#allocation170_spill] sm:$0xff] }
 0x6a5   : > { %v4892_v30 = vmul.f32 %v14155_v0, %v14075_v14  ;;  %v14162_v0 = vld [vmem:[#allocation71_spill] sm:$0xff]  ;;  %v14212_v14 = vld [vmem:[#allocation156_spill] sm:$0xff] }
 0x6a6   : > { %8763 = vmatmul.mubr.bf16.gmra.mrb[12].mxu1 %v4906_v53  ;;  %v14152_v53 = vld [vmem:[#allocation106_spill] sm:$0xff] }
 0x6a7   : > { %8766 = vmatprep.mubr.bf16.mxu1 %v4907_v51  ;;  %8795 = vmatpush3.bf16.msra.mxu1 %v9771_v8  ;;  %v4909_v8 = vpack.c.bf16 %v4888_v17, %v4887_v32  ;;  %v14153_v51 = vld [vmem:[#allocation168_spill] sm:$0xff]  ;;  %v4911_v40 = vpack.c.bf16 %v4892_v30, %v4891_v56  ;;  %v4894_v32 = vmul.f32 %v14157_v50, %v14077_v62  ;;  %v14207_v62 = vld [vmem:[#allocation146_spill] sm:$0xff] }
 0x6a8   : > { %8796 = vmatprep.subr.bf16.mxu1 %v9772_v20  ;;  %v4890_v31 = vmul.f32 %v14153_v51, %v14152_v53  ;;  %v14158_v17 = vld [vmem:[#allocation176_spill] sm:$0xff]  ;;  %v14214_v53 = vpack.c.bf16 %v14212_v14, %v14213_v37  ;;  %v9793_v37 = vld [vmem:[%s13265_s4 + $0x1a0] sm:$0xff]   ;;  %v9794_v14 = vld [vmem:[%s13265_s4 + $0x1a8] sm:$0xff]  }
 0x6aa   : > { %v4910_v18 = vpack.c.bf16 %v4890_v31, %v4889_v43  ;;  %v14159_v43 = vld [vmem:[#allocation121_spill] sm:$0xff]  ;;  %v14161_v31 = vld [vmem:[#allocation74_spill] sm:$0xff] }
 0x6ab   : > { %8797 = vmatpush3.bf16.msra.mxu1 %v9772_v20  ;;  %v14156_v20 = vld [vmem:[#allocation174_spill] sm:$0xff]  ;;  %v4897_v30 = vmul.f32 %v12537_v23, %v14159_v43  ;;  %v14168_v23 = vld [vmem:[#allocation83_spill] sm:$0xff] }
 0x6ac   : > { %8830 = vmatprep.subr.bf16.mxu1 %v9773_v25  ;;  %v4893_v57 = vmul.f32 %v14156_v20, %v14076_v39 }
 0x6ae   : > { %8767 = vmatmul.mubr.bf16.gmra.mrb[16].mxu1 %v4908_v29  ;;  %v4895_v29 = vmul.f32 %v14158_v17, %v14078_v1  ;;  %v4912_v4 = vpack.c.bf16 %v4894_v32, %v4893_v57  ;;  %v14165_v1 = vld [vmem:[#allocation80_spill] sm:$0xff]  ;;  %v14170_v17 = vld [vmem:[#allocation99_spill] sm:$0xff] }
 0x6af   : > { %8770 = vmatprep.mubr.bf16.mxu1 %v4909_v8  ;;  %v4896_v8 = vmul.f32 %v12535_v22, %v14080_v24  ;;  %v9774_v22 = vld [vmem:[%s13265_s4 + $0x108] sm:$0xff]   ;;  %v14164_v24 = vld [vmem:[#allocation81_spill] sm:$0xff]  ;;  %v14167_v57 = vld [vmem:[#allocation124_spill] sm:$0xff] }
 0x6b0   : > { %v14166_v20 = vpack.c.bf16 %v14164_v24, %v14165_v1  ;;  %v14169_v50 = vpack.c.bf16 %v14167_v57, %v14168_v23  ;;  %v9776_v32 = vld [vmem:[%s13265_s4 + $0x118] sm:$0xff]   ;;  %v9779_v1 = vld [vmem:[%s13265_s4 + $0x130] sm:$0xff]   ;;  %v14182_v57 = vld [vmem:[#allocation38_spill] sm:$0xff] }
 0x6b1   : > { %v4913_v3 = vpack.c.bf16 %v4896_v8, %v4895_v29  ;;  %v14171_v29 = vld [vmem:[#allocation125_spill] sm:$0xff] }
 0x6b2   : > { %v14172_v8 = vpack.c.bf16 %v14170_v17, %v14171_v29  ;;  %v14183_v23 = vld [vmem:[#allocation37_spill] sm:$0xff] }
 0x6b3   : > { %v9781_v29 = vld [vmem:[%s13265_s4 + $0x140] sm:$0xff]  }
 0x6b6   : > { %8771 = vmatmul.mubr.bf16.gmra.mrb[20].mxu1 %v4910_v18  ;;  %v14160_v18 = vld [vmem:[#allocation120_spill] sm:$0xff] }
 0x6b7   : > { %8774 = vmatprep.mubr.bf16.mxu1 %v4911_v40  ;;  %v4898_v56 = vmul.f32 %v12551_v15, %v14160_v18  ;;  %v14163_v40 = vpack.c.bf16 %v14161_v31, %v14162_v0  ;;  %v9775_v15 = vld [vmem:[%s13265_s4 + $0x110] sm:$0xff]   ;;  %v14177_v31 = vld [vmem:[#allocation105_spill] sm:$0xff] }
 0x6b9   : > { %v4914_v51 = vpack.c.bf16 %v4898_v56, %v4897_v30  ;;  %v9777_v30 = vld [vmem:[%s13265_s4 + $0x120] sm:$0xff]   ;;  %v9778_v56 = vld [vmem:[%s13265_s4 + $0x128] sm:$0xff]  }
 0x6be   : > { %8775 = vmatmul.mubr.bf16.gmra.mrb[24].mxu1 %v4912_v4  ;;  %v14174_v4 = vld [vmem:[#allocation108_spill] sm:$0xff] }
 0x6bf   : > { %8778 = vmatprep.mubr.bf16.mxu1 %v4913_v3 }
 0x6c6   : > { %8779 = vmatmul.mubr.bf16.gmra.mrb[28].mxu1 %v4914_v51  ;;  %v14176_v51 = vld [vmem:[#allocation104_spill] sm:$0xff] }
 0x6c7   : > { %8798 = vmatprep.mubr.bf16.mxu1 %v14163_v40  ;;  %v14178_v0 = vpack.c.bf16 %v14176_v51, %v14177_v31  ;;  %v14179_v40 = vld [vmem:[#allocation70_spill] sm:$0xff]  ;;  %v14195_v31 = vld [vmem:[#allocation129_spill] sm:$0xff] }
 0x6c8   : > { %v14194_v51 = vld [vmem:[#allocation130_spill] sm:$0xff] }
 0x6ce   : > { %8799 = vmatmul.mubr.bf16.vlgmr.msra.gmra.mrb[0].mxu1 %v14166_v20  ;;  %v9780_v20 = vld [vmem:[%s13265_s4 + $0x138] sm:$0xff]  }
 0x6cf   : > { %8831 = vmatpush3.bf16.msra.mxu1 %v9773_v25  ;;  %8802 = vmatprep.mubr.bf16.mxu1 %v14169_v50  ;;  %v14173_v25 = vld [vmem:[#allocation102_spill] sm:$0xff]  ;;  %v14184_v50 = vpack.c.bf16 %v14182_v57, %v14183_v23  ;;  %v14201_v57 = vld [vmem:[#allocation133_spill] sm:$0xff] }
 0x6d0   : > { %8832 = vmatprep.subr.bf16.mxu1 %v9774_v22  ;;  %v14175_v3 = vpack.c.bf16 %v14173_v25, %v14174_v4  ;;  %v14189_v25 = vld [vmem:[#allocation35_spill] sm:$0xff]  ;;  %v14203_v23 = vld [vmem:[#allocation66_spill] sm:$0xff] }
 0x6d3   : > { %8833 = vmatpush3.bf16.msra.mxu1 %v9774_v22  ;;  %v14180_v22 = vld [vmem:[#allocation109_spill] sm:$0xff] }
 0x6d4   : > { %8834 = vmatprep.subr.bf16.mxu1 %v9775_v15  ;;  %v14181_v24 = vpack.c.bf16 %v14179_v40, %v14180_v22  ;;  %v14197_v40 = vld [vmem:[#allocation132_spill] sm:$0xff]  ;;  %v14198_v22 = vld [vmem:[#allocation131_spill] sm:$0xff] }
 0x6d6   : > { %8803 = vmatmul.mubr.bf16.gmra.mrb[4].mxu1 %v14172_v8  ;;  %v14188_v8 = vld [vmem:[#allocation45_spill] sm:$0xff] }
 0x6d7   : > { %8806 = vmatprep.mubr.bf16.mxu1 %v14175_v3  ;;  %8835 = vmatpush3.bf16.msra.mxu1 %v9775_v15  ;;  %v14185_v15 = vld [vmem:[#allocation43_spill] sm:$0xff]  ;;  %v14190_v4 = vpack.c.bf16 %v14188_v8, %v14189_v25  ;;  %v14191_v3 = vld [vmem:[#allocation128_spill] sm:$0xff]  ;;  %v5512_v25 = vld [vmem:[#allocation2 + $0x20] sm:$0xff] }
 0x6d8   : > { %8836 = vmatprep.subr.bf16.mxu1 %v9776_v32  ;;  %v5511_v8 = vld [vmem:[#allocation2 + $0x18] sm:$0xff] }
 0x6db   : > { %8837 = vmatpush3.bf16.msra.mxu1 %v9776_v32  ;;  %v14186_v32 = vld [vmem:[#allocation42_spill] sm:$0xff] }
 0x6dc   : > { %8838 = vmatprep.subr.bf16.mxu1 %v9777_v30  ;;  %v14187_v17 = vpack.c.bf16 %v14185_v15, %v14186_v32  ;;  %v5235_v32 = vmul.f32 %v12615_v35, %v14112_v12 }
 0x6de   : > { %8807 = vmatmul.mubr.bf16.gmra.mrb[8].mxu1 %v14178_v0  ;;  %v14196_v0 = vpack.c.bf16 %v14194_v51, %v14195_v31  ;;  %v5515_v51 = vld [vmem:[#allocation2 + $0x38] sm:$0xff]  ;;  %v5516_v31 = vld [vmem:[#allocation2 + $0x40] sm:$0xff] }
 0x6df   : > { %8810 = vmatprep.mubr.bf16.mxu1 %v14181_v24  ;;  %8839 = vmatpush3.bf16.msra.mxu1 %v9777_v30  ;;  %v14192_v30 = vld [vmem:[#allocation126_spill] sm:$0xff]  ;;  %v14199_v24 = vpack.c.bf16 %v14197_v40, %v14198_v22  ;;  %v12884_v35 = vpack.c.bf16 %v5516_v31, %v5515_v51  ;;  %v5526_v51 = vld [vmem:[#allocation2 + $0x90] sm:$0xff]  ;;  %v5527_v31 = vld [vmem:[#allocation2 + $0x98] sm:$0xff] }
 0x6e0   : > { %8840 = vmatprep.subr.bf16.mxu1 %v9778_v56  ;;  %v9782_v40 = vld [vmem:[%s13265_s4 + $0x148] sm:$0xff]  }
 0x6e1   : > { %v5517_v22 = vld [vmem:[#allocation2 + $0x48] sm:$0xff] }
 0x6e3   : > { %8841 = vmatpush3.bf16.msra.mxu1 %v9778_v56  ;;  %v14193_v56 = vpack.c.bf16 %v14191_v3, %v14192_v30  ;;  %v5543_v3 = vpack.c.bf16 %v5512_v25, %v5511_v8  ;;  %v5513_v30 = vld [vmem:[#allocation2 + $0x28] sm:$0xff]  ;;  %v5524_v8 = vld [vmem:[#allocation2 + $0x80] sm:$0xff] }
 0x6e4   : > { %8842 = vmatprep.subr.bf16.mxu1 %v9779_v1 }
 0x6e6   : > { %8811 = vmatmul.mubr.bf16.gmra.mrb[12].mxu1 %v14184_v50  ;;  %v14204_v50 = vld [vmem:[#allocation61_spill] sm:$0xff] }
 0x6e7   : > { %8814 = vmatprep.mubr.bf16.mxu1 %v14187_v17  ;;  %8843 = vmatpush3.bf16.msra.mxu1 %v9779_v1  ;;  %v14200_v1 = vld [vmem:[#allocation134_spill] sm:$0xff]  ;;  %v14205_v15 = vpack.c.bf16 %v14203_v23, %v14204_v50  ;;  %v5236_v17 = vmul.f32 %v12617_v38, %v14114_v2  ;;  %v9783_v38 = vld [vmem:[%s13265_s4 + $0x150] sm:$0xff]   ;;  %v9784_v23 = vld [vmem:[%s13265_s4 + $0x158] sm:$0xff]  }
 0x6e8   : > { %8844 = vmatprep.subr.bf16.mxu1 %v9780_v20  ;;  %v9785_v50 = vld [vmem:[%s13265_s4 + $0x160] sm:$0xff]  }
 0x6eb   : > { %8845 = vmatpush3.bf16.msra.mxu1 %v9780_v20  ;;  %v14202_v20 = vpack.c.bf16 %v14200_v1, %v14201_v57  ;;  %v5519_v1 = vld [vmem:[#allocation2 + $0x58] sm:$0xff]  ;;  %v5520_v57 = vld [vmem:[#allocation2 + $0x60] sm:$0xff] }
 0x6ec   : > { %8878 = vmatprep.subr.bf16.mxu1 %v9781_v29 }
 0x6ee   : > { %8815 = vmatmul.mubr.bf16.gmra.mrb[16].mxu1 %v14190_v4  ;;  %v5252_v4 = vpack.c.bf16 %v5236_v17, %v5235_v32  ;;  %v5522_v32 = vld [vmem:[#allocation2 + $0x70] sm:$0xff]  ;;  %v5523_v17 = vld [vmem:[#allocation2 + $0x78] sm:$0xff] }
 0x6ef   : > { %8818 = vmatprep.mubr.bf16.mxu1 %v14193_v56  ;;  %v5514_v56 = vld [vmem:[#allocation2 + $0x30] sm:$0xff] }
 0x6f6   : > { %8819 = vmatmul.mubr.bf16.gmra.mrb[20].mxu1 %v14196_v0  ;;  %v12879_v0 = vpack.c.bf16 %v5514_v56, %v5513_v30  ;;  %v9787_v30 = vld [vmem:[%s13265_s4 + $0x170] sm:$0xff]   ;;  %v5525_v56 = vld [vmem:[#allocation2 + $0x88] sm:$0xff] }
 0x6f7   : > { %8822 = vmatprep.mubr.bf16.mxu1 %v14199_v24  ;;  %v5518_v24 = vld [vmem:[#allocation2 + $0x50] sm:$0xff] }
 0x6fe   : > { %8823 = vmatmul.mubr.bf16.gmra.mrb[24].mxu1 %v14202_v20  ;;  %v12891_v20 = vpack.c.bf16 %v5518_v24, %v5517_v22  ;;  %v9788_v22 = vld [vmem:[%s13265_s4 + $0x178] sm:$0xff]  }
 0x6ff   : > { %8826 = vmatprep.mubr.bf16.mxu1 %v14205_v15  ;;  %v5521_v15 = vld [vmem:[#allocation2 + $0x68] sm:$0xff] }
 0x700   : > { %v12903_v25 = vpack.c.bf16 %v5522_v32, %v5521_v15  ;;  %v5532_v15 = vld [vmem:[#allocation2 + $0xc0] sm:$0xff] }
 0x706   : > { %8827 = vmatmul.mubr.bf16.gmra.mrb[28].mxu1 %v5252_v4  ;;  %v9786_v4 = vld [vmem:[%s13265_s4 + $0x168] sm:$0xff]  }
 0x707   : > { %8846 = vmatprep.mubr.bf16.mxu1 %v5543_v3  ;;  %v12908_v3 = vpack.c.bf16 %v5524_v8, %v5523_v17  ;;  %v5533_v8 = vld [vmem:[#allocation2 + $0xc8] sm:$0xff] }
 0x70e   : > { %8847 = vmatmul.mubr.bf16.vlgmr.msra.gmra.mrb[0].mxu1 %v12879_v0 }
 0x70f   : > { %8879 = vmatpush3.bf16.msra.mxu1 %v9781_v29  ;;  %8850 = vmatprep.mubr.bf16.mxu1 %v12884_v35  ;;  %v12896_v29 = vpack.c.bf16 %v5520_v57, %v5519_v1  ;;  %v9789_v1 = vld [vmem:[%s13265_s4 + $0x180] sm:$0xff]   ;;  %v5529_v57 = vld [vmem:[#allocation2 + $0xa8] sm:$0xff] }
 0x710   : > { %8880 = vmatprep.subr.bf16.mxu1 %v9782_v40 }
 0x713   : > { %8881 = vmatpush3.bf16.msra.mxu1 %v9782_v40  ;;  %v5528_v40 = vld [vmem:[#allocation2 + $0xa0] sm:$0xff] }
 0x714   : > { %8882 = vmatprep.subr.bf16.mxu1 %v9783_v38  ;;  %v12920_v24 = vpack.c.bf16 %v5528_v40, %v5527_v31  ;;  %v5537_v40 = vld [vmem:[#allocation2 + $0xe8] sm:$0xff] }
 0x716   : > { %8851 = vmatmul.mubr.bf16.gmra.mrb[4].mxu1 %v12891_v20 }
 0x717   : > { %8854 = vmatprep.mubr.bf16.mxu1 %v12896_v29  ;;  %8883 = vmatpush3.bf16.msra.mxu1 %v9783_v38  ;;  %v12915_v38 = vpack.c.bf16 %v5526_v51, %v5525_v56  ;;  %v5536_v56 = vld [vmem:[#allocation2 + $0xe0] sm:$0xff] }
 0x718   : > { %8884 = vmatprep.subr.bf16.mxu1 %v9784_v23 }
 0x71b   : > { %8885 = vmatpush3.bf16.msra.mxu1 %v9784_v23  ;;  %v5530_v23 = vld [vmem:[#allocation2 + $0xb0] sm:$0xff] }
 0x71c   : > { %8886 = vmatprep.subr.bf16.mxu1 %v9785_v50  ;;  %v12927_v32 = vpack.c.bf16 %v5530_v23, %v5529_v57  ;;  %v5539_v57 = vld [vmem:[#allocation2 + $0xf8] sm:$0xff]  ;;  %v5540_v23 = vld [vmem:[#allocation2 + $0x100] sm:$0xff] }
 0x71e   : > { %8855 = vmatmul.mubr.bf16.gmra.mrb[8].mxu1 %v12903_v25 }
 0x71f   : > { %8858 = vmatprep.mubr.bf16.mxu1 %v12908_v3  ;;  %8887 = vmatpush3.bf16.msra.mxu1 %v9785_v50  ;;  %v5531_v50 = vld [vmem:[#allocation2 + $0xb8] sm:$0xff] }
 0x720   : > { %8888 = vmatprep.subr.bf16.mxu1 %v9786_v4  ;;  %v12929_v17 = vpack.c.bf16 %v5532_v15, %v5531_v50  ;;  %v12941_v15 = vpack.c.bf16 %v5540_v23, %v5539_v57  ;;  %v14210_v57 = vld [vmem:[#allocation150_spill] sm:$0xff] }
 0x723   : > { %8889 = vmatpush3.bf16.msra.mxu1 %v9786_v4  ;;  %v5534_v4 = vld [vmem:[#allocation2 + $0xd0] sm:$0xff] }
 0x724   : > { %8890 = vmatprep.subr.bf16.mxu1 %v9787_v30  ;;  %v12933_v51 = vpack.c.bf16 %v5534_v4, %v5533_v8  ;;  %v5541_v8 = vld [vmem:[#allocation2 + $0x108] sm:$0xff]  ;;  %v5542_v4 = vld [vmem:[#allocation2 + $0x110] sm:$0xff] }
 0x726   : > { %8859 = vmatmul.mubr.bf16.gmra.mrb[12].mxu1 %v12915_v38 }
 0x727   : > { %8862 = vmatprep.mubr.bf16.mxu1 %v12920_v24  ;;  %8891 = vmatpush3.bf16.msra.mxu1 %v9787_v30  ;;  %v5535_v30 = vld [vmem:[#allocation2 + $0xd8] sm:$0xff] }
 0x728   : > { %8892 = vmatprep.subr.bf16.mxu1 %v9788_v22  ;;  %v12935_v31 = vpack.c.bf16 %v5536_v56, %v5535_v30  ;;  %v12945_v30 = vpack.c.bf16 %v5542_v4, %v5541_v8  ;;  %v14206_v56 = vld [vmem:[#allocation149_spill] sm:$0xff]  ;;  %v9791_v8 = vld [vmem:[%s13265_s4 + $0x190] sm:$0xff]  }
 0x729   : > { %v14208_v39 = vpack.c.bf16 %v14206_v56, %v14207_v62  ;;  %v14215_v62 = vld [vmem:[#allocation158_spill] sm:$0xff]  ;;  %v14216_v4 = vld [vmem:[#allocation157_spill] sm:$0xff] }
 0x72a   : > { %v14217_v56 = vpack.c.bf16 %v14215_v62, %v14216_v4  ;;  %v14224_v62 = vld [vmem:[#allocation171_spill] sm:$0xff] }
 0x72b   : > { %8893 = vmatpush3.bf16.msra.mxu1 %v9788_v22  ;;  %v5538_v22 = vld [vmem:[#allocation2 + $0xf0] sm:$0xff] }
 0x72c   : > { %8926 = vmatprep.subr.bf16.mxu1 %v9789_v1  ;;  %v12939_v50 = vpack.c.bf16 %v5538_v22, %v5537_v40  ;;  %v9790_v40 = vld [vmem:[%s13265_s4 + $0x188] sm:$0xff]   ;;  %v14209_v22 = vld [vmem:[#allocation151_spill] sm:$0xff] }
 0x72d   : > { %v14211_v23 = vpack.c.bf16 %v14209_v22, %v14210_v57  ;;  %v14219_v22 = vld [vmem:[#allocation159_spill] sm:$0xff] }
 0x72e   : > { %8863 = vmatmul.mubr.bf16.gmra.mrb[16].mxu1 %v12927_v32  ;;  %v14225_v4 = vld [vmem:[#allocation167_spill] sm:$0xff] }
 0x72f   : > { %8866 = vmatprep.mubr.bf16.mxu1 %v12929_v17 }
 0x736   : > { %8867 = vmatmul.mubr.bf16.gmra.mrb[20].mxu1 %v12933_v51 }
 0x737   : > { %8870 = vmatprep.mubr.bf16.mxu1 %v12935_v31 }
 0x73e   : > { %8871 = vmatmul.mubr.bf16.gmra.mrb[24].mxu1 %v12939_v50 }
 0x73f   : > { %8874 = vmatprep.mubr.bf16.mxu1 %v12941_v15 }
 0x746   : > { %8875 = vmatmul.mubr.bf16.gmra.mrb[28].mxu1 %v12945_v30 }
 0x747   : > { %8894 = vmatprep.mubr.bf16.mxu1 %v14208_v39  ;;  %v9792_v39 = vld [vmem:[%s13265_s4 + $0x198] sm:$0xff]  }
 0x74e   : > { %8895 = vmatmul.mubr.bf16.vlgmr.msra.gmra.mrb[0].mxu1 %v14211_v23 }
 0x74f   : > { %8927 = vmatpush3.bf16.msra.mxu1 %v9789_v1  ;;  %8898 = vmatprep.mubr.bf16.mxu1 %v14214_v53  ;;  %v14218_v1 = vld [vmem:[#allocation163_spill] sm:$0xff]  ;;  %v14221_v53 = vld [vmem:[#allocation166_spill] sm:$0xff] }
 0x750   : > { %8928 = vmatprep.subr.bf16.mxu1 %v9790_v40  ;;  %v14220_v57 = vpack.c.bf16 %v14218_v1, %v14219_v22  ;;  %v14227_v1 = vld [vmem:[#allocation173_spill] sm:$0xff]  ;;  %v14228_v22 = vld [vmem:[#allocation172_spill] sm:$0xff] }
 0x753   : > { %8929 = vmatpush3.bf16.msra.mxu1 %v9790_v40  ;;  %v14222_v40 = vld [vmem:[#allocation164_spill] sm:$0xff] }
 0x754   : > { %8930 = vmatprep.subr.bf16.mxu1 %v9791_v8  ;;  %v14223_v23 = vpack.c.bf16 %v14221_v53, %v14222_v40  ;;  %v14230_v53 = vld [vmem:[#allocation177_spill] sm:$0xff]  ;;  %v14231_v40 = vld [vmem:[#allocation96_spill] sm:$0xff] }
 0x756   : > { %8899 = vmatmul.mubr.bf16.gmra.mrb[4].mxu1 %v14217_v56  ;;  %v14226_v56 = vpack.c.bf16 %v14224_v62, %v14225_v4  ;;  %v14234_v62 = vld [vmem:[#allocation178_spill] sm:$0xff] }
 0x757   : > { %8902 = vmatprep.mubr.bf16.mxu1 %v14220_v57  ;;  %8931 = vmatpush3.bf16.msra.mxu1 %v9791_v8  ;;  %v9795_v8 = vld [vmem:[%s13265_s4 + $0x1b0] sm:$0xff]   ;;  %v14229_v57 = vpack.c.bf16 %v14227_v1, %v14228_v22  ;;  %v14238_v22 = vld [vmem:[#allocation101_spill] sm:$0xff] }
 0x758   : > { %8932 = vmatprep.subr.bf16.mxu1 %v9792_v39  ;;  %v14237_v1 = vld [vmem:[#allocation107_spill] sm:$0xff] }
 0x75b   : > { %8933 = vmatpush3.bf16.msra.mxu1 %v9792_v39  ;;  %v9796_v39 = vld [vmem:[%s13265_s4 + $0x1b8] sm:$0xff]  }
 0x75c   : > { %8934 = vmatprep.subr.bf16.mxu1 %v9793_v37 }
 0x75e   : > { %8903 = vmatmul.mubr.bf16.gmra.mrb[8].mxu1 %v14223_v23  ;;  %v14232_v23 = vpack.c.bf16 %v14230_v53, %v14231_v40  ;;  %v6155_v40 = vld [vmem:[#allocation2 + $0x27] sm:$0xff] }
 0x75f   : > { %8906 = vmatprep.mubr.bf16.mxu1 %v14226_v56  ;;  %8935 = vmatpush3.bf16.msra.mxu1 %v9793_v37  ;;  %v9797_v37 = vld [vmem:[%s13265_s4 + $0x1c0] sm:$0xff]   ;;  %v14236_v56 = vpack.c.bf16 %v12557_v26, %v12549_v49  ;;  %v5879_v49 = vmul.f32 %v12647_v6, %v14159_v43  ;;  %v5880_v26 = vmul.f32 %v12649_v55, %v14160_v18 }
 0x760   : > { %8936 = vmatprep.subr.bf16.mxu1 %v9794_v14 }
 0x763   : > { %8937 = vmatpush3.bf16.msra.mxu1 %v9794_v14  ;;  %v14233_v14 = vld [vmem:[#allocation179_spill] sm:$0xff] }
 0x764   : > { %8938 = vmatprep.subr.bf16.mxu1 %v9795_v8  ;;  %v14235_v4 = vpack.c.bf16 %v14233_v14, %v14234_v62  ;;  %v14243_v14 = vld [vmem:[#allocation118_spill] sm:$0xff] }
 0x765   : > { %v14244_v62 = vpack.c.bf16 %v12597_v34, %v14243_v14 }
 0x766   : > { %8907 = vmatmul.mubr.bf16.gmra.mrb[12].mxu1 %v14229_v57  ;;  %v14239_v57 = vpack.c.bf16 %v14237_v1, %v14238_v22  ;;  %v5896_v22 = vpack.c.bf16 %v5880_v26, %v5879_v49  ;;  %v6162_v49 = vld [vmem:[#allocation2 + $0x5f] sm:$0xff]  ;;  %v6163_v26 = vld [vmem:[#allocation2 + $0x67] sm:$0xff] }
 0x767   : > { %8910 = vmatprep.mubr.bf16.mxu1 %v14232_v23  ;;  %8939 = vmatpush3.bf16.msra.mxu1 %v9795_v8  ;;  %v14240_v8 = vld [vmem:[#allocation180_spill] sm:$0xff]  ;;  %v6156_v23 = vld [vmem:[#allocation2 + $0x2f] sm:$0xff] }
 0x768   : > { %8940 = vmatprep.subr.bf16.mxu1 %v9796_v39  ;;  %v14241_v53 = vpack.c.bf16 %v12575_v7, %v14240_v8  ;;  %v14246_v7 = vld [vmem:[#allocation46_spill] sm:$0xff] }
 0x769   : > { %v6188_v1 = vmul.f32 %v6156_v23, %v14246_v7  ;;  %v6159_v8 = vld [vmem:[#allocation2 + $0x47] sm:$0xff] }
 0x76a   : > { %v6191_v6 = vmul.f32 %v6159_v8, %v13932_v10  ;;  %v9799_v10 = vld [vmem:[%s13265_s4 + $0x1d0] sm:$0xff]   ;;  %v14247_v8 = vld [vmem:[#allocation50_spill] sm:$0xff] }
 0x76b   : > { %8941 = vmatpush3.bf16.msra.mxu1 %v9796_v39  ;;  %v14242_v39 = vpack.c.bf16 %v12587_v54, %v12579_v19  ;;  %v6157_v19 = vld [vmem:[#allocation2 + $0x37] sm:$0xff]  ;;  %v6158_v54 = vld [vmem:[#allocation2 + $0x3f] sm:$0xff] }
 0x76c   : > { %8974 = vmatprep.subr.bf16.mxu1 %v9797_v37  ;;  %v6189_v34 = vmul.f32 %v6157_v19, %v13928_v33 }
 0x76e   : > { %8911 = vmatmul.mubr.bf16.gmra.mrb[16].mxu1 %v14235_v4  ;;  %v14245_v4 = vld [vmem:[#allocation36_spill] sm:$0xff] }
 0x76f   : > { %8914 = vmatprep.mubr.bf16.mxu1 %v14236_v56  ;;  %v6187_v56 = vmul.f32 %v6155_v40, %v14245_v4  ;;  %v9798_v40 = vld [vmem:[%s13265_s4 + $0x1c8] sm:$0xff]  }
 0x770   : > { %v6164_v4 = vld [vmem:[#allocation2 + $0x6f] sm:$0xff] }
 0x776   : > { %8915 = vmatmul.mubr.bf16.gmra.mrb[20].mxu1 %v14239_v57  ;;  %v6219_v57 = vpack.c.bf16 %v6188_v1, %v6187_v56  ;;  %v6196_v56 = vmul.f32 %v6164_v4, %v13948_v47  ;;  %v9801_v47 = vld [vmem:[%s13265_s4 + $0x1e0] sm:$0xff]  }
 0x777   : > { %8918 = vmatprep.mubr.bf16.mxu1 %v14241_v53  ;;  %v6160_v53 = vld [vmem:[#allocation2 + $0x4f] sm:$0xff] }
 0x778   : > { %v6192_v55 = vmul.f32 %v6160_v53, %v13937_v58  ;;  %v6195_v58 = vmul.f32 %v6163_v26, %v13946_v28  ;;  %v14250_v26 = vld [vmem:[#allocation49_spill] sm:$0xff] }
 0x77a   : > { %v6221_v23 = vpack.c.bf16 %v6192_v55, %v6191_v6  ;;  %v6223_v1 = vpack.c.bf16 %v6196_v56, %v6195_v58  ;;  %v6170_v55 = vld [vmem:[#allocation2 + $0x9f] sm:$0xff] }
 0x77b   : > { %v9804_v58 = vld [vmem:[%s13265_s4 + $0x1f8] sm:$0xff]  }
 0x77e   : > { %8919 = vmatmul.mubr.bf16.gmra.mrb[24].mxu1 %v14242_v39  ;;  %v6190_v39 = vmul.f32 %v6158_v54, %v13930_v27  ;;  %v6194_v27 = vmul.f32 %v6162_v49, %v13941_v36  ;;  %v6167_v36 = vld [vmem:[#allocation2 + $0x87] sm:$0xff]  ;;  %v9803_v49 = vld [vmem:[%s13265_s4 + $0x1f0] sm:$0xff]  }
 0x77f   : > { %8922 = vmatprep.mubr.bf16.mxu1 %v14244_v62  ;;  %v6161_v62 = vld [vmem:[#allocation2 + $0x57] sm:$0xff]  ;;  %v6199_v54 = vmul.f32 %v6167_v36, %v13956_v60 }
 0x780   : > { %v6220_v14 = vpack.c.bf16 %v6190_v39, %v6189_v34  ;;  %v6193_v33 = vmul.f32 %v6161_v62, %v13939_v59  ;;  %v6166_v59 = vld [vmem:[#allocation2 + $0x7f] sm:$0xff]  ;;  %v9802_v39 = vld [vmem:[%s13265_s4 + $0x1e8] sm:$0xff]  }
 0x781   : > { %v6198_v28 = vmul.f32 %v6166_v59, %v13954_v21  ;;  %v6171_v21 = vld [vmem:[#allocation2 + $0xa7] sm:$0xff]  ;;  %v14249_v60 = vld [vmem:[#allocation52_spill] sm:$0xff]  ;;  %v14252_v59 = vld [vmem:[#allocation51_spill] sm:$0xff] }
 0x782   : > { %v6222_v7 = vpack.c.bf16 %v6194_v27, %v6193_v33  ;;  %v6202_v62 = vmul.f32 %v6170_v55, %v14249_v60  ;;  %v6203_v4 = vmul.f32 %v6171_v21, %v14250_v26  ;;  %v14251_v33 = vld [vmem:[#allocation54_spill] sm:$0xff] }
 0x783   : > { %v6179_v55 = vld [vmem:[#allocation2 + $0xe7] sm:$0xff]  ;;  %v6180_v21 = vld [vmem:[#allocation2 + $0xef] sm:$0xff] }
 0x784   : > { %v14259_v26 = vld [vmem:[#allocation62_spill] sm:$0xff] }
 0x786   : > { %8923 = vmatmul.mubr.bf16.gmra.mrb[28].mxu1 %v5896_v22  ;;  %v6165_v22 = vld [vmem:[#allocation2 + $0x77] sm:$0xff] }
 0x787   : > { %8942 = vmatprep.mubr.bf16.mxu1 %v6219_v57  ;;  %v6168_v57 = vld [vmem:[#allocation2 + $0x8f] sm:$0xff]  ;;  %v6197_v19 = vmul.f32 %v6165_v22, %v13950_v42  ;;  %v6169_v42 = vld [vmem:[#allocation2 + $0x97] sm:$0xff] }
 0x788   : > { %v6200_v53 = vmul.f32 %v6168_v57, %v14247_v8  ;;  %v6176_v22 = vld [vmem:[#allocation2 + $0xcf] sm:$0xff]  ;;  %v14253_v57 = vld [vmem:[#allocation56_spill] sm:$0xff] }
 0x789   : > { %v6224_v34 = vpack.c.bf16 %v6198_v28, %v6197_v19  ;;  %v9805_v28 = vld [vmem:[%s13265_s4 + $0x200] sm:$0xff]   ;;  %v14255_v8 = vld [vmem:[#allocation58_spill] sm:$0xff] }
 0x78a   : > { %v6225_v6 = vpack.c.bf16 %v6200_v53, %v6199_v54  ;;  %v6208_v53 = vmul.f32 %v6176_v22, %v14255_v8 }
 0x78e   : > { %8943 = vmatmul.mubr.bf16.vlgmr.msra.gmra.mrb[0].mxu1 %v6220_v14  ;;  %v6172_v14 = vld [vmem:[#allocation2 + $0xaf] sm:$0xff] }
 0x78f   : > { %8975 = vmatpush3.bf16.msra.mxu1 %v9797_v37  ;;  %8946 = vmatprep.mubr.bf16.mxu1 %v6221_v23  ;;  %v9800_v37 = vld [vmem:[%s13265_s4 + $0x1d8] sm:$0xff]   ;;  %v6204_v27 = vmul.f32 %v6172_v14, %v14251_v33  ;;  %v14256_v14 = vld [vmem:[#allocation55_spill] sm:$0xff] }
 0x790   : > { %8976 = vmatprep.subr.bf16.mxu1 %v9798_v40 }
 0x791   : > { %v6227_v56 = vpack.c.bf16 %v6204_v27, %v6203_v4  ;;  %v6212_v4 = vmul.f32 %v6180_v21, %v14259_v26  ;;  %v6806_v21 = vld [vmem:[#allocation2 + $0x61] sm:$0xff] }
 0x793   : > { %8977 = vmatpush3.bf16.msra.mxu1 %v9798_v40  ;;  %v14248_v40 = vld [vmem:[#allocation47_spill] sm:$0xff] }
 0x794   : > { %8978 = vmatprep.subr.bf16.mxu1 %v9799_v10  ;;  %v6201_v23 = vmul.f32 %v6169_v42, %v14248_v40  ;;  %v6178_v42 = vld [vmem:[#allocation2 + $0xdf] sm:$0xff] }
 0x796   : > { %8947 = vmatmul.mubr.bf16.gmra.mrb[4].mxu1 %v6222_v7  ;;  %v6173_v7 = vld [vmem:[#allocation2 + $0xb7] sm:$0xff] }
 0x797   : > { %8950 = vmatprep.mubr.bf16.mxu1 %v6223_v1  ;;  %8979 = vmatpush3.bf16.msra.mxu1 %v9799_v10  ;;  %v6226_v10 = vpack.c.bf16 %v6202_v62, %v6201_v23  ;;  %v6175_v1 = vld [vmem:[#allocation2 + $0xc7] sm:$0xff]  ;;  %v6205_v36 = vmul.f32 %v6173_v7, %v14252_v59  ;;  %v14257_v23 = vld [vmem:[#allocation60_spill] sm:$0xff] }
 0x798   : > { %8980 = vmatprep.subr.bf16.mxu1 %v9800_v37  ;;  %v6210_v60 = vmul.f32 %v6178_v42, %v14257_v23  ;;  %v14258_v62 = vld [vmem:[#allocation57_spill] sm:$0xff]  ;;  %v6185_v59 = vld [vmem:[#allocation2 + $0x117] sm:$0xff] }
 0x79b   : > { %8981 = vmatpush3.bf16.msra.mxu1 %v9800_v37  ;;  %v6174_v37 = vld [vmem:[#allocation2 + $0xbf] sm:$0xff] }
 0x79c   : > { %8982 = vmatprep.subr.bf16.mxu1 %v9801_v47  ;;  %v6206_v19 = vmul.f32 %v6174_v37, %v14253_v57  ;;  %v14261_v37 = vld [vmem:[#allocation64_spill] sm:$0xff]  ;;  %v14263_v57 = vld [vmem:[#allocation117_spill] sm:$0xff] }
 0x79e   : > { %8951 = vmatmul.mubr.bf16.gmra.mrb[8].mxu1 %v6224_v34  ;;  %v6228_v34 = vpack.c.bf16 %v6206_v19, %v6205_v36  ;;  %v14262_v36 = vld [vmem:[#allocation181_spill] sm:$0xff] }
 0x79f   : > { %8954 = vmatprep.mubr.bf16.mxu1 %v6225_v6  ;;  %8983 = vmatpush3.bf16.msra.mxu1 %v9801_v47  ;;  %v14254_v47 = vld [vmem:[#allocation53_spill] sm:$0xff]  ;;  %v6177_v6 = vld [vmem:[#allocation2 + $0xd7] sm:$0xff]  ;;  %v14264_v19 = vpack.c.bf16 %v14262_v36, %v14263_v57  ;;  %v6815_v57 = vld [vmem:[#allocation2 + $0xa9] sm:$0xff] }
 0x7a0   : > { %8984 = vmatprep.subr.bf16.mxu1 %v9802_v39  ;;  %v6207_v54 = vmul.f32 %v6175_v1, %v14254_v47  ;;  %v6209_v40 = vmul.f32 %v6177_v6, %v14256_v14  ;;  %v6186_v47 = vld [vmem:[#allocation2 + $0x11f] sm:$0xff]  ;;  %v6807_v14 = vld [vmem:[#allocation2 + $0x69] sm:$0xff] }
 0x7a1   : > { %v6218_v8 = vmul.f32 %v6186_v47, %v14114_v2  ;;  %v9808_v2 = vld [vmem:[%s13265_s4 + $0x218] sm:$0xff]   ;;  %v6802_v6 = vld [vmem:[#allocation2 + $0x41] sm:$0xff] }
 0x7a2   : > { %v6230_v33 = vpack.c.bf16 %v6210_v60, %v6209_v40  ;;  %v6808_v40 = vld [vmem:[#allocation2 + $0x71] sm:$0xff]  ;;  %v6838_v60 = vmul.f32 %v6806_v21, %v14128_v5  ;;  %v6814_v36 = vld [vmem:[#allocation2 + $0xa1] sm:$0xff] }
 0x7a3   : > { %8985 = vmatpush3.bf16.msra.mxu1 %v9802_v39  ;;  %v6229_v39 = vpack.c.bf16 %v6208_v53, %v6207_v54  ;;  %v6217_v54 = vmul.f32 %v6185_v59, %v14112_v12  ;;  %v9807_v12 = vld [vmem:[%s13265_s4 + $0x210] sm:$0xff]   ;;  %v6813_v59 = vld [vmem:[#allocation2 + $0x99] sm:$0xff] }
 0x7a4   : > { %8986 = vmatprep.subr.bf16.mxu1 %v9803_v49  ;;  %v6845_v47 = vmul.f32 %v6813_v59, %v14140_v63 }
 0x7a5   : > { %v6234_v53 = vpack.c.bf16 %v6218_v8, %v6217_v54  ;;  %v14270_v54 = vld [vmem:[#allocation91_spill] sm:$0xff] }
 0x7a6   : > { %8955 = vmatmul.mubr.bf16.gmra.mrb[12].mxu1 %v6226_v10  ;;  %v6181_v10 = vld [vmem:[#allocation2 + $0xf7] sm:$0xff]  ;;  %v6846_v8 = vmul.f32 %v6814_v36, %v14270_v54 }
 0x7a7   : > { %8958 = vmatprep.mubr.bf16.mxu1 %v6227_v56  ;;  %8987 = vmatpush3.bf16.msra.mxu1 %v9803_v49  ;;  %v6211_v49 = vmul.f32 %v6179_v55, %v14258_v62  ;;  %v14260_v56 = vld [vmem:[#allocation59_spill] sm:$0xff]  ;;  %v14265_v62 = vld [vmem:[#allocation86_spill] sm:$0xff] }
 0x7a8   : > { %8988 = vmatprep.subr.bf16.mxu1 %v9804_v58  ;;  %v6213_v7 = vmul.f32 %v6181_v10, %v14260_v56  ;;  %v14267_v10 = vld [vmem:[#allocation88_spill] sm:$0xff]  ;;  %v14268_v56 = vld [vmem:[#allocation87_spill] sm:$0xff] }
 0x7a9   : > { %v6231_v27 = vpack.c.bf16 %v6212_v4, %v6211_v49  ;;  %v14266_v49 = vld [vmem:[#allocation85_spill] sm:$0xff]  ;;  %v14285_v54 = vld [vmem:[#allocation7_spill] sm:$0xff] }
 0x7aa   : > { %v6809_v4 = vld [vmem:[#allocation2 + $0x79] sm:$0xff] }
 0x7ab   : > { %8989 = vmatpush3.bf16.msra.mxu1 %v9804_v58  ;;  %v6182_v58 = vld [vmem:[#allocation2 + $0xff] sm:$0xff] }
 0x7ac   : > { %9022 = vmatprep.subr.bf16.mxu1 %v9805_v28  ;;  %v6214_v1 = vmul.f32 %v6182_v58, %v14261_v37  ;;  %v6841_v58 = vmul.f32 %v6809_v4, %v14267_v10  ;;  %v14269_v37 = vld [vmem:[#allocation89_spill] sm:$0xff] }
 0x7ad   : > { %v13150_v10 = vld [vmem:[%s13266_s5] ss:$0 sm:$0xff] }
 0x7ae   : > { %8959 = vmatmul.mubr.bf16.gmra.mrb[16].mxu1 %v6228_v34  ;;  %v6232_v22 = vpack.c.bf16 %v6214_v1, %v6213_v7  ;;  %v9806_v34 = vld [vmem:[%s13265_s4 + $0x208] sm:$0xff]  }
 0x7af   : > { %8962 = vmatprep.mubr.bf16.mxu1 %v6229_v39 }
 0x7b6   : > { %8963 = vmatmul.mubr.bf16.gmra.mrb[20].mxu1 %v6230_v33  ;;  %v6811_v33 = vld [vmem:[#allocation2 + $0x89] sm:$0xff] }
 0x7b7   : > { %8966 = vmatprep.mubr.bf16.mxu1 %v6231_v27  ;;  %v6812_v27 = vld [vmem:[#allocation2 + $0x91] sm:$0xff] }
 0x7b8   : > { %v6844_v5 = vmul.f32 %v6812_v27, %v14269_v37 }
 0x7be   : > { %8967 = vmatmul.mubr.bf16.gmra.mrb[24].mxu1 %v6232_v22 }
 0x7bf   : > { %8970 = vmatprep.mubr.bf16.mxu1 %v14264_v19  ;;  %v6816_v19 = vld [vmem:[#allocation2 + $0xb1] sm:$0xff] }
 0x7c6   : > { %8971 = vmatmul.mubr.bf16.gmra.mrb[28].mxu1 %v6234_v53  ;;  %v6847_v53 = vmul.f32 %v6815_v57, %v14059_v9 }
 0x7c7   : > { %8990 = vmatprep.mubr.bf16.mxu1 %v12879_v0  ;;  %v9809_v0 = vld [vmem:[%s13265_s4 + $0x220] sm:$0xff]  }
 0x7ce   : > { %8991 = vmatmul.mubr.bf16.vlgmr.msra.gmra.mrb[0].mxu1 %v12884_v35  ;;  %v9810_v35 = vld [vmem:[%s13265_s4 + $0x228] sm:$0xff]  }
 0x7cf   : > { %9023 = vmatpush3.bf16.msra.mxu1 %v9805_v28  ;;  %8994 = vmatprep.mubr.bf16.mxu1 %v12891_v20  ;;  %v9811_v20 = vld [vmem:[%s13265_s4 + $0x230] sm:$0xff]  }
 0x7d0   : > { %9024 = vmatprep.subr.bf16.mxu1 %v9806_v34 }
 0x7d3   : > { %9025 = vmatpush3.bf16.msra.mxu1 %v9806_v34  ;;  %v14271_v34 = vld [vmem:[#allocation95_spill] sm:$0xff] }
 0x7d4   : > { %9026 = vmatprep.subr.bf16.mxu1 %v9807_v12 }
 0x7d6   : > { %8995 = vmatmul.mubr.bf16.gmra.mrb[4].mxu1 %v12896_v29  ;;  %v9812_v29 = vld [vmem:[%s13265_s4 + $0x238] sm:$0xff]  }
 0x7d7   : > { %8998 = vmatprep.mubr.bf16.mxu1 %v12903_v25  ;;  %9027 = vmatpush3.bf16.msra.mxu1 %v9807_v12  ;;  %v6799_v25 = vld [vmem:[#allocation2 + $0x29] sm:$0xff]  ;;  %v6848_v12 = vmul.f32 %v6816_v19, %v14271_v34  ;;  %v14286_v34 = vld [vmem:[#allocation9_spill] sm:$0xff] }
 0x7d8   : > { %9028 = vmatprep.subr.bf16.mxu1 %v9808_v2 }
 0x7db   : > { %9029 = vmatpush3.bf16.msra.mxu1 %v9808_v2  ;;  %v6870_v2 = vpack.c.bf16 %v6846_v8, %v6845_v47 }
 0x7dc   : > { %9030 = vmatprep.subr.bf16.mxu1 %v9809_v0 }
 0x7de   : > { %8999 = vmatmul.mubr.bf16.gmra.mrb[8].mxu1 %v12908_v3  ;;  %v6800_v3 = vld [vmem:[#allocation2 + $0x31] sm:$0xff] }
 0x7df   : > { %9002 = vmatprep.mubr.bf16.mxu1 %v12915_v38  ;;  %9031 = vmatpush3.bf16.msra.mxu1 %v9809_v0  ;;  %v6831_v38 = vmul.f32 %v6799_v25, %v14117_v13  ;;  %v6817_v0 = vld [vmem:[#allocation2 + $0xb9] sm:$0xff] }
 0x7e0   : > { %9032 = vmatprep.subr.bf16.mxu1 %v9810_v35  ;;  %v14272_v25 = vld [vmem:[#allocation100_spill] sm:$0xff] }
 0x7e3   : > { %9033 = vmatpush3.bf16.msra.mxu1 %v9810_v35  ;;  %v6818_v35 = vld [vmem:[#allocation2 + $0xc1] sm:$0xff] }
 0x7e4   : > { %9034 = vmatprep.subr.bf16.mxu1 %v9811_v20 }
 0x7e6   : > { %9003 = vmatmul.mubr.bf16.gmra.mrb[12].mxu1 %v12920_v24  ;;  %v6832_v24 = vmul.f32 %v6800_v3, %v14116_v61  ;;  %v6805_v61 = vld [vmem:[#allocation2 + $0x59] sm:$0xff]  ;;  %v6849_v3 = vmul.f32 %v6817_v0, %v14272_v25 }
 0x7e7   : > { %9006 = vmatprep.mubr.bf16.mxu1 %v12927_v32  ;;  %9035 = vmatpush3.bf16.msra.mxu1 %v9811_v20  ;;  %v9822_v32 = vld [vmem:[#allocation2 + $0x10] sm:$0xff]  ;;  %v6837_v23 = vmul.f32 %v6805_v61, %v14126_v52  ;;  %v6843_v52 = vmul.f32 %v6811_v33, %v14136_v16  ;;  %v6871_v16 = vpack.c.bf16 %v6848_v12, %v6847_v53 }
 0x7e8   : > { %9036 = vmatprep.subr.bf16.mxu1 %v9812_v29  ;;  %v6540_v28 = vpack.c.bf16 %v9822_v32, %v9822_v32  ;;  %v6863_v39 = vpack.c.bf16 %v6832_v24, %v6831_v38  ;;  %v6819_v20 = vld [vmem:[#allocation2 + $0xc9] sm:$0xff]  ;;  %v14273_v38 = vld [vmem:[#allocation97_spill] sm:$0xff] }
 0x7e9   : > { %v6866_v26 = vpack.c.bf16 %v6838_v60, %v6837_v23  ;;  %v6869_v22 = vpack.c.bf16 %v6844_v5, %v6843_v52  ;;  %v6850_v24 = vmul.f32 %v6818_v35, %v14273_v38  ;;  %v14274_v32 = vld [vmem:[#allocation103_spill] sm:$0xff] }
 0x7ea   : > { %v6851_v63 = vmul.f32 %v6819_v20, %v14274_v32  ;;  %v14278_v23 = vld [vmem:[#allocation115_spill] sm:$0xff] }
 0x7eb   : > { %9037 = vmatpush3.bf16.msra.mxu1 %v9812_v29  ;;  %v6820_v29 = vld [vmem:[#allocation2 + $0xd1] sm:$0xff] }
 0x7ec   : > { %v14283_v5 = vld [vmem:[#allocation3_spill] sm:$0xff] }
 0x7ee   : > { %9007 = vmatmul.mubr.bf16.gmra.mrb[16].mxu1 %v12929_v17  ;;  %v6801_v17 = vld [vmem:[#allocation2 + $0x39] sm:$0xff] }
 0x7ef   : > { %9010 = vmatprep.mubr.bf16.mxu1 %v12933_v51  ;;  %v6803_v51 = vld [vmem:[#allocation2 + $0x49] sm:$0xff] }
 0x7f0   : > { %v6835_v42 = vmul.f32 %v6803_v51, %v14122_v41  ;;  %v6823_v51 = vld [vmem:[#allocation2 + $0xe9] sm:$0xff] }
 0x7f6   : > { %9011 = vmatmul.mubr.bf16.gmra.mrb[20].mxu1 %v12935_v31  ;;  %v6804_v31 = vld [vmem:[#allocation2 + $0x51] sm:$0xff] }
 0x7f7   : > { %9014 = vmatprep.mubr.bf16.mxu1 %v12939_v50  ;;  %v6833_v50 = vmul.f32 %v6801_v17, %v14118_v11  ;;  %v6839_v11 = vmul.f32 %v6807_v14, %v14265_v62  ;;  %v6821_v17 = vld [vmem:[#allocation2 + $0xd9] sm:$0xff] }
 0x7f8   : > { %v14279_v62 = vld [vmem:[#allocation113_spill] sm:$0xff] }
 0x7fe   : > { %9015 = vmatmul.mubr.bf16.gmra.mrb[24].mxu1 %v12941_v15  ;;  %v6834_v15 = vmul.f32 %v6802_v6, %v14120_v46  ;;  %v6840_v46 = vmul.f32 %v6808_v40, %v14266_v49  ;;  %v6822_v6 = vld [vmem:[#allocation2 + $0xe1] sm:$0xff]  ;;  %v6825_v40 = vld [vmem:[#allocation2 + $0xf9] sm:$0xff] }
 0x7ff   : > { %9018 = vmatprep.mubr.bf16.mxu1 %v12945_v30  ;;  %v6836_v30 = vmul.f32 %v6804_v31, %v14124_v45  ;;  %v6810_v45 = vld [vmem:[#allocation2 + $0x81] sm:$0xff]  ;;  %v6824_v31 = vld [vmem:[#allocation2 + $0xf1] sm:$0xff]  ;;  %v6857_v60 = vmul.f32 %v6825_v40, %v14278_v23 }
 0x800   : > { %v6864_v13 = vpack.c.bf16 %v6834_v15, %v6833_v50  ;;  %v6867_v41 = vpack.c.bf16 %v6840_v46, %v6839_v11  ;;  %v6842_v7 = vmul.f32 %v6810_v45, %v14268_v56  ;;  %v6853_v50 = vmul.f32 %v6821_v17, %v14069_v48  ;;  %v14275_v15 = vld [vmem:[#allocation106_spill] sm:$0xff]  ;;  %v6829_v46 = vld [vmem:[#allocation2 + $0x119] sm:$0xff]  ;;  %v14289_v17 = vld [vmem:[#allocation15_spill] sm:$0xff] }
 0x801   : > { %v6865_v55 = vpack.c.bf16 %v6836_v30, %v6835_v42  ;;  %v6854_v42 = vmul.f32 %v6822_v6, %v14275_v15  ;;  %v14276_v30 = vld [vmem:[#allocation112_spill] sm:$0xff]  ;;  %v14280_v48 = vld [vmem:[#allocation182_spill] sm:$0xff]  ;;  %v6861_v45 = vmul.f32 %v6829_v46, %v14159_v43 }
 0x802   : > { %v6868_v1 = vpack.c.bf16 %v6842_v7, %v6841_v58 }
 0x803   : > { %v6874_v21 = vpack.c.bf16 %v6854_v42, %v6853_v50 }
 0x806   : > { %9019 = vmatmul.mubr.bf16.gmra.mrb[28].mxu1 %v6540_v28  ;;  %v6852_v28 = vmul.f32 %v6820_v29, %v14068_v44  ;;  %v6826_v44 = vld [vmem:[#allocation2 + $0x101] sm:$0xff]  ;;  %v14287_v29 = vld [vmem:[#allocation11_spill] sm:$0xff] }
 0x807   : > { %9038 = vmatprep.mubr.bf16.mxu1 %v6863_v39  ;;  %v6872_v39 = vpack.c.bf16 %v6850_v24, %v6849_v3  ;;  %v6858_v11 = vmul.f32 %v6826_v44, %v14279_v62  ;;  %v14288_v24 = vld [vmem:[#allocation13_spill] sm:$0xff]  ;;  %v14292_v44 = vld [vmem:[#allocation4_spill] sm:$0xff] }
 0x808   : > { %v6873_v9 = vpack.c.bf16 %v6852_v28, %v6851_v63 }
 0x809   : > { %v6876_v49 = vpack.c.bf16 %v6858_v11, %v6857_v60  ;;  %v14293_v11 = vld [vmem:[#allocation21_spill] sm:$0xff] }
 0x80e   : > { %9039 = vmatmul.mubr.bf16.vlgmr.msra.gmra.mrb[0].mxu1 %v6864_v13  ;;  %v6855_v13 = vmul.f32 %v6823_v51, %v14276_v30 }
 0x80f   : > { %9042 = vmatprep.mubr.bf16.mxu1 %v6865_v55  ;;  %v14277_v55 = vld [vmem:[#allocation111_spill] sm:$0xff] }
 0x810   : > { %v6856_v61 = vmul.f32 %v6824_v31, %v14277_v55  ;;  %v14290_v31 = vld [vmem:[#allocation17_spill] sm:$0xff] }
 0x812   : > { %v6875_v14 = vpack.c.bf16 %v6856_v61, %v6855_v13 }
 0x816   : > { %9043 = vmatmul.mubr.bf16.gmra.mrb[4].mxu1 %v6866_v26  ;;  %v6830_v26 = vld [vmem:[#allocation2 + $0x121] sm:$0xff] }
 0x817   : > { %9046 = vmatprep.mubr.bf16.mxu1 %v6867_v41  ;;  %v14281_v41 = vld [vmem:[#allocation76_spill] sm:$0xff]  ;;  %v6862_v33 = vmul.f32 %v6830_v26, %v14160_v18  ;;  %v14284_v18 = vld [vmem:[#allocation5_spill] sm:$0xff]  ;;  %v14294_v26 = vld [vmem:[#allocation6_spill] sm:$0xff] }
 0x818   : > { %v14282_v4 = vpack.c.bf16 %v14280_v48, %v14281_v41 }
 0x819   : > { %v6878_v27 = vpack.c.bf16 %v6862_v33, %v6861_v45 }
 0x81e   : > { %9047 = vmatmul.mubr.bf16.gmra.mrb[8].mxu1 %v6868_v1 }
 0x81f   : > { %9050 = vmatprep.mubr.bf16.mxu1 %v6869_v22 }
 0x826   : > { %9051 = vmatmul.mubr.bf16.gmra.mrb[12].mxu1 %v6870_v2 }
 0x827   : > { %9054 = vmatprep.mubr.bf16.mxu1 %v6871_v16 }
 0x82e   : > { %9055 = vmatmul.mubr.bf16.gmra.mrb[16].mxu1 %v6872_v39 }
 0x82f   : > { %9058 = vmatprep.mubr.bf16.mxu1 %v6873_v9 }
 0x836   : > { %9059 = vmatmul.mubr.bf16.gmra.mrb[20].mxu1 %v6874_v21  ;;  %v14291_v21 = vld [vmem:[#allocation19_spill] sm:$0xff] }
 0x837   : > { %9062 = vmatprep.mubr.bf16.mxu1 %v6875_v14 }
 0x83e   : > { %9063 = vmatmul.mubr.bf16.gmra.mrb[24].mxu1 %v6876_v49 }
 0x83f   : > { %9066 = vmatprep.mubr.bf16.mxu1 %v14282_v4 }
 0x846   : > { %9067 = vmatmul.mubr.bf16.gmra.mrb[28].mxu1 %v6878_v27  ;;  %v14295_v27 = vld [vmem:[#allocation23_spill] sm:$0xff] }
 0x8e1   : > { %v9040_v58 = vpop.f32.mrb[0].mxu1 }
 0x8e2   : > { %v6978_v56 = vpop.f32.mrb[1].mxu1  ;;  %v7146_v43 = vadd.f32 %v9040_v58, %v13150_v10 }
 0x8e3   : > { %v7144_v7 = vadd.f32 %v13150_v10, %v6978_v56  ;;  %v9041_v52 = vpop.f32.mrb[2].mxu1 }
 0x8e4   : > { %v6981_v37 = vpop.f32.mrb[3].mxu1  ;;  %v7178_v8 = vadd.f32 %v7146_v43, %v14285_v54  ;;  %v7147_v53 = vadd.f32 %v9041_v52, %v13150_v10  ;;  %v14298_v43 = vld [vmem:[#allocation10_spill] sm:$0xff] }
 0x8e5   : > { %v7176_v1 = vadd.f32 %v7144_v7, %v14283_v5  ;;  %v7145_v22 = vadd.f32 %v13150_v10, %v6981_v37  ;;  %v14296_v7 = vld [vmem:[#allocation8_spill] sm:$0xff] }
 0x8e6   : > { %v7179_v12 = vadd.f32 %v7147_v53, %v14286_v34 }
 0x8e7   : > { %7208 = vxpose.xlu0.b32.start [1/16] %v7176_v1, 128  ;;  %v7177_v59 = vadd.f32 %v7145_v22, %v14284_v18  ;;  %v14297_v1 = vld [vmem:[#allocation25_spill] sm:$0xff] }
 0x8e9   : > { %v9044_v36 = vpop.f32.mrb[4].mxu1 }
 0x8ea   : > { %v6994_v57 = vpop.f32.mrb[5].mxu1  ;;  %v7150_v38 = vadd.f32 %v9044_v36, %v13150_v10 }
 0x8eb   : > { %7209 = vxpose.xlu0.b32.cont [2/16] %v7177_v59, 128  ;;  %v9045_v19 = vpop.f32.mrb[6].mxu1  ;;  %v7148_v2 = vadd.f32 %v13150_v10, %v6994_v57 }
 0x8ec   : > { %v6997_v47 = vpop.f32.mrb[7].mxu1  ;;  %v7182_v6 = vadd.f32 %v7150_v38, %v14289_v17  ;;  %v7151_v51 = vadd.f32 %v9045_v19, %v13150_v10 }
 0x8ed   : > { %v7180_v25 = vadd.f32 %v7148_v2, %v14287_v29  ;;  %v7149_v3 = vadd.f32 %v13150_v10, %v6997_v47 }
 0x8ee   : > { %v7183_v50 = vadd.f32 %v7151_v51, %v14290_v31  ;;  %v14303_v31 = vld [vmem:[#allocation31_spill] sm:$0xff] }
 0x8ef   : > { %7210 = vxpose.xlu0.b32.cont [3/16] %v7178_v8, 128  ;;  %v7181_v32 = vadd.f32 %v7149_v3, %v14288_v24  ;;  %v14299_v8 = vld [vmem:[#allocation27_spill] sm:$0xff]  ;;  %v14302_v24 = vld [vmem:[#allocation14_spill] sm:$0xff] }
 0x8f1   : > { %v9048_v16 = vpop.f32.mrb[8].mxu1 }
 0x8f2   : > { %v7010_v0 = vpop.f32.mrb[9].mxu1  ;;  %v7154_v62 = vadd.f32 %v9048_v16, %v13150_v10  ;;  %v14300_v16 = vld [vmem:[#allocation12_spill] sm:$0xff] }
 0x8f3   : > { %7211 = vxpose.xlu0.b32.cont [4/16] %v7179_v12, 128  ;;  %v9049_v35 = vpop.f32.mrb[10].mxu1  ;;  %v7152_v15 = vadd.f32 %v13150_v10, %v7010_v0 }
 0x8f4   : > { %v7013_v20 = vpop.f32.mrb[11].mxu1  ;;  %v7186_v58 = vadd.f32 %v7154_v62, %v14295_v27  ;;  %v7155_v56 = vadd.f32 %v9049_v35, %v13150_v10  ;;  %v14308_v62 = vld [vmem:[#allocation22_spill] sm:$0xff] }
 0x8f5   : > { %v7184_v14 = vadd.f32 %v7152_v15, %v14291_v21  ;;  %v7153_v40 = vadd.f32 %v13150_v10, %v7013_v20  ;;  %v14305_v21 = vld [vmem:[#allocation32_spill] sm:$0xff]  ;;  %v14314_v27 = vld [vmem:[#allocation34_spill] sm:$0xff] }
 0x8f6   : > { %v7187_v22 = vadd.f32 %v7155_v56, %v14297_v1 }
 0x8f7   : > { %7212 = vxpose.xlu0.b32.cont [5/16] %v7180_v25, 128  ;;  %v7185_v49 = vadd.f32 %v7153_v40, %v14293_v11  ;;  %v14301_v25 = vld [vmem:[#allocation29_spill] sm:$0xff]  ;;  %v14306_v40 = vld [vmem:[#allocation18_spill] sm:$0xff]  ;;  %v14309_v11 = vld [vmem:[#allocation24_spill] sm:$0xff] }
 0x8f9   : > { %v9052_v63 = vpop.f32.mrb[12].mxu1 }
 0x8fa   : > { %v7026_v28 = vpop.f32.mrb[13].mxu1  ;;  %v7158_v29 = vadd.f32 %v9052_v63, %v13150_v10 }
 0x8fb   : > { %7213 = vxpose.xlu0.b32.cont [6/16] %v7181_v32, 128  ;;  %v13165_v39 = vpop.f32.mrb[14].mxu1  ;;  %v7156_v5 = vadd.f32 %v13150_v10, %v7026_v28 }
 0x8fc   : > { %v7029_v9 = vpop.f32.mrb[15].mxu1 }
 0x8fd   : > { %v7188_v53 = vadd.f32 %v7156_v5, %v14299_v8  ;;  %v7157_v2 = vadd.f32 %v13150_v10, %v7029_v9 }
 0x8ff   : > { %7214 = vxpose.xlu0.b32.cont [7/16] %v7182_v6, 128  ;;  %v7189_v3 = vadd.f32 %v7157_v2, %v14301_v25 }
 0x901   : > { %v9056_v42 = vpop.f32.mrb[16].mxu1 }
 0x902   : > { %v7042_v30 = vpop.f32.mrb[17].mxu1  ;;  %v7162_v46 = vadd.f32 %v9056_v42, %v13150_v10  ;;  %v7159_v42 = vadd.f32 %v13165_v39, %v13150_v10 }
 0x903   : > { %v7160_v13 = vadd.f32 %v13150_v10, %v7042_v30  ;;  %7215 = vxpose.xlu0.b32.cont [8/16] %v7183_v50, 128  ;;  %v9057_v55 = vpop.f32.mrb[18].mxu1  ;;  %v7190_v50 = vadd.f32 %v7158_v29, %v14303_v31  ;;  %v14304_v30 = vld [vmem:[#allocation16_spill] sm:$0xff] }
 0x904   : > { %v7045_v61 = vpop.f32.mrb[19].mxu1  ;;  %v7194_v52 = vadd.f32 %v7162_v46, %v14296_v7  ;;  %v7163_v37 = vadd.f32 %v9057_v55, %v13150_v10  ;;  %v14310_v46 = vld [vmem:[#allocation26_spill] sm:$0xff] }
 0x905   : > { %v7192_v23 = vadd.f32 %v7160_v13, %v14292_v44  ;;  %v7161_v60 = vadd.f32 %v13150_v10, %v7045_v61 }
 0x906   : > { %v7195_v18 = vadd.f32 %v7163_v37, %v14298_v43 }
 0x907   : > { %7216 = vxpose.xlu0.b32.cont [9/16] %v7184_v14, 128  ;;  %7240 = vxpose.xlu1.b32.start [1/16] %v7192_v23, 128  ;;  %v7193_v48 = vadd.f32 %v7161_v60, %v14294_v26  ;;  %v7191_v14 = vadd.f32 %v7159_v42, %v14305_v21  ;;  %v14307_v23 = vld [vmem:[#allocation20_spill] sm:$0xff] }
 0x908   : > { %v14311_v26 = vld [vmem:[#allocation28_spill] sm:$0xff] }
 0x909   : > { %v9060_v41 = vpop.f32.mrb[20].mxu1 }
 0x90a   : > { %v7058_v4 = vpop.f32.mrb[21].mxu1  ;;  %v7166_v38 = vadd.f32 %v9060_v41, %v13150_v10  ;;  %v14312_v41 = vld [vmem:[#allocation30_spill] sm:$0xff] }
 0x90b   : > { %7217 = vxpose.xlu0.b32.cont [10/16] %v7185_v49, 128  ;;  %7241 = vxpose.xlu1.b32.cont [2/16] %v7193_v48, 128  ;;  %v9061_v45 = vpop.f32.mrb[22].mxu1  ;;  %v7164_v59 = vadd.f32 %v13150_v10, %v7058_v4 }
 0x90c   : > { %v7061_v33 = vpop.f32.mrb[23].mxu1  ;;  %v7198_v13 = vadd.f32 %v7166_v38, %v14304_v30  ;;  %v7167_v55 = vadd.f32 %v9061_v45, %v13150_v10  ;;  %v14313_v45 = vld [vmem:[#allocation33_spill] sm:$0xff] }
 0x90d   : > { %v7196_v0 = vadd.f32 %v7164_v59, %v14300_v16  ;;  %v7165_v35 = vadd.f32 %v13150_v10, %v7061_v33 }
 0x90e   : > { %v7199_v44 = vadd.f32 %v7167_v55, %v14306_v40 }
 0x90f   : > { %7218 = vxpose.xlu0.b32.cont [11/16] %v7186_v58, 128  ;;  %7242 = vxpose.xlu1.b32.cont [3/16] %v7194_v52, 128  ;;  %v7197_v32 = vadd.f32 %v7165_v35, %v14302_v24 }
 0x911   : > { %v9064_v36 = vpop.f32.mrb[24].mxu1 }
 0x912   : > { %v7170_v57 = vadd.f32 %v9064_v36, %v13150_v10  ;;  %v7074_v19 = vpop.f32.mrb[25].mxu1 }
 0x913   : > { %v7168_v47 = vadd.f32 %v13150_v10, %v7074_v19  ;;  %7219 = vxpose.xlu0.b32.cont [12/16] %v7187_v22, 128  ;;  %7243 = vxpose.xlu1.b32.cont [4/16] %v7195_v18, 128  ;;  %v9065_v54 = vpop.f32.mrb[26].mxu1 }
 0x914   : > { %v7171_v34 = vadd.f32 %v9065_v54, %v13150_v10  ;;  %v7077_v12 = vpop.f32.mrb[27].mxu1  ;;  %v7202_v49 = vadd.f32 %v7170_v57, %v14309_v11 }
 0x915   : > { %v7169_v20 = vadd.f32 %v13150_v10, %v7077_v12  ;;  %v7200_v60 = vadd.f32 %v7168_v47, %v14307_v23 }
 0x917   : > { %7220 = vxpose.xlu0.b32.cont [13/16] %v7188_v53, 128  ;;  %7244 = vxpose.xlu1.b32.cont [5/16] %v7196_v0, 128  ;;  %v7201_v39 = vadd.f32 %v7169_v20, %v14308_v62 }
 0x919   : > { %v9068_v28 = vpop.f32.mrb[28].mxu1 }
 0x91a   : > { %v7174_v17 = vadd.f32 %v9068_v28, %v13150_v10  ;;  %v7090_v9 = vpop.f32.mrb[29].mxu1 }
 0x91b   : > { %v7172_v6 = vadd.f32 %v13150_v10, %v7090_v9  ;;  %7221 = vxpose.xlu0.b32.cont [14/16] %v7189_v3, 128  ;;  %7245 = vxpose.xlu1.b32.cont [6/16] %v7197_v32, 128  ;;  %v9069_v51 = vpop.f32.mrb[30].mxu1 }
 0x91c   : > { %v7175_v15 = vadd.f32 %v9069_v51, %v13150_v10  ;;  %v7093_v63 = vpop.f32.mrb[31].mxu1  ;;  %v7206_v33 = vadd.f32 %v7174_v17, %v14313_v45 }
 0x91d   : > { %v7173_v61 = vadd.f32 %v13150_v10, %v7093_v63  ;;  %v7203_v10 = vadd.f32 %v7171_v34, %v14310_v46  ;;  %v7204_v48 = vadd.f32 %v7172_v6, %v14311_v26 }
 0x91e   : > { %v7207_v58 = vadd.f32 %v7175_v15, %v14314_v27 }
 0x91f   : > { %7222 = vxpose.xlu0.b32.cont [15/16] %v7190_v50, 128  ;;  %7246 = vxpose.xlu1.b32.cont [7/16] %v7198_v13, 128  ;;  %v7205_v4 = vadd.f32 %v7173_v61, %v14312_v41 }
 0x923   : > { %7223 = vxpose.xlu0.b32.end [16/16] %v7191_v14, 128  ;;  %7247 = vxpose.xlu1.b32.cont [8/16] %v7199_v44, 128 }
 0x927   : > { %7248 = vxpose.xlu1.b32.cont [9/16] %v7200_v60, 128 }
 0x92b   : > { %7249 = vxpose.xlu1.b32.cont [10/16] %v7201_v39, 128 }
 0x92f   : > { %7250 = vxpose.xlu1.b32.cont [11/16] %v7202_v49, 128 }
 0x933   : > { %7251 = vxpose.xlu1.b32.cont [12/16] %v7203_v10, 128 }
 0x937   : > { %7252 = vxpose.xlu1.b32.cont [13/16] %v7204_v48, 128 }
 0x93b   : > { %7253 = vxpose.xlu1.b32.cont [14/16] %v7205_v4, 128 }
 0x93f   : > { %7254 = vxpose.xlu1.b32.cont [15/16] %v7206_v33, 128 }
 0x943   : > { %7255 = vxpose.xlu1.b32.end [16/16] %v7207_v58, 128 }
 0x967   : > { %v7224_v56 = vpop.trf.xlu0 }
 0x968   : > { %7272 = vst [vmem:[%s13224_s8] sm:$0xff] %v7224_v56 }
 0x96b   : > { %v7225_v7 = vpop.trf.xlu0 }
 0x96c   : > { %7274 = vst [vmem:[%s13224_s8 + $0x10] sm:$0xff] %v7225_v7 }
 0x96f   : > { %v7226_v52 = vpop.trf.xlu0 }
 0x970   : > { %7276 = vst [vmem:[%s13224_s8 + $0x20] sm:$0xff] %v7226_v52 }
 0x973   : > { %v7227_v37 = vpop.trf.xlu0 }
 0x974   : > { %7278 = vst [vmem:[%s13224_s8 + $0x30] sm:$0xff] %v7227_v37 }
 0x977   : > { %v7228_v5 = vpop.trf.xlu0 }
 0x978   : > { %7280 = vst [vmem:[%s13224_s8 + $0x40] sm:$0xff] %v7228_v5 }
 0x97b   : > { %v7229_v1 = vpop.trf.xlu0 }
 0x97c   : > { %7282 = vst [vmem:[%s13224_s8 + $0x50] sm:$0xff] %v7229_v1 }
 0x97f   : > { %v7230_v22 = vpop.trf.xlu0 }
 0x980   : > { %7284 = vst [vmem:[%s13224_s8 + $0x60] sm:$0xff] %v7230_v22 }
 0x983   : > { %v7231_v43 = vpop.trf.xlu0 }
 0x984   : > { %7286 = vst [vmem:[%s13224_s8 + $0x70] sm:$0xff] %v7231_v43 }
 0x987   : > { %v7256_v18 = vpop.trf.xlu1  ;;  %v7232_v59 = vpop.trf.xlu0 }
 0x988   : > { %7273 = vst [vmem:[%s13224_s8 + $0x8] sm:$0xff] %v7256_v18  ;;  %7288 = vst [vmem:[%s13224_s8 + $0x80] sm:$0xff] %v7232_v59 }
 0x98b   : > { %v7257_v36 = vpop.trf.xlu1  ;;  %v7233_v57 = vpop.trf.xlu0 }
 0x98c   : > { %7275 = vst [vmem:[%s13224_s8 + $0x18] sm:$0xff] %v7257_v36  ;;  %7290 = vst [vmem:[%s13224_s8 + $0x90] sm:$0xff] %v7233_v57 }
 0x98f   : > { %v7258_v19 = vpop.trf.xlu1  ;;  %v7234_v47 = vpop.trf.xlu0 }
 0x990   : > { %7277 = vst [vmem:[%s13224_s8 + $0x28] sm:$0xff] %v7258_v19  ;;  %7292 = vst [vmem:[%s13224_s8 + $0xa0] sm:$0xff] %v7234_v47 }
 0x993   : > { %v7259_v54 = vpop.trf.xlu1  ;;  %v7235_v8 = vpop.trf.xlu0 }
 0x994   : > { %7279 = vst [vmem:[%s13224_s8 + $0x38] sm:$0xff] %v7259_v54  ;;  %7294 = vst [vmem:[%s13224_s8 + $0xb0] sm:$0xff] %v7235_v8 }
 0x997   : > { %v7260_v53 = vpop.trf.xlu1  ;;  %v7236_v34 = vpop.trf.xlu0 }
 0x998   : > { %7281 = vst [vmem:[%s13224_s8 + $0x48] sm:$0xff] %v7260_v53  ;;  %7296 = vst [vmem:[%s13224_s8 + $0xc0] sm:$0xff] %v7236_v34 }
 0x99b   : > { %v7261_v12 = vpop.trf.xlu1  ;;  %v7237_v2 = vpop.trf.xlu0 }
 0x99c   : > { %7283 = vst [vmem:[%s13224_s8 + $0x58] sm:$0xff] %v7261_v12  ;;  %7298 = vst [vmem:[%s13224_s8 + $0xd0] sm:$0xff] %v7237_v2 }
 0x99f   : > { %v7262_v16 = vpop.trf.xlu1  ;;  %v7238_v0 = vpop.trf.xlu0 }
 0x9a0   : > { %7285 = vst [vmem:[%s13224_s8 + $0x68] sm:$0xff] %v7262_v16  ;;  %7300 = vst [vmem:[%s13224_s8 + $0xe0] sm:$0xff] %v7238_v0 }
 0x9a3   : > { %v7263_v35 = vpop.trf.xlu1  ;;  %v7239_v20 = vpop.trf.xlu0 }
 0x9a4   : > { %7287 = vst [vmem:[%s13224_s8 + $0x78] sm:$0xff] %v7263_v35  ;;  %7302 = vst [vmem:[%s13224_s8 + $0xf0] sm:$0xff] %v7239_v20 }
 0x9a7   : > { %v7264_v29 = vpop.trf.xlu1 }
 0x9a8   : > { %7289 = vst [vmem:[%s13224_s8 + $0x88] sm:$0xff] %v7264_v29 }
 0x9ab   : > { %v7265_v25 = vpop.trf.xlu1 }
 0x9ac   : > { %7291 = vst [vmem:[%s13224_s8 + $0x98] sm:$0xff] %v7265_v25 }
 0x9af   : > { %v7266_v3 = vpop.trf.xlu1 }
 0x9b0   : > { %7293 = vst [vmem:[%s13224_s8 + $0xa8] sm:$0xff] %v7266_v3 }
 0x9b3   : > { %v7267_v38 = vpop.trf.xlu1 }
 0x9b4   : > { %7295 = vst [vmem:[%s13224_s8 + $0xb8] sm:$0xff] %v7267_v38 }
 0x9b7   : > { %v7268_v24 = vpop.trf.xlu1 }
 0x9b8   : > { %7297 = vst [vmem:[%s13224_s8 + $0xc8] sm:$0xff] %v7268_v24 }
 0x9bb   : > { %v7269_v32 = vpop.trf.xlu1 }
 0x9bc   : > { %7299 = vst [vmem:[%s13224_s8 + $0xd8] sm:$0xff] %v7269_v32 }
 0x9bf   : > { %v7270_v28 = vpop.trf.xlu1 }
 0x9c0   : > { %7301 = vst [vmem:[%s13224_s8 + $0xe8] sm:$0xff] %v7270_v28 }
 0x9c3   : > { %v7271_v17 = vpop.trf.xlu1 }
 0x9c4   : > { %7303 = vst [vmem:[%s13224_s8 + $0xf8] sm:$0xff] %v7271_v17 }
 0x9c5 PF: > { %s16_s21 = sadd.s32 1, %s9829_s21  }
 0x9c6   : > { %p13_p4 = scmp.ge.s32.totalorder %s16_s21, 4  }
 0x9c8   :  { %15 = sbr.rel (!%p13_p4) target bundleno = 1 (0x1), region = 90 }

</bundles_post_ra>
